<compile_context>
chip_gen: v7x
topology: tpu7x:2x2x1
jax: 0.10.0
libtpu: 0.0.40
codegen_flags: <defaults>
</compile_context>

<pallas_src>
import functools

import jax
import jax.numpy as jnp
from jax import lax
from jax.experimental import pallas as pl
from jax.experimental.pallas import tpu as pltpu

EPS = 1e-5  # PyTorch BatchNorm1d default eps


# --------------------------------------------------------------------------
# In-kernel helpers (pure functions on jnp values)
# --------------------------------------------------------------------------

def _mmT(x, w):
    # x: (N, Din), w: (Dout, Din)  ->  (N, Dout); f32 accumulation on the MXU.
    return lax.dot_general(x, w, (((1,), (1,)), ((), ())),
                           preferred_element_type=jnp.float32)


def _sigmoid(x):
    # exact logistic via tanh: goes to the EUP slot and is numerically stable.
    return 0.5 * (jnp.tanh(0.5 * x) + 1.0)


def _val_embed(x, gamma, beta, w, b):
    # training-mode BatchNorm1d (batch stats over all B*T rows, biased var) + Linear.
    mean = jnp.mean(x, axis=0, keepdims=True)
    var = jnp.mean((x - mean) ** 2, axis=0, keepdims=True)
    xn = (x - mean) * lax.rsqrt(var + EPS) * gamma + beta
    return _mmT(xn, w) + b


# --------------------------------------------------------------------------
# Fused forward kernel
# --------------------------------------------------------------------------

def _fused_kernel(*refs, B, T, L, R, n_layers):
    it = iter(refs)
    nxt = lambda: next(it)

    # ---- unpack (order must match the wrapper's `inputs` list) ----
    meds = nxt()[...]; proc = nxt()[...]; lab = nxt()[...]
    outc = nxt()[...]; chart = nxt()[...]
    conds = nxt()[...]; demo4 = nxt()[...]

    med_p = (nxt()[...], nxt()[...], nxt()[...], nxt()[...])    # gamma, beta, W, b
    lab_p = (nxt()[...], nxt()[...], nxt()[...], nxt()[...])
    chart_p = (nxt()[...], nxt()[...], nxt()[...], nxt()[...])
    proc_M, proc_b = nxt()[...], nxt()[...]
    out_M, out_b = nxt()[...], nxt()[...]
    cond_M, cond_b = nxt()[...], nxt()[...]
    efw = nxt()                                                  # (5, L, L) ref, static first-axis index
    efb = nxt()[...]
    sfc_wc, sfc_wd, sfc_b = nxt()[...], nxt()[...], nxt()[...]
    sf2_w, sf2_b = nxt()[...], nxt()[...]
    lstm_p = [(nxt()[...], nxt()[...], nxt()[...], nxt()[...]) for _ in range(n_layers)]
    fc1_wh, fc1_ws, fc1_b, fc2_w = nxt()[...], nxt()[...], nxt()[...], nxt()[...]
    sig_ref, logit_ref = nxt(), nxt()

    # ---- time-series embeddings (all VMEM-resident, no HBM round trips) ----
    med_e = _val_embed(meds, *med_p)                 # (N, L)
    proc_e = _mmT(proc, proc_M) + proc_b             # folded CodeEmbed
    lab_e = _val_embed(lab, *lab_p)
    out_e = _mmT(outc, out_M) + out_b
    chart_e = _val_embed(chart, *chart_p)

    # ---- embedfc over concat [med, proc, lab, out, chart]: the concat is folded
    #      into 5 block matmuls, no (N, 5L) copy is materialized ----
    out1 = (efb
            + _mmT(med_e, efw[0]) + _mmT(proc_e, efw[1]) + _mmT(lab_e, efw[2])
            + _mmT(out_e, efw[3]) + _mmT(chart_e, efw[4]))       # (N, L), time-major rows

    # ---- static path: StatEmbed(conds) ++ demo embeds -> statfc -> statfc2 ----
    cond_e = _mmT(conds, cond_M) + cond_b                        # (B, L)
    stat = _mmT(cond_e, sfc_wc) + _mmT(demo4, sfc_wd) + sfc_b    # (B, L)
    out2 = _mmT(stat, sf2_w) + sf2_b                             # (B, R)

    # ---- multi-layer LSTM, batch_first, zero (h0, c0); PyTorch gate order i, f, g, o ----
    seq = out1                                                   # (T*B, Din), time-major
    h = jnp.zeros((B, R), jnp.float32)
    for (wih, whh, bih, bhh) in lstm_p:
        xg = _mmT(seq, wih) + bih                                # x@W_ih^T hoisted out of time loop
        h = jnp.zeros((B, R), jnp.float32)
        c = jnp.zeros((B, R), jnp.float32)
        hs = []
        for t in range(T):                                       # T is a small static constant
            g = xg[t * B:(t + 1) * B, :] + _mmT(h, whh) + bhh    # (B, 4R)
            i_g = _sigmoid(g[:, 0:R])
            f_g = _sigmoid(g[:, R:2 * R])
            g_g = jnp.tanh(g[:, 2 * R:3 * R])
            o_g = _sigmoid(g[:, 3 * R:4 * R])
            c = f_g * c + i_g * g_g
            h = o_g * jnp.tanh(c)
            hs.append(h)
        seq = jnp.concatenate(hs, axis=0)                        # (T*B, R) input to next layer
    code_h_n = h                                                 # h_n[-1]

    # ---- head: fc1(cat(h, out2)) -> fc2 (no bias) -> sigmoid ----
    pre = _mmT(code_h_n, fc1_wh) + _mmT(out2, fc1_ws) + fc1_b    # (B, R)
    logits = _mmT(pre, fc2_w)                                    # (B, 1)
    sig_ref[...] = _sigmoid(logits)
    logit_ref[...] = logits


# --------------------------------------------------------------------------
# Wrapper: weight folding / splitting (outside the kernel) + pallas_call
# --------------------------------------------------------------------------

def lstm_base_h_forward(params, cfg, meds, chart, out_c, proc, lab, conds, demo):
    B, T = meds.shape[0], meds.shape[1]
    L, R, NL = cfg["latent"], cfg["rnn"], cfg["rnnLayers"]
    N = B * T

    def tmf(x):  # (B, T, V) -> time-major (T*B, V) f32 so per-step rows are contiguous
        return jnp.transpose(x, (1, 0, 2)).reshape(N, x.shape[2]).astype(jnp.float32)

    def fold(emb, wfc):  # weight-only CodeEmbed fold: M[l, v] = sum_e W[l, v*E+e] * emb[v, e]
        V, E = emb.shape
        return jnp.sum(wfc.reshape(wfc.shape[0], V, E) * emb[None, :, :], axis=-1)

    row = lambda v: v.reshape(1, -1).astype(jnp.float32)

    # demo embeddings (padding_idx=0 rows zeroed at init); lane-dense (B, 4L) slab
    gender = jnp.take(params["gender_emb"], demo[:, 0], axis=0)
    eth = jnp.take(params["eth_emb"], demo[:, 1], axis=0)
    ins = jnp.take(params["ins_emb"], demo[:, 2], axis=0)
    age = jnp.take(params["age_emb"], demo[:, 3], axis=0)
    demo4 = jnp.concatenate([gender, eth, ins, age], axis=1).astype(jnp.float32)

    med_g, med_bn, med_w, med_fb = params["med"]
    lab_g, lab_bn, lab_w, lab_fb = params["lab"]
    chart_g, chart_bn, chart_w, chart_fb = params["chart"]
    proc_emb, proc_w, proc_fb = params["proc"]
    out_emb, out_w, out_fb = params["out"]
    cond_emb, cond_w, cond_fb = params["cond"]

    efw, efb = params["embedfc"]
    efw5 = efw.reshape(L, 5, L).transpose(1, 0, 2)   # efw5[m] == efw[:, m*L:(m+1)*L]
    sfw, sfb = params["statfc"]
    sf2w, sf2b = params["statfc2"]
    f1w, f1b = params["fc1"]
    f2w = params["fc2"]

    inputs = [
        tmf(meds), tmf(proc), tmf(lab), tmf(out_c), tmf(chart),
        conds.astype(jnp.float32), demo4,
        row(med_g), row(med_bn), med_w, row(med_fb),
        row(lab_g), row(lab_bn), lab_w, row(lab_fb),
        row(chart_g), row(chart_bn), chart_w, row(chart_fb),
        fold(proc_emb, proc_w), row(proc_fb),
        fold(out_emb, out_w), row(out_fb),
        fold(cond_emb, cond_w), row(cond_fb),
        efw5, row(efb),
        sfw[:, :L], sfw[:, L:], row(sfb),
        sf2w, row(sf2b),
    ]
    for (wih, whh, bih, bhh) in params["lstm"]:
        inputs += [wih, whh, row(bih), row(bhh)]
    inputs += [f1w[:, :R], f1w[:, R:], row(f1b), f2w]

    kern = functools.partial(_fused_kernel, B=B, T=T, L=L, R=R, n_layers=NL)

    # advisory cost estimate so XLA can schedule the tiny gathers/reshapes around us
    flops = 2 * N * L * sum(x.shape[-1] for x in (meds, proc, lab, out_c, chart))
    flops += 2 * N * 5 * L * L
    din = L
    for _ in range(NL):
        flops += 2 * N * 4 * R * din + 2 * N * 4 * R * R
        din = R
    flops += 2 * B * (L * conds.shape[-1] + 5 * L * L + R * L + 2 * R * R + R)
    cost = pl.CostEstimate(
        flops=int(flops),
        transcendentals=int(NL * N * R * 5 + B),
        bytes_accessed=int(sum(x.size for x in inputs) * 4 + 2 * B * 4))

    vmem = pl.BlockSpec(memory_space=pltpu.MemorySpace.VMEM)
    # TODO(synk): at MIMIC-scale B*T the embed/embedfc path should get a row grid
    #             (parallel axis, ~512-row tiles sized for v7x's 64 MiB VMEM); at these
    #             toy sizes a single grid-less invocation is optimal.
    sig, logits = pl.pallas_call(
        kern,
        out_shape=(jax.ShapeDtypeStruct((B, 1), jnp.float32),
                   jax.ShapeDtypeStruct((B, 1), jnp.float32)),
        in_specs=[vmem] * len(inputs),
        out_specs=(vmem, vmem),
        compiler_params=pltpu.CompilerParams(vmem_limit_bytes=32 * 1024 * 1024),
        cost_estimate=cost,
    )(*inputs)
    return sig, logits


# --------------------------------------------------------------------------
# Parameter construction (deterministic, synthetic; PyTorch-shaped)
# --------------------------------------------------------------------------

def init_params(key, cfg):
    keys = iter(jax.random.split(key, 64))

    def nrm(shape, scale=0.1):
        return (scale * jax.random.normal(next(keys), shape)).astype(jnp.float32)

    L, E, R, NL = cfg["latent"], cfg["embed"], cfg["rnn"], cfg["rnnLayers"]
    p = {}
    # ValEmbed: BatchNorm1d(V) affine + Linear(V, L)
    for name, V in [("med", cfg["med_v"]), ("chart", cfg["chart_v"]), ("lab", cfg["lab_v"])]:
        p[name] = (jnp.ones((V,), jnp.float32), jnp.zeros((V,), jnp.float32),
                   nrm((L, V)), nrm((L,)))
    # CodeEmbed / StatEmbed: Embedding(V, E) + Linear(V*E, L)
    for name, V in [("proc", cfg["proc_v"]), ("out", cfg["out_v"]), ("cond", cfg["cond_v"])]:
        p[name] = (nrm((V, E)), nrm((L, V * E)), nrm((L,)))
    # demo embeddings (padding_idx=0 -> row 0 zeroed)
    for name, V in [("gender", cfg["gender_v"]), ("eth", cfg["eth_v"]),
                    ("ins", cfg["ins_v"]), ("age", cfg["age_v"])]:
        p[name + "_emb"] = nrm((V, L)).at[0].set(0.0)
    p["embedfc"] = (nrm((L, 5 * L)), nrm((L,)))     # latent*(modalities-1), modalities=6
    p["statfc"] = (nrm((L, 5 * L)), nrm((L,)))
    p["statfc2"] = (nrm((R, L)), nrm((R,)))
    lstm, din = [], L
    for _ in range(NL):
        lstm.append((nrm((4 * R, din)), nrm((4 * R, R)), nrm((4 * R,)), nrm((4 * R,))))
        din = R
    p["lstm"] = lstm
    p["fc1"] = (nrm((R, 2 * R)), nrm((R,)))
    p["fc2"] = nrm((1, R))                          # bias=False
    return p


# --------------------------------------------------------------------------
# Main
# --------------------------------------------------------------------------

if __name__ == "__main__":
    cfg = dict(B=2, T=8, embed=8, latent=32, rnn=16, rnnLayers=2,
               med_v=5, proc_v=6, out_v=7, chart_v=9, lab_v=10, cond_v=11,
               eth_v=3, gender_v=2, age_v=4, ins_v=3)

    root = jax.random.PRNGKey(0)
    k_par, k_in = jax.random.split(root)
    params = init_params(k_par, cfg)

    ki = iter(jax.random.split(k_in, 16))
    B, T = cfg["B"], cfg["T"]
    meds = jax.random.normal(next(ki), (B, T, cfg["med_v"]), jnp.float32)
    chart = jax.random.normal(next(ki), (B, T, cfg["chart_v"]), jnp.float32)
    out_c = jax.random.bernoulli(next(ki), 0.4, (B, T, cfg["out_v"])).astype(jnp.float32)
    proc = jax.random.bernoulli(next(ki), 0.4, (B, T, cfg["proc_v"])).astype(jnp.float32)
    lab = jax.random.normal(next(ki), (B, T, cfg["lab_v"]), jnp.float32)
    conds = jax.random.bernoulli(next(ki), 0.4, (B, cfg["cond_v"])).astype(jnp.float32)
    demo = jnp.stack([
        jax.random.randint(next(ki), (B,), 0, cfg["gender_v"]),
        jax.random.randint(next(ki), (B,), 0, cfg["eth_v"]),
        jax.random.randint(next(ki), (B,), 0, cfg["ins_v"]),
        jax.random.randint(next(ki), (B,), 0, cfg["age_v"]),
    ], axis=1)

    fwd = jax.jit(lambda p, *a: lstm_base_h_forward(p, cfg, *a))
    sigout, logits = fwd(params, meds, chart, out_c, proc, lab, conds, demo)
    jax.block_until_ready((sigout, logits))
    assert sigout.shape == (B, 1) and logits.shape == (B, 1)
    assert bool(jnp.all(jnp.isfinite(sigout))) and bool(jnp.all(jnp.isfinite(logits)))
    print("KERNEL_OK")
</pallas_src>

<mosaic_0001>
module attributes {stable_mosaic.version = 11 : i64} {
  func.func @_fused_kernel(%arg0: memref<16x5xf32, #tpu.memory_space<vmem>>, %arg1: memref<16x6xf32, #tpu.memory_space<vmem>>, %arg2: memref<16x10xf32, #tpu.memory_space<vmem>>, %arg3: memref<16x7xf32, #tpu.memory_space<vmem>>, %arg4: memref<16x9xf32, #tpu.memory_space<vmem>>, %arg5: memref<2x11xf32, #tpu.memory_space<vmem>>, %arg6: memref<2x128xf32, #tpu.memory_space<vmem>>, %arg7: memref<1x5xf32, #tpu.memory_space<vmem>>, %arg8: memref<1x5xf32, #tpu.memory_space<vmem>>, %arg9: memref<32x5xf32, #tpu.memory_space<vmem>>, %arg10: memref<1x32xf32, #tpu.memory_space<vmem>>, %arg11: memref<1x10xf32, #tpu.memory_space<vmem>>, %arg12: memref<1x10xf32, #tpu.memory_space<vmem>>, %arg13: memref<32x10xf32, #tpu.memory_space<vmem>>, %arg14: memref<1x32xf32, #tpu.memory_space<vmem>>, %arg15: memref<1x9xf32, #tpu.memory_space<vmem>>, %arg16: memref<1x9xf32, #tpu.memory_space<vmem>>, %arg17: memref<32x9xf32, #tpu.memory_space<vmem>>, %arg18: memref<1x32xf32, #tpu.memory_space<vmem>>, %arg19: memref<32x6xf32, #tpu.memory_space<vmem>>, %arg20: memref<1x32xf32, #tpu.memory_space<vmem>>, %arg21: memref<32x7xf32, #tpu.memory_space<vmem>>, %arg22: memref<1x32xf32, #tpu.memory_space<vmem>>, %arg23: memref<32x11xf32, #tpu.memory_space<vmem>>, %arg24: memref<1x32xf32, #tpu.memory_space<vmem>>, %arg25: memref<5x32x32xf32, #tpu.memory_space<vmem>>, %arg26: memref<1x32xf32, #tpu.memory_space<vmem>>, %arg27: memref<32x32xf32, #tpu.memory_space<vmem>>, %arg28: memref<32x128xf32, #tpu.memory_space<vmem>>, %arg29: memref<1x32xf32, #tpu.memory_space<vmem>>, %arg30: memref<16x32xf32, #tpu.memory_space<vmem>>, %arg31: memref<1x16xf32, #tpu.memory_space<vmem>>, %arg32: memref<64x32xf32, #tpu.memory_space<vmem>>, %arg33: memref<64x16xf32, #tpu.memory_space<vmem>>, %arg34: memref<1x64xf32, #tpu.memory_space<vmem>>, %arg35: memref<1x64xf32, #tpu.memory_space<vmem>>, %arg36: memref<64x16xf32, #tpu.memory_space<vmem>>, %arg37: memref<64x16xf32, #tpu.memory_space<vmem>>, %arg38: memref<1x64xf32, #tpu.memory_space<vmem>>, %arg39: memref<1x64xf32, #tpu.memory_space<vmem>>, %arg40: memref<16x16xf32, #tpu.memory_space<vmem>>, %arg41: memref<16x16xf32, #tpu.memory_space<vmem>>, %arg42: memref<1x16xf32, #tpu.memory_space<vmem>>, %arg43: memref<1x16xf32, #tpu.memory_space<vmem>>, %arg44: memref<2x1xf32, #tpu.memory_space<vmem>>, %arg45: memref<2x1xf32, #tpu.memory_space<vmem>>) attributes {dimension_semantics = [], scalar_prefetch = 0 : i64, scratch_operands = 0 : i64, tpu.core_type = #tpu.core_type<tc>} {
    %c0 = arith.constant 0 : index
    %c0_0 = arith.constant 0 : index
    %0 = vector.load %arg0[%c0, %c0_0] : memref<16x5xf32, #tpu.memory_space<vmem>>, vector<16x5xf32>
    %c0_1 = arith.constant 0 : index
    %c0_2 = arith.constant 0 : index
    %1 = vector.load %arg1[%c0_1, %c0_2] : memref<16x6xf32, #tpu.memory_space<vmem>>, vector<16x6xf32>
    %c0_3 = arith.constant 0 : index
    %c0_4 = arith.constant 0 : index
    %2 = vector.load %arg2[%c0_3, %c0_4] : memref<16x10xf32, #tpu.memory_space<vmem>>, vector<16x10xf32>
    %c0_5 = arith.constant 0 : index
    %c0_6 = arith.constant 0 : index
    %3 = vector.load %arg3[%c0_5, %c0_6] : memref<16x7xf32, #tpu.memory_space<vmem>>, vector<16x7xf32>
    %c0_7 = arith.constant 0 : index
    %c0_8 = arith.constant 0 : index
    %4 = vector.load %arg4[%c0_7, %c0_8] : memref<16x9xf32, #tpu.memory_space<vmem>>, vector<16x9xf32>
    %c0_9 = arith.constant 0 : index
    %c0_10 = arith.constant 0 : index
    %5 = vector.load %arg5[%c0_9, %c0_10] : memref<2x11xf32, #tpu.memory_space<vmem>>, vector<2x11xf32>
    %c0_11 = arith.constant 0 : index
    %c0_12 = arith.constant 0 : index
    %6 = vector.load %arg6[%c0_11, %c0_12] : memref<2x128xf32, #tpu.memory_space<vmem>>, vector<2x128xf32>
    %c0_13 = arith.constant 0 : index
    %c0_14 = arith.constant 0 : index
    %7 = vector.load %arg7[%c0_13, %c0_14] : memref<1x5xf32, #tpu.memory_space<vmem>>, vector<1x5xf32>
    %c0_15 = arith.constant 0 : index
    %c0_16 = arith.constant 0 : index
    %8 = vector.load %arg8[%c0_15, %c0_16] : memref<1x5xf32, #tpu.memory_space<vmem>>, vector<1x5xf32>
    %c0_17 = arith.constant 0 : index
    %c0_18 = arith.constant 0 : index
    %9 = vector.load %arg9[%c0_17, %c0_18] : memref<32x5xf32, #tpu.memory_space<vmem>>, vector<32x5xf32>
    %c0_19 = arith.constant 0 : index
    %c0_20 = arith.constant 0 : index
    %10 = vector.load %arg10[%c0_19, %c0_20] : memref<1x32xf32, #tpu.memory_space<vmem>>, vector<1x32xf32>
    %c0_21 = arith.constant 0 : index
    %c0_22 = arith.constant 0 : index
    %11 = vector.load %arg11[%c0_21, %c0_22] : memref<1x10xf32, #tpu.memory_space<vmem>>, vector<1x10xf32>
    %c0_23 = arith.constant 0 : index
    %c0_24 = arith.constant 0 : index
    %12 = vector.load %arg12[%c0_23, %c0_24] : memref<1x10xf32, #tpu.memory_space<vmem>>, vector<1x10xf32>
    %c0_25 = arith.constant 0 : index
    %c0_26 = arith.constant 0 : index
    %13 = vector.load %arg13[%c0_25, %c0_26] : memref<32x10xf32, #tpu.memory_space<vmem>>, vector<32x10xf32>
    %c0_27 = arith.constant 0 : index
    %c0_28 = arith.constant 0 : index
    %14 = vector.load %arg14[%c0_27, %c0_28] : memref<1x32xf32, #tpu.memory_space<vmem>>, vector<1x32xf32>
    %c0_29 = arith.constant 0 : index
    %c0_30 = arith.constant 0 : index
    %15 = vector.load %arg15[%c0_29, %c0_30] : memref<1x9xf32, #tpu.memory_space<vmem>>, vector<1x9xf32>
    %c0_31 = arith.constant 0 : index
    %c0_32 = arith.constant 0 : index
    %16 = vector.load %arg16[%c0_31, %c0_32] : memref<1x9xf32, #tpu.memory_space<vmem>>, vector<1x9xf32>
    %c0_33 = arith.constant 0 : index
    %c0_34 = arith.constant 0 : index
    %17 = vector.load %arg17[%c0_33, %c0_34] : memref<32x9xf32, #tpu.memory_space<vmem>>, vector<32x9xf32>
    %c0_35 = arith.constant 0 : index
    %c0_36 = arith.constant 0 : index
    %18 = vector.load %arg18[%c0_35, %c0_36] : memref<1x32xf32, #tpu.memory_space<vmem>>, vector<1x32xf32>
    %c0_37 = arith.constant 0 : index
    %c0_38 = arith.constant 0 : index
    %19 = vector.load %arg19[%c0_37, %c0_38] : memref<32x6xf32, #tpu.memory_space<vmem>>, vector<32x6xf32>
    %c0_39 = arith.constant 0 : index
    %c0_40 = arith.constant 0 : index
    %20 = vector.load %arg20[%c0_39, %c0_40] : memref<1x32xf32, #tpu.memory_space<vmem>>, vector<1x32xf32>
    %c0_41 = arith.constant 0 : index
    %c0_42 = arith.constant 0 : index
    %21 = vector.load %arg21[%c0_41, %c0_42] : memref<32x7xf32, #tpu.memory_space<vmem>>, vector<32x7xf32>
    %c0_43 = arith.constant 0 : index
    %c0_44 = arith.constant 0 : index
    %22 = vector.load %arg22[%c0_43, %c0_44] : memref<1x32xf32, #tpu.memory_space<vmem>>, vector<1x32xf32>
    %c0_45 = arith.constant 0 : index
    %c0_46 = arith.constant 0 : index
    %23 = vector.load %arg23[%c0_45, %c0_46] : memref<32x11xf32, #tpu.memory_space<vmem>>, vector<32x11xf32>
    %c0_47 = arith.constant 0 : index
    %c0_48 = arith.constant 0 : index
    %24 = vector.load %arg24[%c0_47, %c0_48] : memref<1x32xf32, #tpu.memory_space<vmem>>, vector<1x32xf32>
    %c0_49 = arith.constant 0 : index
    %c0_50 = arith.constant 0 : index
    %25 = vector.load %arg26[%c0_49, %c0_50] : memref<1x32xf32, #tpu.memory_space<vmem>>, vector<1x32xf32>
    %c0_51 = arith.constant 0 : index
    %c0_52 = arith.constant 0 : index
    %26 = vector.load %arg27[%c0_51, %c0_52] : memref<32x32xf32, #tpu.memory_space<vmem>>, vector<32x32xf32>
    %c0_53 = arith.constant 0 : index
    %c0_54 = arith.constant 0 : index
    %27 = vector.load %arg28[%c0_53, %c0_54] : memref<32x128xf32, #tpu.memory_space<vmem>>, vector<32x128xf32>
    %c0_55 = arith.constant 0 : index
    %c0_56 = arith.constant 0 : index
    %28 = vector.load %arg29[%c0_55, %c0_56] : memref<1x32xf32, #tpu.memory_space<vmem>>, vector<1x32xf32>
    %c0_57 = arith.constant 0 : index
    %c0_58 = arith.constant 0 : index
    %29 = vector.load %arg30[%c0_57, %c0_58] : memref<16x32xf32, #tpu.memory_space<vmem>>, vector<16x32xf32>
    %c0_59 = arith.constant 0 : index
    %c0_60 = arith.constant 0 : index
    %30 = vector.load %arg31[%c0_59, %c0_60] : memref<1x16xf32, #tpu.memory_space<vmem>>, vector<1x16xf32>
    %c0_61 = arith.constant 0 : index
    %c0_62 = arith.constant 0 : index
    %31 = vector.load %arg32[%c0_61, %c0_62] : memref<64x32xf32, #tpu.memory_space<vmem>>, vector<64x32xf32>
    %c0_63 = arith.constant 0 : index
    %c0_64 = arith.constant 0 : index
    %32 = vector.load %arg33[%c0_63, %c0_64] : memref<64x16xf32, #tpu.memory_space<vmem>>, vector<64x16xf32>
    %c0_65 = arith.constant 0 : index
    %c0_66 = arith.constant 0 : index
    %33 = vector.load %arg34[%c0_65, %c0_66] : memref<1x64xf32, #tpu.memory_space<vmem>>, vector<1x64xf32>
    %c0_67 = arith.constant 0 : index
    %c0_68 = arith.constant 0 : index
    %34 = vector.load %arg35[%c0_67, %c0_68] : memref<1x64xf32, #tpu.memory_space<vmem>>, vector<1x64xf32>
    %c0_69 = arith.constant 0 : index
    %c0_70 = arith.constant 0 : index
    %35 = vector.load %arg36[%c0_69, %c0_70] : memref<64x16xf32, #tpu.memory_space<vmem>>, vector<64x16xf32>
    %c0_71 = arith.constant 0 : index
    %c0_72 = arith.constant 0 : index
    %36 = vector.load %arg37[%c0_71, %c0_72] : memref<64x16xf32, #tpu.memory_space<vmem>>, vector<64x16xf32>
    %c0_73 = arith.constant 0 : index
    %c0_74 = arith.constant 0 : index
    %37 = vector.load %arg38[%c0_73, %c0_74] : memref<1x64xf32, #tpu.memory_space<vmem>>, vector<1x64xf32>
    %c0_75 = arith.constant 0 : index
    %c0_76 = arith.constant 0 : index
    %38 = vector.load %arg39[%c0_75, %c0_76] : memref<1x64xf32, #tpu.memory_space<vmem>>, vector<1x64xf32>
    %c0_77 = arith.constant 0 : index
    %c0_78 = arith.constant 0 : index
    %39 = vector.load %arg40[%c0_77, %c0_78] : memref<16x16xf32, #tpu.memory_space<vmem>>, vector<16x16xf32>
    %c0_79 = arith.constant 0 : index
    %c0_80 = arith.constant 0 : index
    %40 = vector.load %arg41[%c0_79, %c0_80] : memref<16x16xf32, #tpu.memory_space<vmem>>, vector<16x16xf32>
    %c0_81 = arith.constant 0 : index
    %c0_82 = arith.constant 0 : index
    %41 = vector.load %arg42[%c0_81, %c0_82] : memref<1x16xf32, #tpu.memory_space<vmem>>, vector<1x16xf32>
    %c0_83 = arith.constant 0 : index
    %c0_84 = arith.constant 0 : index
    %42 = vector.load %arg43[%c0_83, %c0_84] : memref<1x16xf32, #tpu.memory_space<vmem>>, vector<1x16xf32>
    %cst = arith.constant dense<0.000000e+00> : vector<5xf32>
    %43 = vector.multi_reduction <add>, %0, %cst [0] : vector<16x5xf32> to vector<5xf32>
    %44 = vector.shape_cast %43 : vector<5xf32> to vector<1x5xf32>
    %cst_85 = arith.constant 1.600000e+01 : f32
    %45 = vector.broadcast %cst_85 : f32 to vector<1x5xf32>
    %46 = arith.divf %44, %45 : vector<1x5xf32>
    %47 = vector.broadcast %46 : vector<1x5xf32> to vector<16x5xf32>
    %48 = arith.subf %0, %47 : vector<16x5xf32>
    %49 = arith.mulf %48, %48 : vector<16x5xf32>
    %cst_86 = arith.constant dense<0.000000e+00> : vector<5xf32>
    %50 = vector.multi_reduction <add>, %49, %cst_86 [0] : vector<16x5xf32> to vector<5xf32>
    %51 = vector.shape_cast %50 : vector<5xf32> to vector<1x5xf32>
    %cst_87 = arith.constant 1.600000e+01 : f32
    %52 = vector.broadcast %cst_87 : f32 to vector<1x5xf32>
    %53 = arith.divf %51, %52 : vector<1x5xf32>
    %54 = vector.broadcast %46 : vector<1x5xf32> to vector<16x5xf32>
    %55 = arith.subf %0, %54 : vector<16x5xf32>
    %cst_88 = arith.constant 9.99999974E-6 : f32
    %56 = vector.broadcast %cst_88 : f32 to vector<1x5xf32>
    %57 = arith.addf %53, %56 : vector<1x5xf32>
    %58 = math.rsqrt %57 : vector<1x5xf32>
    %59 = vector.broadcast %58 : vector<1x5xf32> to vector<16x5xf32>
    %60 = arith.mulf %55, %59 : vector<16x5xf32>
    %61 = vector.broadcast %7 : vector<1x5xf32> to vector<16x5xf32>
    %62 = arith.mulf %60, %61 : vector<16x5xf32>
    %63 = vector.broadcast %8 : vector<1x5xf32> to vector<16x5xf32>
    %64 = arith.addf %62, %63 : vector<16x5xf32>
    %cst_89 = arith.constant dense<0.000000e+00> : vector<16x32xf32>
    %65 = tpu.matmul %64, %9, %cst_89 {dimension_numbers = #tpu.dot_dimension_numbers<[1], [1], [0], [0], [0, 0, 1, 0], [], []>} : vector<16x5xf32>, vector<32x5xf32>, vector<16x32xf32> -> vector<16x32xf32>
    %66 = vector.broadcast %10 : vector<1x32xf32> to vector<16x32xf32>
    %67 = arith.addf %65, %66 : vector<16x32xf32>
    %cst_90 = arith.constant dense<0.000000e+00> : vector<16x32xf32>
    %68 = tpu.matmul %1, %19, %cst_90 {dimension_numbers = #tpu.dot_dimension_numbers<[1], [1], [0], [0], [0, 0, 1, 0], [], []>} : vector<16x6xf32>, vector<32x6xf32>, vector<16x32xf32> -> vector<16x32xf32>
    %69 = vector.broadcast %20 : vector<1x32xf32> to vector<16x32xf32>
    %70 = arith.addf %68, %69 : vector<16x32xf32>
    %cst_91 = arith.constant dense<0.000000e+00> : vector<10xf32>
    %71 = vector.multi_reduction <add>, %2, %cst_91 [0] : vector<16x10xf32> to vector<10xf32>
    %72 = vector.shape_cast %71 : vector<10xf32> to vector<1x10xf32>
    %cst_92 = arith.constant 1.600000e+01 : f32
    %73 = vector.broadcast %cst_92 : f32 to vector<1x10xf32>
    %74 = arith.divf %72, %73 : vector<1x10xf32>
    %75 = vector.broadcast %74 : vector<1x10xf32> to vector<16x10xf32>
    %76 = arith.subf %2, %75 : vector<16x10xf32>
    %77 = arith.mulf %76, %76 : vector<16x10xf32>
    %cst_93 = arith.constant dense<0.000000e+00> : vector<10xf32>
    %78 = vector.multi_reduction <add>, %77, %cst_93 [0] : vector<16x10xf32> to vector<10xf32>
    %79 = vector.shape_cast %78 : vector<10xf32> to vector<1x10xf32>
    %cst_94 = arith.constant 1.600000e+01 : f32
    %80 = vector.broadcast %cst_94 : f32 to vector<1x10xf32>
    %81 = arith.divf %79, %80 : vector<1x10xf32>
    %82 = vector.broadcast %74 : vector<1x10xf32> to vector<16x10xf32>
    %83 = arith.subf %2, %82 : vector<16x10xf32>
    %cst_95 = arith.constant 9.99999974E-6 : f32
    %84 = vector.broadcast %cst_95 : f32 to vector<1x10xf32>
    %85 = arith.addf %81, %84 : vector<1x10xf32>
    %86 = math.rsqrt %85 : vector<1x10xf32>
    %87 = vector.broadcast %86 : vector<1x10xf32> to vector<16x10xf32>
    %88 = arith.mulf %83, %87 : vector<16x10xf32>
    %89 = vector.broadcast %11 : vector<1x10xf32> to vector<16x10xf32>
    %90 = arith.mulf %88, %89 : vector<16x10xf32>
    %91 = vector.broadcast %12 : vector<1x10xf32> to vector<16x10xf32>
    %92 = arith.addf %90, %91 : vector<16x10xf32>
    %cst_96 = arith.constant dense<0.000000e+00> : vector<16x32xf32>
    %93 = tpu.matmul %92, %13, %cst_96 {dimension_numbers = #tpu.dot_dimension_numbers<[1], [1], [0], [0], [0, 0, 1, 0], [], []>} : vector<16x10xf32>, vector<32x10xf32>, vector<16x32xf32> -> vector<16x32xf32>
    %94 = vector.broadcast %14 : vector<1x32xf32> to vector<16x32xf32>
    %95 = arith.addf %93, %94 : vector<16x32xf32>
    %cst_97 = arith.constant dense<0.000000e+00> : vector<16x32xf32>
    %96 = tpu.matmul %3, %21, %cst_97 {dimension_numbers = #tpu.dot_dimension_numbers<[1], [1], [0], [0], [0, 0, 1, 0], [], []>} : vector<16x7xf32>, vector<32x7xf32>, vector<16x32xf32> -> vector<16x32xf32>
    %97 = vector.broadcast %22 : vector<1x32xf32> to vector<16x32xf32>
    %98 = arith.addf %96, %97 : vector<16x32xf32>
    %cst_98 = arith.constant dense<0.000000e+00> : vector<9xf32>
    %99 = vector.multi_reduction <add>, %4, %cst_98 [0] : vector<16x9xf32> to vector<9xf32>
    %100 = vector.shape_cast %99 : vector<9xf32> to vector<1x9xf32>
    %cst_99 = arith.constant 1.600000e+01 : f32
    %101 = vector.broadcast %cst_99 : f32 to vector<1x9xf32>
    %102 = arith.divf %100, %101 : vector<1x9xf32>
    %103 = vector.broadcast %102 : vector<1x9xf32> to vector<16x9xf32>
    %104 = arith.subf %4, %103 : vector<16x9xf32>
    %105 = arith.mulf %104, %104 : vector<16x9xf32>
    %cst_100 = arith.constant dense<0.000000e+00> : vector<9xf32>
    %106 = vector.multi_reduction <add>, %105, %cst_100 [0] : vector<16x9xf32> to vector<9xf32>
    %107 = vector.shape_cast %106 : vector<9xf32> to vector<1x9xf32>
    %cst_101 = arith.constant 1.600000e+01 : f32
    %108 = vector.broadcast %cst_101 : f32 to vector<1x9xf32>
    %109 = arith.divf %107, %108 : vector<1x9xf32>
    %110 = vector.broadcast %102 : vector<1x9xf32> to vector<16x9xf32>
    %111 = arith.subf %4, %110 : vector<16x9xf32>
    %cst_102 = arith.constant 9.99999974E-6 : f32
    %112 = vector.broadcast %cst_102 : f32 to vector<1x9xf32>
    %113 = arith.addf %109, %112 : vector<1x9xf32>
    %114 = math.rsqrt %113 : vector<1x9xf32>
    %115 = vector.broadcast %114 : vector<1x9xf32> to vector<16x9xf32>
    %116 = arith.mulf %111, %115 : vector<16x9xf32>
    %117 = vector.broadcast %15 : vector<1x9xf32> to vector<16x9xf32>
    %118 = arith.mulf %116, %117 : vector<16x9xf32>
    %119 = vector.broadcast %16 : vector<1x9xf32> to vector<16x9xf32>
    %120 = arith.addf %118, %119 : vector<16x9xf32>
    %cst_103 = arith.constant dense<0.000000e+00> : vector<16x32xf32>
    %121 = tpu.matmul %120, %17, %cst_103 {dimension_numbers = #tpu.dot_dimension_numbers<[1], [1], [0], [0], [0, 0, 1, 0], [], []>} : vector<16x9xf32>, vector<32x9xf32>, vector<16x32xf32> -> vector<16x32xf32>
    %122 = vector.broadcast %18 : vector<1x32xf32> to vector<16x32xf32>
    %123 = arith.addf %121, %122 : vector<16x32xf32>
    %c0_104 = arith.constant 0 : index
    %c0_105 = arith.constant 0 : index
    %c0_106 = arith.constant 0 : index
    %124 = vector.load %arg25[%c0_104, %c0_105, %c0_106] : memref<5x32x32xf32, #tpu.memory_space<vmem>>, vector<1x32x32xf32>
    %125 = vector.shape_cast %124 : vector<1x32x32xf32> to vector<32x32xf32>
    %cst_107 = arith.constant dense<0.000000e+00> : vector<16x32xf32>
    %126 = tpu.matmul %67, %125, %cst_107 {dimension_numbers = #tpu.dot_dimension_numbers<[1], [1], [0], [0], [0, 0, 1, 0], [], []>} : vector<16x32xf32>, vector<32x32xf32>, vector<16x32xf32> -> vector<16x32xf32>
    %127 = vector.broadcast %25 : vector<1x32xf32> to vector<16x32xf32>
    %128 = arith.addf %127, %126 : vector<16x32xf32>
    %c1 = arith.constant 1 : index
    %c0_108 = arith.constant 0 : index
    %c0_109 = arith.constant 0 : index
    %129 = vector.load %arg25[%c1, %c0_108, %c0_109] : memref<5x32x32xf32, #tpu.memory_space<vmem>>, vector<1x32x32xf32>
    %130 = vector.shape_cast %129 : vector<1x32x32xf32> to vector<32x32xf32>
    %cst_110 = arith.constant dense<0.000000e+00> : vector<16x32xf32>
    %131 = tpu.matmul %70, %130, %cst_110 {dimension_numbers = #tpu.dot_dimension_numbers<[1], [1], [0], [0], [0, 0, 1, 0], [], []>} : vector<16x32xf32>, vector<32x32xf32>, vector<16x32xf32> -> vector<16x32xf32>
    %132 = arith.addf %128, %131 : vector<16x32xf32>
    %c2 = arith.constant 2 : index
    %c0_111 = arith.constant 0 : index
    %c0_112 = arith.constant 0 : index
    %133 = vector.load %arg25[%c2, %c0_111, %c0_112] : memref<5x32x32xf32, #tpu.memory_space<vmem>>, vector<1x32x32xf32>
    %134 = vector.shape_cast %133 : vector<1x32x32xf32> to vector<32x32xf32>
    %cst_113 = arith.constant dense<0.000000e+00> : vector<16x32xf32>
    %135 = tpu.matmul %95, %134, %cst_113 {dimension_numbers = #tpu.dot_dimension_numbers<[1], [1], [0], [0], [0, 0, 1, 0], [], []>} : vector<16x32xf32>, vector<32x32xf32>, vector<16x32xf32> -> vector<16x32xf32>
    %136 = arith.addf %132, %135 : vector<16x32xf32>
    %c3 = arith.constant 3 : index
    %c0_114 = arith.constant 0 : index
    %c0_115 = arith.constant 0 : index
    %137 = vector.load %arg25[%c3, %c0_114, %c0_115] : memref<5x32x32xf32, #tpu.memory_space<vmem>>, vector<1x32x32xf32>
    %138 = vector.shape_cast %137 : vector<1x32x32xf32> to vector<32x32xf32>
    %cst_116 = arith.constant dense<0.000000e+00> : vector<16x32xf32>
    %139 = tpu.matmul %98, %138, %cst_116 {dimension_numbers = #tpu.dot_dimension_numbers<[1], [1], [0], [0], [0, 0, 1, 0], [], []>} : vector<16x32xf32>, vector<32x32xf32>, vector<16x32xf32> -> vector<16x32xf32>
    %140 = arith.addf %136, %139 : vector<16x32xf32>
    %c4 = arith.constant 4 : index
    %c0_117 = arith.constant 0 : index
    %c0_118 = arith.constant 0 : index
    %141 = vector.load %arg25[%c4, %c0_117, %c0_118] : memref<5x32x32xf32, #tpu.memory_space<vmem>>, vector<1x32x32xf32>
    %142 = vector.shape_cast %141 : vector<1x32x32xf32> to vector<32x32xf32>
    %cst_119 = arith.constant dense<0.000000e+00> : vector<16x32xf32>
    %143 = tpu.matmul %123, %142, %cst_119 {dimension_numbers = #tpu.dot_dimension_numbers<[1], [1], [0], [0], [0, 0, 1, 0], [], []>} : vector<16x32xf32>, vector<32x32xf32>, vector<16x32xf32> -> vector<16x32xf32>
    %144 = arith.addf %140, %143 : vector<16x32xf32>
    %cst_120 = arith.constant dense<0.000000e+00> : vector<2x32xf32>
    %145 = tpu.matmul %5, %23, %cst_120 {dimension_numbers = #tpu.dot_dimension_numbers<[1], [1], [0], [0], [0, 0, 1, 0], [], []>} : vector<2x11xf32>, vector<32x11xf32>, vector<2x32xf32> -> vector<2x32xf32>
    %146 = vector.broadcast %24 : vector<1x32xf32> to vector<2x32xf32>
    %147 = arith.addf %145, %146 : vector<2x32xf32>
    %cst_121 = arith.constant dense<0.000000e+00> : vector<2x32xf32>
    %148 = tpu.matmul %147, %26, %cst_121 {dimension_numbers = #tpu.dot_dimension_numbers<[1], [1], [0], [0], [0, 0, 1, 0], [], []>} : vector<2x32xf32>, vector<32x32xf32>, vector<2x32xf32> -> vector<2x32xf32>
    %cst_122 = arith.constant dense<0.000000e+00> : vector<2x32xf32>
    %149 = tpu.matmul %6, %27, %cst_122 {dimension_numbers = #tpu.dot_dimension_numbers<[1], [1], [0], [0], [0, 0, 1, 0], [], []>} : vector<2x128xf32>, vector<32x128xf32>, vector<2x32xf32> -> vector<2x32xf32>
    %150 = arith.addf %148, %149 : vector<2x32xf32>
    %151 = vector.broadcast %28 : vector<1x32xf32> to vector<2x32xf32>
    %152 = arith.addf %150, %151 : vector<2x32xf32>
    %cst_123 = arith.constant dense<0.000000e+00> : vector<2x16xf32>
    %153 = tpu.matmul %152, %29, %cst_123 {dimension_numbers = #tpu.dot_dimension_numbers<[1], [1], [0], [0], [0, 0, 1, 0], [], []>} : vector<2x32xf32>, vector<16x32xf32>, vector<2x16xf32> -> vector<2x16xf32>
    %154 = vector.broadcast %30 : vector<1x16xf32> to vector<2x16xf32>
    %155 = arith.addf %153, %154 : vector<2x16xf32>
    %cst_124 = arith.constant dense<0.000000e+00> : vector<16x64xf32>
    %156 = tpu.matmul %144, %31, %cst_124 {dimension_numbers = #tpu.dot_dimension_numbers<[1], [1], [0], [0], [0, 0, 1, 0], [], []>} : vector<16x32xf32>, vector<64x32xf32>, vector<16x64xf32> -> vector<16x64xf32>
    %157 = vector.broadcast %33 : vector<1x64xf32> to vector<16x64xf32>
    %158 = arith.addf %156, %157 : vector<16x64xf32>
    %cst_125 = arith.constant 0.000000e+00 : f32
    %159 = vector.broadcast %cst_125 : f32 to vector<2x16xf32>
    %cst_126 = arith.constant 0.000000e+00 : f32
    %160 = vector.broadcast %cst_126 : f32 to vector<2x16xf32>
    %161 = vector.extract_strided_slice %158 {offsets = [0, 0], sizes = [2, 64], strides = [1, 1]} : vector<16x64xf32> to vector<2x64xf32>
    %cst_127 = arith.constant dense<0.000000e+00> : vector<2x64xf32>
    %162 = tpu.matmul %159, %32, %cst_127 {dimension_numbers = #tpu.dot_dimension_numbers<[1], [1], [0], [0], [0, 0, 1, 0], [], []>} : vector<2x16xf32>, vector<64x16xf32>, vector<2x64xf32> -> vector<2x64xf32>
    %163 = arith.addf %161, %162 : vector<2x64xf32>
    %164 = vector.broadcast %34 : vector<1x64xf32> to vector<2x64xf32>
    %165 = arith.addf %163, %164 : vector<2x64xf32>
    %166 = vector.extract_strided_slice %165 {offsets = [0, 0], sizes = [2, 16], strides = [1, 1]} : vector<2x64xf32> to vector<2x16xf32>
    %cst_128 = arith.constant 5.000000e-01 : f32
    %167 = vector.broadcast %cst_128 : f32 to vector<2x16xf32>
    %168 = arith.mulf %167, %166 : vector<2x16xf32>
    %169 = math.tanh %168 : vector<2x16xf32>
    %cst_129 = arith.constant 1.000000e+00 : f32
    %170 = vector.broadcast %cst_129 : f32 to vector<2x16xf32>
    %171 = arith.addf %169, %170 : vector<2x16xf32>
    %cst_130 = arith.constant 5.000000e-01 : f32
    %172 = vector.broadcast %cst_130 : f32 to vector<2x16xf32>
    %173 = arith.mulf %172, %171 : vector<2x16xf32>
    %174 = vector.extract_strided_slice %165 {offsets = [0, 16], sizes = [2, 16], strides = [1, 1]} : vector<2x64xf32> to vector<2x16xf32>
    %cst_131 = arith.constant 5.000000e-01 : f32
    %175 = vector.broadcast %cst_131 : f32 to vector<2x16xf32>
    %176 = arith.mulf %175, %174 : vector<2x16xf32>
    %177 = math.tanh %176 : vector<2x16xf32>
    %cst_132 = arith.constant 1.000000e+00 : f32
    %178 = vector.broadcast %cst_132 : f32 to vector<2x16xf32>
    %179 = arith.addf %177, %178 : vector<2x16xf32>
    %cst_133 = arith.constant 5.000000e-01 : f32
    %180 = vector.broadcast %cst_133 : f32 to vector<2x16xf32>
    %181 = arith.mulf %180, %179 : vector<2x16xf32>
    %182 = vector.extract_strided_slice %165 {offsets = [0, 32], sizes = [2, 16], strides = [1, 1]} : vector<2x64xf32> to vector<2x16xf32>
    %183 = math.tanh %182 : vector<2x16xf32>
    %184 = vector.extract_strided_slice %165 {offsets = [0, 48], sizes = [2, 16], strides = [1, 1]} : vector<2x64xf32> to vector<2x16xf32>
    %cst_134 = arith.constant 5.000000e-01 : f32
    %185 = vector.broadcast %cst_134 : f32 to vector<2x16xf32>
    %186 = arith.mulf %185, %184 : vector<2x16xf32>
    %187 = math.tanh %186 : vector<2x16xf32>
    %cst_135 = arith.constant 1.000000e+00 : f32
    %188 = vector.broadcast %cst_135 : f32 to vector<2x16xf32>
    %189 = arith.addf %187, %188 : vector<2x16xf32>
    %cst_136 = arith.constant 5.000000e-01 : f32
    %190 = vector.broadcast %cst_136 : f32 to vector<2x16xf32>
    %191 = arith.mulf %190, %189 : vector<2x16xf32>
    %192 = arith.mulf %181, %160 : vector<2x16xf32>
    %193 = arith.mulf %173, %183 : vector<2x16xf32>
    %194 = arith.addf %192, %193 : vector<2x16xf32>
    %195 = math.tanh %194 : vector<2x16xf32>
    %196 = arith.mulf %191, %195 : vector<2x16xf32>
    %197 = vector.extract_strided_slice %158 {offsets = [2, 0], sizes = [2, 64], strides = [1, 1]} : vector<16x64xf32> to vector<2x64xf32>
    %cst_137 = arith.constant dense<0.000000e+00> : vector<2x64xf32>
    %198 = tpu.matmul %196, %32, %cst_137 {dimension_numbers = #tpu.dot_dimension_numbers<[1], [1], [0], [0], [0, 0, 1, 0], [], []>} : vector<2x16xf32>, vector<64x16xf32>, vector<2x64xf32> -> vector<2x64xf32>
    %199 = arith.addf %197, %198 : vector<2x64xf32>
    %200 = vector.broadcast %34 : vector<1x64xf32> to vector<2x64xf32>
    %201 = arith.addf %199, %200 : vector<2x64xf32>
    %202 = vector.extract_strided_slice %201 {offsets = [0, 0], sizes = [2, 16], strides = [1, 1]} : vector<2x64xf32> to vector<2x16xf32>
    %cst_138 = arith.constant 5.000000e-01 : f32
    %203 = vector.broadcast %cst_138 : f32 to vector<2x16xf32>
    %204 = arith.mulf %203, %202 : vector<2x16xf32>
    %205 = math.tanh %204 : vector<2x16xf32>
    %cst_139 = arith.constant 1.000000e+00 : f32
    %206 = vector.broadcast %cst_139 : f32 to vector<2x16xf32>
    %207 = arith.addf %205, %206 : vector<2x16xf32>
    %cst_140 = arith.constant 5.000000e-01 : f32
    %208 = vector.broadcast %cst_140 : f32 to vector<2x16xf32>
    %209 = arith.mulf %208, %207 : vector<2x16xf32>
    %210 = vector.extract_strided_slice %201 {offsets = [0, 16], sizes = [2, 16], strides = [1, 1]} : vector<2x64xf32> to vector<2x16xf32>
    %cst_141 = arith.constant 5.000000e-01 : f32
    %211 = vector.broadcast %cst_141 : f32 to vector<2x16xf32>
    %212 = arith.mulf %211, %210 : vector<2x16xf32>
    %213 = math.tanh %212 : vector<2x16xf32>
    %cst_142 = arith.constant 1.000000e+00 : f32
    %214 = vector.broadcast %cst_142 : f32 to vector<2x16xf32>
    %215 = arith.addf %213, %214 : vector<2x16xf32>
    %cst_143 = arith.constant 5.000000e-01 : f32
    %216 = vector.broadcast %cst_143 : f32 to vector<2x16xf32>
    %217 = arith.mulf %216, %215 : vector<2x16xf32>
    %218 = vector.extract_strided_slice %201 {offsets = [0, 32], sizes = [2, 16], strides = [1, 1]} : vector<2x64xf32> to vector<2x16xf32>
    %219 = math.tanh %218 : vector<2x16xf32>
    %220 = vector.extract_strided_slice %201 {offsets = [0, 48], sizes = [2, 16], strides = [1, 1]} : vector<2x64xf32> to vector<2x16xf32>
    %cst_144 = arith.constant 5.000000e-01 : f32
    %221 = vector.broadcast %cst_144 : f32 to vector<2x16xf32>
    %222 = arith.mulf %221, %220 : vector<2x16xf32>
    %223 = math.tanh %222 : vector<2x16xf32>
    %cst_145 = arith.constant 1.000000e+00 : f32
    %224 = vector.broadcast %cst_145 : f32 to vector<2x16xf32>
    %225 = arith.addf %223, %224 : vector<2x16xf32>
    %cst_146 = arith.constant 5.000000e-01 : f32
    %226 = vector.broadcast %cst_146 : f32 to vector<2x16xf32>
    %227 = arith.mulf %226, %225 : vector<2x16xf32>
    %228 = arith.mulf %217, %194 : vector<2x16xf32>
    %229 = arith.mulf %209, %219 : vector<2x16xf32>
    %230 = arith.addf %228, %229 : vector<2x16xf32>
    %231 = math.tanh %230 : vector<2x16xf32>
    %232 = arith.mulf %227, %231 : vector<2x16xf32>
    %233 = vector.extract_strided_slice %158 {offsets = [4, 0], sizes = [2, 64], strides = [1, 1]} : vector<16x64xf32> to vector<2x64xf32>
    %cst_147 = arith.constant dense<0.000000e+00> : vector<2x64xf32>
    %234 = tpu.matmul %232, %32, %cst_147 {dimension_numbers = #tpu.dot_dimension_numbers<[1], [1], [0], [0], [0, 0, 1, 0], [], []>} : vector<2x16xf32>, vector<64x16xf32>, vector<2x64xf32> -> vector<2x64xf32>
    %235 = arith.addf %233, %234 : vector<2x64xf32>
    %236 = vector.broadcast %34 : vector<1x64xf32> to vector<2x64xf32>
    %237 = arith.addf %235, %236 : vector<2x64xf32>
    %238 = vector.extract_strided_slice %237 {offsets = [0, 0], sizes = [2, 16], strides = [1, 1]} : vector<2x64xf32> to vector<2x16xf32>
    %cst_148 = arith.constant 5.000000e-01 : f32
    %239 = vector.broadcast %cst_148 : f32 to vector<2x16xf32>
    %240 = arith.mulf %239, %238 : vector<2x16xf32>
    %241 = math.tanh %240 : vector<2x16xf32>
    %cst_149 = arith.constant 1.000000e+00 : f32
    %242 = vector.broadcast %cst_149 : f32 to vector<2x16xf32>
    %243 = arith.addf %241, %242 : vector<2x16xf32>
    %cst_150 = arith.constant 5.000000e-01 : f32
    %244 = vector.broadcast %cst_150 : f32 to vector<2x16xf32>
    %245 = arith.mulf %244, %243 : vector<2x16xf32>
    %246 = vector.extract_strided_slice %237 {offsets = [0, 16], sizes = [2, 16], strides = [1, 1]} : vector<2x64xf32> to vector<2x16xf32>
    %cst_151 = arith.constant 5.000000e-01 : f32
    %247 = vector.broadcast %cst_151 : f32 to vector<2x16xf32>
    %248 = arith.mulf %247, %246 : vector<2x16xf32>
    %249 = math.tanh %248 : vector<2x16xf32>
    %cst_152 = arith.constant 1.000000e+00 : f32
    %250 = vector.broadcast %cst_152 : f32 to vector<2x16xf32>
    %251 = arith.addf %249, %250 : vector<2x16xf32>
    %cst_153 = arith.constant 5.000000e-01 : f32
    %252 = vector.broadcast %cst_153 : f32 to vector<2x16xf32>
    %253 = arith.mulf %252, %251 : vector<2x16xf32>
    %254 = vector.extract_strided_slice %237 {offsets = [0, 32], sizes = [2, 16], strides = [1, 1]} : vector<2x64xf32> to vector<2x16xf32>
    %255 = math.tanh %254 : vector<2x16xf32>
    %256 = vector.extract_strided_slice %237 {offsets = [0, 48], sizes = [2, 16], strides = [1, 1]} : vector<2x64xf32> to vector<2x16xf32>
    %cst_154 = arith.constant 5.000000e-01 : f32
    %257 = vector.broadcast %cst_154 : f32 to vector<2x16xf32>
    %258 = arith.mulf %257, %256 : vector<2x16xf32>
    %259 = math.tanh %258 : vector<2x16xf32>
    %cst_155 = arith.constant 1.000000e+00 : f32
    %260 = vector.broadcast %cst_155 : f32 to vector<2x16xf32>
    %261 = arith.addf %259, %260 : vector<2x16xf32>
    %cst_156 = arith.constant 5.000000e-01 : f32
    %262 = vector.broadcast %cst_156 : f32 to vector<2x16xf32>
    %263 = arith.mulf %262, %261 : vector<2x16xf32>
    %264 = arith.mulf %253, %230 : vector<2x16xf32>
    %265 = arith.mulf %245, %255 : vector<2x16xf32>
    %266 = arith.addf %264, %265 : vector<2x16xf32>
    %267 = math.tanh %266 : vector<2x16xf32>
    %268 = arith.mulf %263, %267 : vector<2x16xf32>
    %269 = vector.extract_strided_slice %158 {offsets = [6, 0], sizes = [2, 64], strides = [1, 1]} : vector<16x64xf32> to vector<2x64xf32>
    %cst_157 = arith.constant dense<0.000000e+00> : vector<2x64xf32>
    %270 = tpu.matmul %268, %32, %cst_157 {dimension_numbers = #tpu.dot_dimension_numbers<[1], [1], [0], [0], [0, 0, 1, 0], [], []>} : vector<2x16xf32>, vector<64x16xf32>, vector<2x64xf32> -> vector<2x64xf32>
    %271 = arith.addf %269, %270 : vector<2x64xf32>
    %272 = vector.broadcast %34 : vector<1x64xf32> to vector<2x64xf32>
    %273 = arith.addf %271, %272 : vector<2x64xf32>
    %274 = vector.extract_strided_slice %273 {offsets = [0, 0], sizes = [2, 16], strides = [1, 1]} : vector<2x64xf32> to vector<2x16xf32>
    %cst_158 = arith.constant 5.000000e-01 : f32
    %275 = vector.broadcast %cst_158 : f32 to vector<2x16xf32>
    %276 = arith.mulf %275, %274 : vector<2x16xf32>
    %277 = math.tanh %276 : vector<2x16xf32>
    %cst_159 = arith.constant 1.000000e+00 : f32
    %278 = vector.broadcast %cst_159 : f32 to vector<2x16xf32>
    %279 = arith.addf %277, %278 : vector<2x16xf32>
    %cst_160 = arith.constant 5.000000e-01 : f32
    %280 = vector.broadcast %cst_160 : f32 to vector<2x16xf32>
    %281 = arith.mulf %280, %279 : vector<2x16xf32>
    %282 = vector.extract_strided_slice %273 {offsets = [0, 16], sizes = [2, 16], strides = [1, 1]} : vector<2x64xf32> to vector<2x16xf32>
    %cst_161 = arith.constant 5.000000e-01 : f32
    %283 = vector.broadcast %cst_161 : f32 to vector<2x16xf32>
    %284 = arith.mulf %283, %282 : vector<2x16xf32>
    %285 = math.tanh %284 : vector<2x16xf32>
    %cst_162 = arith.constant 1.000000e+00 : f32
    %286 = vector.broadcast %cst_162 : f32 to vector<2x16xf32>
    %287 = arith.addf %285, %286 : vector<2x16xf32>
    %cst_163 = arith.constant 5.000000e-01 : f32
    %288 = vector.broadcast %cst_163 : f32 to vector<2x16xf32>
    %289 = arith.mulf %288, %287 : vector<2x16xf32>
    %290 = vector.extract_strided_slice %273 {offsets = [0, 32], sizes = [2, 16], strides = [1, 1]} : vector<2x64xf32> to vector<2x16xf32>
    %291 = math.tanh %290 : vector<2x16xf32>
    %292 = vector.extract_strided_slice %273 {offsets = [0, 48], sizes = [2, 16], strides = [1, 1]} : vector<2x64xf32> to vector<2x16xf32>
    %cst_164 = arith.constant 5.000000e-01 : f32
    %293 = vector.broadcast %cst_164 : f32 to vector<2x16xf32>
    %294 = arith.mulf %293, %292 : vector<2x16xf32>
    %295 = math.tanh %294 : vector<2x16xf32>
    %cst_165 = arith.constant 1.000000e+00 : f32
    %296 = vector.broadcast %cst_165 : f32 to vector<2x16xf32>
    %297 = arith.addf %295, %296 : vector<2x16xf32>
    %cst_166 = arith.constant 5.000000e-01 : f32
    %298 = vector.broadcast %cst_166 : f32 to vector<2x16xf32>
    %299 = arith.mulf %298, %297 : vector<2x16xf32>
    %300 = arith.mulf %289, %266 : vector<2x16xf32>
    %301 = arith.mulf %281, %291 : vector<2x16xf32>
    %302 = arith.addf %300, %301 : vector<2x16xf32>
    %303 = math.tanh %302 : vector<2x16xf32>
    %304 = arith.mulf %299, %303 : vector<2x16xf32>
    %305 = vector.extract_strided_slice %158 {offsets = [8, 0], sizes = [2, 64], strides = [1, 1]} : vector<16x64xf32> to vector<2x64xf32>
    %cst_167 = arith.constant dense<0.000000e+00> : vector<2x64xf32>
    %306 = tpu.matmul %304, %32, %cst_167 {dimension_numbers = #tpu.dot_dimension_numbers<[1], [1], [0], [0], [0, 0, 1, 0], [], []>} : vector<2x16xf32>, vector<64x16xf32>, vector<2x64xf32> -> vector<2x64xf32>
    %307 = arith.addf %305, %306 : vector<2x64xf32>
    %308 = vector.broadcast %34 : vector<1x64xf32> to vector<2x64xf32>
    %309 = arith.addf %307, %308 : vector<2x64xf32>
    %310 = vector.extract_strided_slice %309 {offsets = [0, 0], sizes = [2, 16], strides = [1, 1]} : vector<2x64xf32> to vector<2x16xf32>
    %cst_168 = arith.constant 5.000000e-01 : f32
    %311 = vector.broadcast %cst_168 : f32 to vector<2x16xf32>
    %312 = arith.mulf %311, %310 : vector<2x16xf32>
    %313 = math.tanh %312 : vector<2x16xf32>
    %cst_169 = arith.constant 1.000000e+00 : f32
    %314 = vector.broadcast %cst_169 : f32 to vector<2x16xf32>
    %315 = arith.addf %313, %314 : vector<2x16xf32>
    %cst_170 = arith.constant 5.000000e-01 : f32
    %316 = vector.broadcast %cst_170 : f32 to vector<2x16xf32>
    %317 = arith.mulf %316, %315 : vector<2x16xf32>
    %318 = vector.extract_strided_slice %309 {offsets = [0, 16], sizes = [2, 16], strides = [1, 1]} : vector<2x64xf32> to vector<2x16xf32>
    %cst_171 = arith.constant 5.000000e-01 : f32
    %319 = vector.broadcast %cst_171 : f32 to vector<2x16xf32>
    %320 = arith.mulf %319, %318 : vector<2x16xf32>
    %321 = math.tanh %320 : vector<2x16xf32>
    %cst_172 = arith.constant 1.000000e+00 : f32
    %322 = vector.broadcast %cst_172 : f32 to vector<2x16xf32>
    %323 = arith.addf %321, %322 : vector<2x16xf32>
    %cst_173 = arith.constant 5.000000e-01 : f32
    %324 = vector.broadcast %cst_173 : f32 to vector<2x16xf32>
    %325 = arith.mulf %324, %323 : vector<2x16xf32>
    %326 = vector.extract_strided_slice %309 {offsets = [0, 32], sizes = [2, 16], strides = [1, 1]} : vector<2x64xf32> to vector<2x16xf32>
    %327 = math.tanh %326 : vector<2x16xf32>
    %328 = vector.extract_strided_slice %309 {offsets = [0, 48], sizes = [2, 16], strides = [1, 1]} : vector<2x64xf32> to vector<2x16xf32>
    %cst_174 = arith.constant 5.000000e-01 : f32
    %329 = vector.broadcast %cst_174 : f32 to vector<2x16xf32>
    %330 = arith.mulf %329, %328 : vector<2x16xf32>
    %331 = math.tanh %330 : vector<2x16xf32>
    %cst_175 = arith.constant 1.000000e+00 : f32
    %332 = vector.broadcast %cst_175 : f32 to vector<2x16xf32>
    %333 = arith.addf %331, %332 : vector<2x16xf32>
    %cst_176 = arith.constant 5.000000e-01 : f32
    %334 = vector.broadcast %cst_176 : f32 to vector<2x16xf32>
    %335 = arith.mulf %334, %333 : vector<2x16xf32>
    %336 = arith.mulf %325, %302 : vector<2x16xf32>
    %337 = arith.mulf %317, %327 : vector<2x16xf32>
    %338 = arith.addf %336, %337 : vector<2x16xf32>
    %339 = math.tanh %338 : vector<2x16xf32>
    %340 = arith.mulf %335, %339 : vector<2x16xf32>
    %341 = vector.extract_strided_slice %158 {offsets = [10, 0], sizes = [2, 64], strides = [1, 1]} : vector<16x64xf32> to vector<2x64xf32>
    %cst_177 = arith.constant dense<0.000000e+00> : vector<2x64xf32>
    %342 = tpu.matmul %340, %32, %cst_177 {dimension_numbers = #tpu.dot_dimension_numbers<[1], [1], [0], [0], [0, 0, 1, 0], [], []>} : vector<2x16xf32>, vector<64x16xf32>, vector<2x64xf32> -> vector<2x64xf32>
    %343 = arith.addf %341, %342 : vector<2x64xf32>
    %344 = vector.broadcast %34 : vector<1x64xf32> to vector<2x64xf32>
    %345 = arith.addf %343, %344 : vector<2x64xf32>
    %346 = vector.extract_strided_slice %345 {offsets = [0, 0], sizes = [2, 16], strides = [1, 1]} : vector<2x64xf32> to vector<2x16xf32>
    %cst_178 = arith.constant 5.000000e-01 : f32
    %347 = vector.broadcast %cst_178 : f32 to vector<2x16xf32>
    %348 = arith.mulf %347, %346 : vector<2x16xf32>
    %349 = math.tanh %348 : vector<2x16xf32>
    %cst_179 = arith.constant 1.000000e+00 : f32
    %350 = vector.broadcast %cst_179 : f32 to vector<2x16xf32>
    %351 = arith.addf %349, %350 : vector<2x16xf32>
    %cst_180 = arith.constant 5.000000e-01 : f32
    %352 = vector.broadcast %cst_180 : f32 to vector<2x16xf32>
    %353 = arith.mulf %352, %351 : vector<2x16xf32>
    %354 = vector.extract_strided_slice %345 {offsets = [0, 16], sizes = [2, 16], strides = [1, 1]} : vector<2x64xf32> to vector<2x16xf32>
    %cst_181 = arith.constant 5.000000e-01 : f32
    %355 = vector.broadcast %cst_181 : f32 to vector<2x16xf32>
    %356 = arith.mulf %355, %354 : vector<2x16xf32>
    %357 = math.tanh %356 : vector<2x16xf32>
    %cst_182 = arith.constant 1.000000e+00 : f32
    %358 = vector.broadcast %cst_182 : f32 to vector<2x16xf32>
    %359 = arith.addf %357, %358 : vector<2x16xf32>
    %cst_183 = arith.constant 5.000000e-01 : f32
    %360 = vector.broadcast %cst_183 : f32 to vector<2x16xf32>
    %361 = arith.mulf %360, %359 : vector<2x16xf32>
    %362 = vector.extract_strided_slice %345 {offsets = [0, 32], sizes = [2, 16], strides = [1, 1]} : vector<2x64xf32> to vector<2x16xf32>
    %363 = math.tanh %362 : vector<2x16xf32>
    %364 = vector.extract_strided_slice %345 {offsets = [0, 48], sizes = [2, 16], strides = [1, 1]} : vector<2x64xf32> to vector<2x16xf32>
    %cst_184 = arith.constant 5.000000e-01 : f32
    %365 = vector.broadcast %cst_184 : f32 to vector<2x16xf32>
    %366 = arith.mulf %365, %364 : vector<2x16xf32>
    %367 = math.tanh %366 : vector<2x16xf32>
    %cst_185 = arith.constant 1.000000e+00 : f32
    %368 = vector.broadcast %cst_185 : f32 to vector<2x16xf32>
    %369 = arith.addf %367, %368 : vector<2x16xf32>
    %cst_186 = arith.constant 5.000000e-01 : f32
    %370 = vector.broadcast %cst_186 : f32 to vector<2x16xf32>
    %371 = arith.mulf %370, %369 : vector<2x16xf32>
    %372 = arith.mulf %361, %338 : vector<2x16xf32>
    %373 = arith.mulf %353, %363 : vector<2x16xf32>
    %374 = arith.addf %372, %373 : vector<2x16xf32>
    %375 = math.tanh %374 : vector<2x16xf32>
    %376 = arith.mulf %371, %375 : vector<2x16xf32>
    %377 = vector.extract_strided_slice %158 {offsets = [12, 0], sizes = [2, 64], strides = [1, 1]} : vector<16x64xf32> to vector<2x64xf32>
    %cst_187 = arith.constant dense<0.000000e+00> : vector<2x64xf32>
    %378 = tpu.matmul %376, %32, %cst_187 {dimension_numbers = #tpu.dot_dimension_numbers<[1], [1], [0], [0], [0, 0, 1, 0], [], []>} : vector<2x16xf32>, vector<64x16xf32>, vector<2x64xf32> -> vector<2x64xf32>
    %379 = arith.addf %377, %378 : vector<2x64xf32>
    %380 = vector.broadcast %34 : vector<1x64xf32> to vector<2x64xf32>
    %381 = arith.addf %379, %380 : vector<2x64xf32>
    %382 = vector.extract_strided_slice %381 {offsets = [0, 0], sizes = [2, 16], strides = [1, 1]} : vector<2x64xf32> to vector<2x16xf32>
    %cst_188 = arith.constant 5.000000e-01 : f32
    %383 = vector.broadcast %cst_188 : f32 to vector<2x16xf32>
    %384 = arith.mulf %383, %382 : vector<2x16xf32>
    %385 = math.tanh %384 : vector<2x16xf32>
    %cst_189 = arith.constant 1.000000e+00 : f32
    %386 = vector.broadcast %cst_189 : f32 to vector<2x16xf32>
    %387 = arith.addf %385, %386 : vector<2x16xf32>
    %cst_190 = arith.constant 5.000000e-01 : f32
    %388 = vector.broadcast %cst_190 : f32 to vector<2x16xf32>
    %389 = arith.mulf %388, %387 : vector<2x16xf32>
    %390 = vector.extract_strided_slice %381 {offsets = [0, 16], sizes = [2, 16], strides = [1, 1]} : vector<2x64xf32> to vector<2x16xf32>
    %cst_191 = arith.constant 5.000000e-01 : f32
    %391 = vector.broadcast %cst_191 : f32 to vector<2x16xf32>
    %392 = arith.mulf %391, %390 : vector<2x16xf32>
    %393 = math.tanh %392 : vector<2x16xf32>
    %cst_192 = arith.constant 1.000000e+00 : f32
    %394 = vector.broadcast %cst_192 : f32 to vector<2x16xf32>
    %395 = arith.addf %393, %394 : vector<2x16xf32>
    %cst_193 = arith.constant 5.000000e-01 : f32
    %396 = vector.broadcast %cst_193 : f32 to vector<2x16xf32>
    %397 = arith.mulf %396, %395 : vector<2x16xf32>
    %398 = vector.extract_strided_slice %381 {offsets = [0, 32], sizes = [2, 16], strides = [1, 1]} : vector<2x64xf32> to vector<2x16xf32>
    %399 = math.tanh %398 : vector<2x16xf32>
    %400 = vector.extract_strided_slice %381 {offsets = [0, 48], sizes = [2, 16], strides = [1, 1]} : vector<2x64xf32> to vector<2x16xf32>
    %cst_194 = arith.constant 5.000000e-01 : f32
    %401 = vector.broadcast %cst_194 : f32 to vector<2x16xf32>
    %402 = arith.mulf %401, %400 : vector<2x16xf32>
    %403 = math.tanh %402 : vector<2x16xf32>
    %cst_195 = arith.constant 1.000000e+00 : f32
    %404 = vector.broadcast %cst_195 : f32 to vector<2x16xf32>
    %405 = arith.addf %403, %404 : vector<2x16xf32>
    %cst_196 = arith.constant 5.000000e-01 : f32
    %406 = vector.broadcast %cst_196 : f32 to vector<2x16xf32>
    %407 = arith.mulf %406, %405 : vector<2x16xf32>
    %408 = arith.mulf %397, %374 : vector<2x16xf32>
    %409 = arith.mulf %389, %399 : vector<2x16xf32>
    %410 = arith.addf %408, %409 : vector<2x16xf32>
    %411 = math.tanh %410 : vector<2x16xf32>
    %412 = arith.mulf %407, %411 : vector<2x16xf32>
    %413 = vector.extract_strided_slice %158 {offsets = [14, 0], sizes = [2, 64], strides = [1, 1]} : vector<16x64xf32> to vector<2x64xf32>
    %cst_197 = arith.constant dense<0.000000e+00> : vector<2x64xf32>
    %414 = tpu.matmul %412, %32, %cst_197 {dimension_numbers = #tpu.dot_dimension_numbers<[1], [1], [0], [0], [0, 0, 1, 0], [], []>} : vector<2x16xf32>, vector<64x16xf32>, vector<2x64xf32> -> vector<2x64xf32>
    %415 = arith.addf %413, %414 : vector<2x64xf32>
    %416 = vector.broadcast %34 : vector<1x64xf32> to vector<2x64xf32>
    %417 = arith.addf %415, %416 : vector<2x64xf32>
    %418 = vector.extract_strided_slice %417 {offsets = [0, 0], sizes = [2, 16], strides = [1, 1]} : vector<2x64xf32> to vector<2x16xf32>
    %cst_198 = arith.constant 5.000000e-01 : f32
    %419 = vector.broadcast %cst_198 : f32 to vector<2x16xf32>
    %420 = arith.mulf %419, %418 : vector<2x16xf32>
    %421 = math.tanh %420 : vector<2x16xf32>
    %cst_199 = arith.constant 1.000000e+00 : f32
    %422 = vector.broadcast %cst_199 : f32 to vector<2x16xf32>
    %423 = arith.addf %421, %422 : vector<2x16xf32>
    %cst_200 = arith.constant 5.000000e-01 : f32
    %424 = vector.broadcast %cst_200 : f32 to vector<2x16xf32>
    %425 = arith.mulf %424, %423 : vector<2x16xf32>
    %426 = vector.extract_strided_slice %417 {offsets = [0, 16], sizes = [2, 16], strides = [1, 1]} : vector<2x64xf32> to vector<2x16xf32>
    %cst_201 = arith.constant 5.000000e-01 : f32
    %427 = vector.broadcast %cst_201 : f32 to vector<2x16xf32>
    %428 = arith.mulf %427, %426 : vector<2x16xf32>
    %429 = math.tanh %428 : vector<2x16xf32>
    %cst_202 = arith.constant 1.000000e+00 : f32
    %430 = vector.broadcast %cst_202 : f32 to vector<2x16xf32>
    %431 = arith.addf %429, %430 : vector<2x16xf32>
    %cst_203 = arith.constant 5.000000e-01 : f32
    %432 = vector.broadcast %cst_203 : f32 to vector<2x16xf32>
    %433 = arith.mulf %432, %431 : vector<2x16xf32>
    %434 = vector.extract_strided_slice %417 {offsets = [0, 32], sizes = [2, 16], strides = [1, 1]} : vector<2x64xf32> to vector<2x16xf32>
    %435 = math.tanh %434 : vector<2x16xf32>
    %436 = vector.extract_strided_slice %417 {offsets = [0, 48], sizes = [2, 16], strides = [1, 1]} : vector<2x64xf32> to vector<2x16xf32>
    %cst_204 = arith.constant 5.000000e-01 : f32
    %437 = vector.broadcast %cst_204 : f32 to vector<2x16xf32>
    %438 = arith.mulf %437, %436 : vector<2x16xf32>
    %439 = math.tanh %438 : vector<2x16xf32>
    %cst_205 = arith.constant 1.000000e+00 : f32
    %440 = vector.broadcast %cst_205 : f32 to vector<2x16xf32>
    %441 = arith.addf %439, %440 : vector<2x16xf32>
    %cst_206 = arith.constant 5.000000e-01 : f32
    %442 = vector.broadcast %cst_206 : f32 to vector<2x16xf32>
    %443 = arith.mulf %442, %441 : vector<2x16xf32>
    %444 = arith.mulf %433, %410 : vector<2x16xf32>
    %445 = arith.mulf %425, %435 : vector<2x16xf32>
    %446 = arith.addf %444, %445 : vector<2x16xf32>
    %447 = math.tanh %446 : vector<2x16xf32>
    %448 = arith.mulf %443, %447 : vector<2x16xf32>
    %449 = tpu.concatenate %196, %232, %268, %304, %340, %376, %412, %448 in 0 : vector<2x16xf32>, vector<2x16xf32>, vector<2x16xf32>, vector<2x16xf32>, vector<2x16xf32>, vector<2x16xf32>, vector<2x16xf32>, vector<2x16xf32> -> vector<16x16xf32>
    %cst_207 = arith.constant dense<0.000000e+00> : vector<16x64xf32>
    %450 = tpu.matmul %449, %35, %cst_207 {dimension_numbers = #tpu.dot_dimension_numbers<[1], [1], [0], [0], [0, 0, 1, 0], [], []>} : vector<16x16xf32>, vector<64x16xf32>, vector<16x64xf32> -> vector<16x64xf32>
    %451 = vector.broadcast %37 : vector<1x64xf32> to vector<16x64xf32>
    %452 = arith.addf %450, %451 : vector<16x64xf32>
    %cst_208 = arith.constant 0.000000e+00 : f32
    %453 = vector.broadcast %cst_208 : f32 to vector<2x16xf32>
    %cst_209 = arith.constant 0.000000e+00 : f32
    %454 = vector.broadcast %cst_209 : f32 to vector<2x16xf32>
    %455 = vector.extract_strided_slice %452 {offsets = [0, 0], sizes = [2, 64], strides = [1, 1]} : vector<16x64xf32> to vector<2x64xf32>
    %cst_210 = arith.constant dense<0.000000e+00> : vector<2x64xf32>
    %456 = tpu.matmul %453, %36, %cst_210 {dimension_numbers = #tpu.dot_dimension_numbers<[1], [1], [0], [0], [0, 0, 1, 0], [], []>} : vector<2x16xf32>, vector<64x16xf32>, vector<2x64xf32> -> vector<2x64xf32>
    %457 = arith.addf %455, %456 : vector<2x64xf32>
    %458 = vector.broadcast %38 : vector<1x64xf32> to vector<2x64xf32>
    %459 = arith.addf %457, %458 : vector<2x64xf32>
    %460 = vector.extract_strided_slice %459 {offsets = [0, 0], sizes = [2, 16], strides = [1, 1]} : vector<2x64xf32> to vector<2x16xf32>
    %cst_211 = arith.constant 5.000000e-01 : f32
    %461 = vector.broadcast %cst_211 : f32 to vector<2x16xf32>
    %462 = arith.mulf %461, %460 : vector<2x16xf32>
    %463 = math.tanh %462 : vector<2x16xf32>
    %cst_212 = arith.constant 1.000000e+00 : f32
    %464 = vector.broadcast %cst_212 : f32 to vector<2x16xf32>
    %465 = arith.addf %463, %464 : vector<2x16xf32>
    %cst_213 = arith.constant 5.000000e-01 : f32
    %466 = vector.broadcast %cst_213 : f32 to vector<2x16xf32>
    %467 = arith.mulf %466, %465 : vector<2x16xf32>
    %468 = vector.extract_strided_slice %459 {offsets = [0, 16], sizes = [2, 16], strides = [1, 1]} : vector<2x64xf32> to vector<2x16xf32>
    %cst_214 = arith.constant 5.000000e-01 : f32
    %469 = vector.broadcast %cst_214 : f32 to vector<2x16xf32>
    %470 = arith.mulf %469, %468 : vector<2x16xf32>
    %471 = math.tanh %470 : vector<2x16xf32>
    %cst_215 = arith.constant 1.000000e+00 : f32
    %472 = vector.broadcast %cst_215 : f32 to vector<2x16xf32>
    %473 = arith.addf %471, %472 : vector<2x16xf32>
    %cst_216 = arith.constant 5.000000e-01 : f32
    %474 = vector.broadcast %cst_216 : f32 to vector<2x16xf32>
    %475 = arith.mulf %474, %473 : vector<2x16xf32>
    %476 = vector.extract_strided_slice %459 {offsets = [0, 32], sizes = [2, 16], strides = [1, 1]} : vector<2x64xf32> to vector<2x16xf32>
    %477 = math.tanh %476 : vector<2x16xf32>
    %478 = vector.extract_strided_slice %459 {offsets = [0, 48], sizes = [2, 16], strides = [1, 1]} : vector<2x64xf32> to vector<2x16xf32>
    %cst_217 = arith.constant 5.000000e-01 : f32
    %479 = vector.broadcast %cst_217 : f32 to vector<2x16xf32>
    %480 = arith.mulf %479, %478 : vector<2x16xf32>
    %481 = math.tanh %480 : vector<2x16xf32>
    %cst_218 = arith.constant 1.000000e+00 : f32
    %482 = vector.broadcast %cst_218 : f32 to vector<2x16xf32>
    %483 = arith.addf %481, %482 : vector<2x16xf32>
    %cst_219 = arith.constant 5.000000e-01 : f32
    %484 = vector.broadcast %cst_219 : f32 to vector<2x16xf32>
    %485 = arith.mulf %484, %483 : vector<2x16xf32>
    %486 = arith.mulf %475, %454 : vector<2x16xf32>
    %487 = arith.mulf %467, %477 : vector<2x16xf32>
    %488 = arith.addf %486, %487 : vector<2x16xf32>
    %489 = math.tanh %488 : vector<2x16xf32>
    %490 = arith.mulf %485, %489 : vector<2x16xf32>
    %491 = vector.extract_strided_slice %452 {offsets = [2, 0], sizes = [2, 64], strides = [1, 1]} : vector<16x64xf32> to vector<2x64xf32>
    %cst_220 = arith.constant dense<0.000000e+00> : vector<2x64xf32>
    %492 = tpu.matmul %490, %36, %cst_220 {dimension_numbers = #tpu.dot_dimension_numbers<[1], [1], [0], [0], [0, 0, 1, 0], [], []>} : vector<2x16xf32>, vector<64x16xf32>, vector<2x64xf32> -> vector<2x64xf32>
    %493 = arith.addf %491, %492 : vector<2x64xf32>
    %494 = vector.broadcast %38 : vector<1x64xf32> to vector<2x64xf32>
    %495 = arith.addf %493, %494 : vector<2x64xf32>
    %496 = vector.extract_strided_slice %495 {offsets = [0, 0], sizes = [2, 16], strides = [1, 1]} : vector<2x64xf32> to vector<2x16xf32>
    %cst_221 = arith.constant 5.000000e-01 : f32
    %497 = vector.broadcast %cst_221 : f32 to vector<2x16xf32>
    %498 = arith.mulf %497, %496 : vector<2x16xf32>
    %499 = math.tanh %498 : vector<2x16xf32>
    %cst_222 = arith.constant 1.000000e+00 : f32
    %500 = vector.broadcast %cst_222 : f32 to vector<2x16xf32>
    %501 = arith.addf %499, %500 : vector<2x16xf32>
    %cst_223 = arith.constant 5.000000e-01 : f32
    %502 = vector.broadcast %cst_223 : f32 to vector<2x16xf32>
    %503 = arith.mulf %502, %501 : vector<2x16xf32>
    %504 = vector.extract_strided_slice %495 {offsets = [0, 16], sizes = [2, 16], strides = [1, 1]} : vector<2x64xf32> to vector<2x16xf32>
    %cst_224 = arith.constant 5.000000e-01 : f32
    %505 = vector.broadcast %cst_224 : f32 to vector<2x16xf32>
    %506 = arith.mulf %505, %504 : vector<2x16xf32>
    %507 = math.tanh %506 : vector<2x16xf32>
    %cst_225 = arith.constant 1.000000e+00 : f32
    %508 = vector.broadcast %cst_225 : f32 to vector<2x16xf32>
    %509 = arith.addf %507, %508 : vector<2x16xf32>
    %cst_226 = arith.constant 5.000000e-01 : f32
    %510 = vector.broadcast %cst_226 : f32 to vector<2x16xf32>
    %511 = arith.mulf %510, %509 : vector<2x16xf32>
    %512 = vector.extract_strided_slice %495 {offsets = [0, 32], sizes = [2, 16], strides = [1, 1]} : vector<2x64xf32> to vector<2x16xf32>
    %513 = math.tanh %512 : vector<2x16xf32>
    %514 = vector.extract_strided_slice %495 {offsets = [0, 48], sizes = [2, 16], strides = [1, 1]} : vector<2x64xf32> to vector<2x16xf32>
    %cst_227 = arith.constant 5.000000e-01 : f32
    %515 = vector.broadcast %cst_227 : f32 to vector<2x16xf32>
    %516 = arith.mulf %515, %514 : vector<2x16xf32>
    %517 = math.tanh %516 : vector<2x16xf32>
    %cst_228 = arith.constant 1.000000e+00 : f32
    %518 = vector.broadcast %cst_228 : f32 to vector<2x16xf32>
    %519 = arith.addf %517, %518 : vector<2x16xf32>
    %cst_229 = arith.constant 5.000000e-01 : f32
    %520 = vector.broadcast %cst_229 : f32 to vector<2x16xf32>
    %521 = arith.mulf %520, %519 : vector<2x16xf32>
    %522 = arith.mulf %511, %488 : vector<2x16xf32>
    %523 = arith.mulf %503, %513 : vector<2x16xf32>
    %524 = arith.addf %522, %523 : vector<2x16xf32>
    %525 = math.tanh %524 : vector<2x16xf32>
    %526 = arith.mulf %521, %525 : vector<2x16xf32>
    %527 = vector.extract_strided_slice %452 {offsets = [4, 0], sizes = [2, 64], strides = [1, 1]} : vector<16x64xf32> to vector<2x64xf32>
    %cst_230 = arith.constant dense<0.000000e+00> : vector<2x64xf32>
    %528 = tpu.matmul %526, %36, %cst_230 {dimension_numbers = #tpu.dot_dimension_numbers<[1], [1], [0], [0], [0, 0, 1, 0], [], []>} : vector<2x16xf32>, vector<64x16xf32>, vector<2x64xf32> -> vector<2x64xf32>
    %529 = arith.addf %527, %528 : vector<2x64xf32>
    %530 = vector.broadcast %38 : vector<1x64xf32> to vector<2x64xf32>
    %531 = arith.addf %529, %530 : vector<2x64xf32>
    %532 = vector.extract_strided_slice %531 {offsets = [0, 0], sizes = [2, 16], strides = [1, 1]} : vector<2x64xf32> to vector<2x16xf32>
    %cst_231 = arith.constant 5.000000e-01 : f32
    %533 = vector.broadcast %cst_231 : f32 to vector<2x16xf32>
    %534 = arith.mulf %533, %532 : vector<2x16xf32>
    %535 = math.tanh %534 : vector<2x16xf32>
    %cst_232 = arith.constant 1.000000e+00 : f32
    %536 = vector.broadcast %cst_232 : f32 to vector<2x16xf32>
    %537 = arith.addf %535, %536 : vector<2x16xf32>
    %cst_233 = arith.constant 5.000000e-01 : f32
    %538 = vector.broadcast %cst_233 : f32 to vector<2x16xf32>
    %539 = arith.mulf %538, %537 : vector<2x16xf32>
    %540 = vector.extract_strided_slice %531 {offsets = [0, 16], sizes = [2, 16], strides = [1, 1]} : vector<2x64xf32> to vector<2x16xf32>
    %cst_234 = arith.constant 5.000000e-01 : f32
    %541 = vector.broadcast %cst_234 : f32 to vector<2x16xf32>
    %542 = arith.mulf %541, %540 : vector<2x16xf32>
    %543 = math.tanh %542 : vector<2x16xf32>
    %cst_235 = arith.constant 1.000000e+00 : f32
    %544 = vector.broadcast %cst_235 : f32 to vector<2x16xf32>
    %545 = arith.addf %543, %544 : vector<2x16xf32>
    %cst_236 = arith.constant 5.000000e-01 : f32
    %546 = vector.broadcast %cst_236 : f32 to vector<2x16xf32>
    %547 = arith.mulf %546, %545 : vector<2x16xf32>
    %548 = vector.extract_strided_slice %531 {offsets = [0, 32], sizes = [2, 16], strides = [1, 1]} : vector<2x64xf32> to vector<2x16xf32>
    %549 = math.tanh %548 : vector<2x16xf32>
    %550 = vector.extract_strided_slice %531 {offsets = [0, 48], sizes = [2, 16], strides = [1, 1]} : vector<2x64xf32> to vector<2x16xf32>
    %cst_237 = arith.constant 5.000000e-01 : f32
    %551 = vector.broadcast %cst_237 : f32 to vector<2x16xf32>
    %552 = arith.mulf %551, %550 : vector<2x16xf32>
    %553 = math.tanh %552 : vector<2x16xf32>
    %cst_238 = arith.constant 1.000000e+00 : f32
    %554 = vector.broadcast %cst_238 : f32 to vector<2x16xf32>
    %555 = arith.addf %553, %554 : vector<2x16xf32>
    %cst_239 = arith.constant 5.000000e-01 : f32
    %556 = vector.broadcast %cst_239 : f32 to vector<2x16xf32>
    %557 = arith.mulf %556, %555 : vector<2x16xf32>
    %558 = arith.mulf %547, %524 : vector<2x16xf32>
    %559 = arith.mulf %539, %549 : vector<2x16xf32>
    %560 = arith.addf %558, %559 : vector<2x16xf32>
    %561 = math.tanh %560 : vector<2x16xf32>
    %562 = arith.mulf %557, %561 : vector<2x16xf32>
    %563 = vector.extract_strided_slice %452 {offsets = [6, 0], sizes = [2, 64], strides = [1, 1]} : vector<16x64xf32> to vector<2x64xf32>
    %cst_240 = arith.constant dense<0.000000e+00> : vector<2x64xf32>
    %564 = tpu.matmul %562, %36, %cst_240 {dimension_numbers = #tpu.dot_dimension_numbers<[1], [1], [0], [0], [0, 0, 1, 0], [], []>} : vector<2x16xf32>, vector<64x16xf32>, vector<2x64xf32> -> vector<2x64xf32>
    %565 = arith.addf %563, %564 : vector<2x64xf32>
    %566 = vector.broadcast %38 : vector<1x64xf32> to vector<2x64xf32>
    %567 = arith.addf %565, %566 : vector<2x64xf32>
    %568 = vector.extract_strided_slice %567 {offsets = [0, 0], sizes = [2, 16], strides = [1, 1]} : vector<2x64xf32> to vector<2x16xf32>
    %cst_241 = arith.constant 5.000000e-01 : f32
    %569 = vector.broadcast %cst_241 : f32 to vector<2x16xf32>
    %570 = arith.mulf %569, %568 : vector<2x16xf32>
    %571 = math.tanh %570 : vector<2x16xf32>
    %cst_242 = arith.constant 1.000000e+00 : f32
    %572 = vector.broadcast %cst_242 : f32 to vector<2x16xf32>
    %573 = arith.addf %571, %572 : vector<2x16xf32>
    %cst_243 = arith.constant 5.000000e-01 : f32
    %574 = vector.broadcast %cst_243 : f32 to vector<2x16xf32>
    %575 = arith.mulf %574, %573 : vector<2x16xf32>
    %576 = vector.extract_strided_slice %567 {offsets = [0, 16], sizes = [2, 16], strides = [1, 1]} : vector<2x64xf32> to vector<2x16xf32>
    %cst_244 = arith.constant 5.000000e-01 : f32
    %577 = vector.broadcast %cst_244 : f32 to vector<2x16xf32>
    %578 = arith.mulf %577, %576 : vector<2x16xf32>
    %579 = math.tanh %578 : vector<2x16xf32>
    %cst_245 = arith.constant 1.000000e+00 : f32
    %580 = vector.broadcast %cst_245 : f32 to vector<2x16xf32>
    %581 = arith.addf %579, %580 : vector<2x16xf32>
    %cst_246 = arith.constant 5.000000e-01 : f32
    %582 = vector.broadcast %cst_246 : f32 to vector<2x16xf32>
    %583 = arith.mulf %582, %581 : vector<2x16xf32>
    %584 = vector.extract_strided_slice %567 {offsets = [0, 32], sizes = [2, 16], strides = [1, 1]} : vector<2x64xf32> to vector<2x16xf32>
    %585 = math.tanh %584 : vector<2x16xf32>
    %586 = vector.extract_strided_slice %567 {offsets = [0, 48], sizes = [2, 16], strides = [1, 1]} : vector<2x64xf32> to vector<2x16xf32>
    %cst_247 = arith.constant 5.000000e-01 : f32
    %587 = vector.broadcast %cst_247 : f32 to vector<2x16xf32>
    %588 = arith.mulf %587, %586 : vector<2x16xf32>
    %589 = math.tanh %588 : vector<2x16xf32>
    %cst_248 = arith.constant 1.000000e+00 : f32
    %590 = vector.broadcast %cst_248 : f32 to vector<2x16xf32>
    %591 = arith.addf %589, %590 : vector<2x16xf32>
    %cst_249 = arith.constant 5.000000e-01 : f32
    %592 = vector.broadcast %cst_249 : f32 to vector<2x16xf32>
    %593 = arith.mulf %592, %591 : vector<2x16xf32>
    %594 = arith.mulf %583, %560 : vector<2x16xf32>
    %595 = arith.mulf %575, %585 : vector<2x16xf32>
    %596 = arith.addf %594, %595 : vector<2x16xf32>
    %597 = math.tanh %596 : vector<2x16xf32>
    %598 = arith.mulf %593, %597 : vector<2x16xf32>
    %599 = vector.extract_strided_slice %452 {offsets = [8, 0], sizes = [2, 64], strides = [1, 1]} : vector<16x64xf32> to vector<2x64xf32>
    %cst_250 = arith.constant dense<0.000000e+00> : vector<2x64xf32>
    %600 = tpu.matmul %598, %36, %cst_250 {dimension_numbers = #tpu.dot_dimension_numbers<[1], [1], [0], [0], [0, 0, 1, 0], [], []>} : vector<2x16xf32>, vector<64x16xf32>, vector<2x64xf32> -> vector<2x64xf32>
    %601 = arith.addf %599, %600 : vector<2x64xf32>
    %602 = vector.broadcast %38 : vector<1x64xf32> to vector<2x64xf32>
    %603 = arith.addf %601, %602 : vector<2x64xf32>
    %604 = vector.extract_strided_slice %603 {offsets = [0, 0], sizes = [2, 16], strides = [1, 1]} : vector<2x64xf32> to vector<2x16xf32>
    %cst_251 = arith.constant 5.000000e-01 : f32
    %605 = vector.broadcast %cst_251 : f32 to vector<2x16xf32>
    %606 = arith.mulf %605, %604 : vector<2x16xf32>
    %607 = math.tanh %606 : vector<2x16xf32>
    %cst_252 = arith.constant 1.000000e+00 : f32
    %608 = vector.broadcast %cst_252 : f32 to vector<2x16xf32>
    %609 = arith.addf %607, %608 : vector<2x16xf32>
    %cst_253 = arith.constant 5.000000e-01 : f32
    %610 = vector.broadcast %cst_253 : f32 to vector<2x16xf32>
    %611 = arith.mulf %610, %609 : vector<2x16xf32>
    %612 = vector.extract_strided_slice %603 {offsets = [0, 16], sizes = [2, 16], strides = [1, 1]} : vector<2x64xf32> to vector<2x16xf32>
    %cst_254 = arith.constant 5.000000e-01 : f32
    %613 = vector.broadcast %cst_254 : f32 to vector<2x16xf32>
    %614 = arith.mulf %613, %612 : vector<2x16xf32>
    %615 = math.tanh %614 : vector<2x16xf32>
    %cst_255 = arith.constant 1.000000e+00 : f32
    %616 = vector.broadcast %cst_255 : f32 to vector<2x16xf32>
    %617 = arith.addf %615, %616 : vector<2x16xf32>
    %cst_256 = arith.constant 5.000000e-01 : f32
    %618 = vector.broadcast %cst_256 : f32 to vector<2x16xf32>
    %619 = arith.mulf %618, %617 : vector<2x16xf32>
    %620 = vector.extract_strided_slice %603 {offsets = [0, 32], sizes = [2, 16], strides = [1, 1]} : vector<2x64xf32> to vector<2x16xf32>
    %621 = math.tanh %620 : vector<2x16xf32>
    %622 = vector.extract_strided_slice %603 {offsets = [0, 48], sizes = [2, 16], strides = [1, 1]} : vector<2x64xf32> to vector<2x16xf32>
    %cst_257 = arith.constant 5.000000e-01 : f32
    %623 = vector.broadcast %cst_257 : f32 to vector<2x16xf32>
    %624 = arith.mulf %623, %622 : vector<2x16xf32>
    %625 = math.tanh %624 : vector<2x16xf32>
    %cst_258 = arith.constant 1.000000e+00 : f32
    %626 = vector.broadcast %cst_258 : f32 to vector<2x16xf32>
    %627 = arith.addf %625, %626 : vector<2x16xf32>
    %cst_259 = arith.constant 5.000000e-01 : f32
    %628 = vector.broadcast %cst_259 : f32 to vector<2x16xf32>
    %629 = arith.mulf %628, %627 : vector<2x16xf32>
    %630 = arith.mulf %619, %596 : vector<2x16xf32>
    %631 = arith.mulf %611, %621 : vector<2x16xf32>
    %632 = arith.addf %630, %631 : vector<2x16xf32>
    %633 = math.tanh %632 : vector<2x16xf32>
    %634 = arith.mulf %629, %633 : vector<2x16xf32>
    %635 = vector.extract_strided_slice %452 {offsets = [10, 0], sizes = [2, 64], strides = [1, 1]} : vector<16x64xf32> to vector<2x64xf32>
    %cst_260 = arith.constant dense<0.000000e+00> : vector<2x64xf32>
    %636 = tpu.matmul %634, %36, %cst_260 {dimension_numbers = #tpu.dot_dimension_numbers<[1], [1], [0], [0], [0, 0, 1, 0], [], []>} : vector<2x16xf32>, vector<64x16xf32>, vector<2x64xf32> -> vector<2x64xf32>
    %637 = arith.addf %635, %636 : vector<2x64xf32>
    %638 = vector.broadcast %38 : vector<1x64xf32> to vector<2x64xf32>
    %639 = arith.addf %637, %638 : vector<2x64xf32>
    %640 = vector.extract_strided_slice %639 {offsets = [0, 0], sizes = [2, 16], strides = [1, 1]} : vector<2x64xf32> to vector<2x16xf32>
    %cst_261 = arith.constant 5.000000e-01 : f32
    %641 = vector.broadcast %cst_261 : f32 to vector<2x16xf32>
    %642 = arith.mulf %641, %640 : vector<2x16xf32>
    %643 = math.tanh %642 : vector<2x16xf32>
    %cst_262 = arith.constant 1.000000e+00 : f32
    %644 = vector.broadcast %cst_262 : f32 to vector<2x16xf32>
    %645 = arith.addf %643, %644 : vector<2x16xf32>
    %cst_263 = arith.constant 5.000000e-01 : f32
    %646 = vector.broadcast %cst_263 : f32 to vector<2x16xf32>
    %647 = arith.mulf %646, %645 : vector<2x16xf32>
    %648 = vector.extract_strided_slice %639 {offsets = [0, 16], sizes = [2, 16], strides = [1, 1]} : vector<2x64xf32> to vector<2x16xf32>
    %cst_264 = arith.constant 5.000000e-01 : f32
    %649 = vector.broadcast %cst_264 : f32 to vector<2x16xf32>
    %650 = arith.mulf %649, %648 : vector<2x16xf32>
    %651 = math.tanh %650 : vector<2x16xf32>
    %cst_265 = arith.constant 1.000000e+00 : f32
    %652 = vector.broadcast %cst_265 : f32 to vector<2x16xf32>
    %653 = arith.addf %651, %652 : vector<2x16xf32>
    %cst_266 = arith.constant 5.000000e-01 : f32
    %654 = vector.broadcast %cst_266 : f32 to vector<2x16xf32>
    %655 = arith.mulf %654, %653 : vector<2x16xf32>
    %656 = vector.extract_strided_slice %639 {offsets = [0, 32], sizes = [2, 16], strides = [1, 1]} : vector<2x64xf32> to vector<2x16xf32>
    %657 = math.tanh %656 : vector<2x16xf32>
    %658 = vector.extract_strided_slice %639 {offsets = [0, 48], sizes = [2, 16], strides = [1, 1]} : vector<2x64xf32> to vector<2x16xf32>
    %cst_267 = arith.constant 5.000000e-01 : f32
    %659 = vector.broadcast %cst_267 : f32 to vector<2x16xf32>
    %660 = arith.mulf %659, %658 : vector<2x16xf32>
    %661 = math.tanh %660 : vector<2x16xf32>
    %cst_268 = arith.constant 1.000000e+00 : f32
    %662 = vector.broadcast %cst_268 : f32 to vector<2x16xf32>
    %663 = arith.addf %661, %662 : vector<2x16xf32>
    %cst_269 = arith.constant 5.000000e-01 : f32
    %664 = vector.broadcast %cst_269 : f32 to vector<2x16xf32>
    %665 = arith.mulf %664, %663 : vector<2x16xf32>
    %666 = arith.mulf %655, %632 : vector<2x16xf32>
    %667 = arith.mulf %647, %657 : vector<2x16xf32>
    %668 = arith.addf %666, %667 : vector<2x16xf32>
    %669 = math.tanh %668 : vector<2x16xf32>
    %670 = arith.mulf %665, %669 : vector<2x16xf32>
    %671 = vector.extract_strided_slice %452 {offsets = [12, 0], sizes = [2, 64], strides = [1, 1]} : vector<16x64xf32> to vector<2x64xf32>
    %cst_270 = arith.constant dense<0.000000e+00> : vector<2x64xf32>
    %672 = tpu.matmul %670, %36, %cst_270 {dimension_numbers = #tpu.dot_dimension_numbers<[1], [1], [0], [0], [0, 0, 1, 0], [], []>} : vector<2x16xf32>, vector<64x16xf32>, vector<2x64xf32> -> vector<2x64xf32>
    %673 = arith.addf %671, %672 : vector<2x64xf32>
    %674 = vector.broadcast %38 : vector<1x64xf32> to vector<2x64xf32>
    %675 = arith.addf %673, %674 : vector<2x64xf32>
    %676 = vector.extract_strided_slice %675 {offsets = [0, 0], sizes = [2, 16], strides = [1, 1]} : vector<2x64xf32> to vector<2x16xf32>
    %cst_271 = arith.constant 5.000000e-01 : f32
    %677 = vector.broadcast %cst_271 : f32 to vector<2x16xf32>
    %678 = arith.mulf %677, %676 : vector<2x16xf32>
    %679 = math.tanh %678 : vector<2x16xf32>
    %cst_272 = arith.constant 1.000000e+00 : f32
    %680 = vector.broadcast %cst_272 : f32 to vector<2x16xf32>
    %681 = arith.addf %679, %680 : vector<2x16xf32>
    %cst_273 = arith.constant 5.000000e-01 : f32
    %682 = vector.broadcast %cst_273 : f32 to vector<2x16xf32>
    %683 = arith.mulf %682, %681 : vector<2x16xf32>
    %684 = vector.extract_strided_slice %675 {offsets = [0, 16], sizes = [2, 16], strides = [1, 1]} : vector<2x64xf32> to vector<2x16xf32>
    %cst_274 = arith.constant 5.000000e-01 : f32
    %685 = vector.broadcast %cst_274 : f32 to vector<2x16xf32>
    %686 = arith.mulf %685, %684 : vector<2x16xf32>
    %687 = math.tanh %686 : vector<2x16xf32>
    %cst_275 = arith.constant 1.000000e+00 : f32
    %688 = vector.broadcast %cst_275 : f32 to vector<2x16xf32>
    %689 = arith.addf %687, %688 : vector<2x16xf32>
    %cst_276 = arith.constant 5.000000e-01 : f32
    %690 = vector.broadcast %cst_276 : f32 to vector<2x16xf32>
    %691 = arith.mulf %690, %689 : vector<2x16xf32>
    %692 = vector.extract_strided_slice %675 {offsets = [0, 32], sizes = [2, 16], strides = [1, 1]} : vector<2x64xf32> to vector<2x16xf32>
    %693 = math.tanh %692 : vector<2x16xf32>
    %694 = vector.extract_strided_slice %675 {offsets = [0, 48], sizes = [2, 16], strides = [1, 1]} : vector<2x64xf32> to vector<2x16xf32>
    %cst_277 = arith.constant 5.000000e-01 : f32
    %695 = vector.broadcast %cst_277 : f32 to vector<2x16xf32>
    %696 = arith.mulf %695, %694 : vector<2x16xf32>
    %697 = math.tanh %696 : vector<2x16xf32>
    %cst_278 = arith.constant 1.000000e+00 : f32
    %698 = vector.broadcast %cst_278 : f32 to vector<2x16xf32>
    %699 = arith.addf %697, %698 : vector<2x16xf32>
    %cst_279 = arith.constant 5.000000e-01 : f32
    %700 = vector.broadcast %cst_279 : f32 to vector<2x16xf32>
    %701 = arith.mulf %700, %699 : vector<2x16xf32>
    %702 = arith.mulf %691, %668 : vector<2x16xf32>
    %703 = arith.mulf %683, %693 : vector<2x16xf32>
    %704 = arith.addf %702, %703 : vector<2x16xf32>
    %705 = math.tanh %704 : vector<2x16xf32>
    %706 = arith.mulf %701, %705 : vector<2x16xf32>
    %707 = vector.extract_strided_slice %452 {offsets = [14, 0], sizes = [2, 64], strides = [1, 1]} : vector<16x64xf32> to vector<2x64xf32>
    %cst_280 = arith.constant dense<0.000000e+00> : vector<2x64xf32>
    %708 = tpu.matmul %706, %36, %cst_280 {dimension_numbers = #tpu.dot_dimension_numbers<[1], [1], [0], [0], [0, 0, 1, 0], [], []>} : vector<2x16xf32>, vector<64x16xf32>, vector<2x64xf32> -> vector<2x64xf32>
    %709 = arith.addf %707, %708 : vector<2x64xf32>
    %710 = vector.broadcast %38 : vector<1x64xf32> to vector<2x64xf32>
    %711 = arith.addf %709, %710 : vector<2x64xf32>
    %712 = vector.extract_strided_slice %711 {offsets = [0, 0], sizes = [2, 16], strides = [1, 1]} : vector<2x64xf32> to vector<2x16xf32>
    %cst_281 = arith.constant 5.000000e-01 : f32
    %713 = vector.broadcast %cst_281 : f32 to vector<2x16xf32>
    %714 = arith.mulf %713, %712 : vector<2x16xf32>
    %715 = math.tanh %714 : vector<2x16xf32>
    %cst_282 = arith.constant 1.000000e+00 : f32
    %716 = vector.broadcast %cst_282 : f32 to vector<2x16xf32>
    %717 = arith.addf %715, %716 : vector<2x16xf32>
    %cst_283 = arith.constant 5.000000e-01 : f32
    %718 = vector.broadcast %cst_283 : f32 to vector<2x16xf32>
    %719 = arith.mulf %718, %717 : vector<2x16xf32>
    %720 = vector.extract_strided_slice %711 {offsets = [0, 16], sizes = [2, 16], strides = [1, 1]} : vector<2x64xf32> to vector<2x16xf32>
    %cst_284 = arith.constant 5.000000e-01 : f32
    %721 = vector.broadcast %cst_284 : f32 to vector<2x16xf32>
    %722 = arith.mulf %721, %720 : vector<2x16xf32>
    %723 = math.tanh %722 : vector<2x16xf32>
    %cst_285 = arith.constant 1.000000e+00 : f32
    %724 = vector.broadcast %cst_285 : f32 to vector<2x16xf32>
    %725 = arith.addf %723, %724 : vector<2x16xf32>
    %cst_286 = arith.constant 5.000000e-01 : f32
    %726 = vector.broadcast %cst_286 : f32 to vector<2x16xf32>
    %727 = arith.mulf %726, %725 : vector<2x16xf32>
    %728 = vector.extract_strided_slice %711 {offsets = [0, 32], sizes = [2, 16], strides = [1, 1]} : vector<2x64xf32> to vector<2x16xf32>
    %729 = math.tanh %728 : vector<2x16xf32>
    %730 = vector.extract_strided_slice %711 {offsets = [0, 48], sizes = [2, 16], strides = [1, 1]} : vector<2x64xf32> to vector<2x16xf32>
    %cst_287 = arith.constant 5.000000e-01 : f32
    %731 = vector.broadcast %cst_287 : f32 to vector<2x16xf32>
    %732 = arith.mulf %731, %730 : vector<2x16xf32>
    %733 = math.tanh %732 : vector<2x16xf32>
    %cst_288 = arith.constant 1.000000e+00 : f32
    %734 = vector.broadcast %cst_288 : f32 to vector<2x16xf32>
    %735 = arith.addf %733, %734 : vector<2x16xf32>
    %cst_289 = arith.constant 5.000000e-01 : f32
    %736 = vector.broadcast %cst_289 : f32 to vector<2x16xf32>
    %737 = arith.mulf %736, %735 : vector<2x16xf32>
    %738 = arith.mulf %727, %704 : vector<2x16xf32>
    %739 = arith.mulf %719, %729 : vector<2x16xf32>
    %740 = arith.addf %738, %739 : vector<2x16xf32>
    %741 = math.tanh %740 : vector<2x16xf32>
    %742 = arith.mulf %737, %741 : vector<2x16xf32>
    %cst_290 = arith.constant dense<0.000000e+00> : vector<2x16xf32>
    %743 = tpu.matmul %742, %39, %cst_290 {dimension_numbers = #tpu.dot_dimension_numbers<[1], [1], [0], [0], [0, 0, 1, 0], [], []>} : vector<2x16xf32>, vector<16x16xf32>, vector<2x16xf32> -> vector<2x16xf32>
    %cst_291 = arith.constant dense<0.000000e+00> : vector<2x16xf32>
    %744 = tpu.matmul %155, %40, %cst_291 {dimension_numbers = #tpu.dot_dimension_numbers<[1], [1], [0], [0], [0, 0, 1, 0], [], []>} : vector<2x16xf32>, vector<16x16xf32>, vector<2x16xf32> -> vector<2x16xf32>
    %745 = arith.addf %743, %744 : vector<2x16xf32>
    %746 = vector.broadcast %41 : vector<1x16xf32> to vector<2x16xf32>
    %747 = arith.addf %745, %746 : vector<2x16xf32>
    %cst_292 = arith.constant dense<0.000000e+00> : vector<2x1xf32>
    %748 = tpu.matmul %747, %42, %cst_292 {dimension_numbers = #tpu.dot_dimension_numbers<[1], [1], [0], [0], [0, 0, 1, 0], [], []>} : vector<2x16xf32>, vector<1x16xf32>, vector<2x1xf32> -> vector<2x1xf32>
    %cst_293 = arith.constant 5.000000e-01 : f32
    %749 = vector.broadcast %cst_293 : f32 to vector<2x1xf32>
    %750 = arith.mulf %749, %748 : vector<2x1xf32>
    %751 = math.tanh %750 : vector<2x1xf32>
    %cst_294 = arith.constant 1.000000e+00 : f32
    %752 = vector.broadcast %cst_294 : f32 to vector<2x1xf32>
    %753 = arith.addf %751, %752 : vector<2x1xf32>
    %cst_295 = arith.constant 5.000000e-01 : f32
    %754 = vector.broadcast %cst_295 : f32 to vector<2x1xf32>
    %755 = arith.mulf %754, %753 : vector<2x1xf32>
    %c0_296 = arith.constant 0 : index
    %c0_297 = arith.constant 0 : index
    %756 = vector.load %arg44[%c0_296, %c0_297] : memref<2x1xf32, #tpu.memory_space<vmem>>, vector<2x1xf32>
    tpu.vector_store %arg44[%c0_296, %c0_297], %755 {strides = array<i32>} : memref<2x1xf32, #tpu.memory_space<vmem>>, vector<2x1xf32>,
    %c0_298 = arith.constant 0 : index
    %c0_299 = arith.constant 0 : index
    %757 = vector.load %arg45[%c0_298, %c0_299] : memref<2x1xf32, #tpu.memory_space<vmem>>, vector<2x1xf32>
    tpu.vector_store %arg45[%c0_298, %c0_299], %748 {strides = array<i32>} : memref<2x1xf32, #tpu.memory_space<vmem>>, vector<2x1xf32>,
    return
  }
}

</mosaic_0001>

<bundles_post_ra>
// kernel: _lambda_.1
= control target key start
LH: loop header
LB: loop body
LE: loop exit
PB: predicated region body
PF: predicated region fallthrough
CT: control target
= control target key end

     0   :  { %s5620_s3 = smov 9   ;;  %s5621_s10 = smov 19   ;;  %vm288_vm0 = vcmask 39936   ;;  %vm439_vm2 = vcmask 48128   ;;  %vm533_vm4 = vcmask 80896   ;;  %vm777_vm5 = vcmask 72704   ;;  %s6642_s0 = inlined_call_operand.smem [shape: u32[46], index: -1, kind: input, shape index: {}] }
   0x1   :  { %s3929_s6 = sld [smem:[%s6642_s0 + %s5620_s3]]   ;;  %s5622_s14 = smov 13   ;;  %vm5691_vm1 = vmpackc.low %vm288_vm0, %vm288_vm0  ;;  %vm683_vm7 = vcmask 56320   ;;  %vm925_vm9 = vcmask 261120   ;;  %vm1433_vm12 = vcmask 89088   ;;  %vm5638_vm14 = vmmov 0  }
   0x2   :  { %s1_s9 = sld [smem:[%s6642_s0]]   ;;  %s5623_s18 = smov 1   ;;  %vm5713_vm3 = vmpackc.low %vm439_vm2, %vm439_vm2  ;;  %vm1877_vm15 = vcmask 130048  }
   0x3   :  { %s3939_s13 = sld [smem:[%s6642_s0 + %s5621_s10]]   ;;  %s5624_s22 = smov 2   ;;  %vm5753_vm6 = vmpackc.low %vm533_vm4, %vm533_vm4 }
   0x4   :  { %s5687_s17 = sld [smem:[%s6642_s0 + %s5622_s14]]   ;;  %s5625_s26 = smov 4   ;;  %vm5779_vm8 = vmpackc.low %vm683_vm7, %vm683_vm7 }
   0x5   :  { %s5698_s21 = sld [smem:[%s6642_s0 + %s5623_s18]]   ;;  %s5626_s30 = smov 21   ;;  %vm5836_vm10 = vmpackc.low %vm925_vm9, %vm925_vm9 }
   0x6   :  { %s3922_s25 = sld [smem:[%s6642_s0 + %s5624_s22]]   ;;  %s5627_s4 = smov 3   ;;  %vm5903_vm11 = vmpackc.low %vm777_vm5, %vm777_vm5 }
   0x7   :  { %v199_v1 = vld [vmem:[%s3929_s6] sm:$0xff]  ;;  %v200_v2 = vld [vmem:[%s3929_s6 + $0x8] sm:$0xff]  ;;  %v201_v3 = vld [vmem:[%s3929_s6 + $0x10] sm:$0xff]  ;;  %s3924_s29 = sld [smem:[%s6642_s0 + %s5625_s26]]   ;;  %s5628_s8 = smov 25  }
   0x8   :  { %v4998_v4 = vpack.c.bf16 %v200_v2, %v199_v1  ;;  %v202_v5 = vld [vmem:[%s3929_s6 + $0x18] sm:$0xff]  ;;  %v5703_v6 = vld [vmem:[%s1_s9] sm:$0xff]  ;;  %v5705_v7 = vld [vmem:[%s1_s9 + $0x8] sm:$0xff]  ;;  %s5747_s3 = sld [smem:[%s6642_s0 + %s5626_s30]]   ;;  %s5629_s12 = smov 7  }
   0x9   :  { %v5004_v8 = vpack.c.bf16 %v202_v5, %v201_v3  ;;  %v289_v9 = vsel %vm288_vm0, %v5703_v6, 0.0  ;;  %v290_v10 = vsel %vm288_vm0, %v5705_v7, 0.0  ;;  %v218_v13 = vld [vmem:[%s3939_s13] sm:$0xff]  ;;  %v219_v14 = vld [vmem:[%s3939_s13 + $0x8] sm:$0xff]  ;;  %v220_v15 = vld [vmem:[%s3939_s13 + $0x10] sm:$0xff]  ;;  %s5770_s7 = sld [smem:[%s6642_s0 + %s5627_s4]]   ;;  %s5630_s16 = smov 8  }
   0xa   :  { %5000 = vmatprep.subr.msk.bf16.mxu0 %vm5691_vm1, %v4998_v4  ;;  %v291_v12 = vadd.f32 %v290_v10, %v289_v9  ;;  %v5010_v16 = vpack.c.bf16 %v219_v14, %v218_v13  ;;  %v221_v17 = vld [vmem:[%s3939_s13 + $0x18] sm:$0xff]  ;;  %v206_v19 = vld [vmem:[%s5687_s17] sm:$0xff]  ;;  %v207_v22 = vld [vmem:[%s5687_s17 + $0x8] sm:$0xff]  ;;  %s5792_s11 = sld [smem:[%s6642_s0 + %s5628_s8]]   ;;  %s5635_s6 = smov 16  }
   0xb   :  { %5003 = vmatpush3.bf16.xpose.msk.msra.mxu0 %vm5691_vm1, %v4998_v4  ;;  %v5016_v20 = vpack.c.bf16 %v221_v17, %v220_v15  ;;  %v187_v21 = vld [vmem:[%s5698_s21] sm:$0xff]  ;;  %v5749_v30 = vpack.c.bf16 %v207_v22, %v206_v19  ;;  %v188_v56 = vld [vmem:[%s5698_s21 + $0x8] sm:$0xff]  ;;  %s3927_s15 = sld [smem:[%s6642_s0 + %s5629_s12]]   ;;  %s5631_s21 = smov 11   ;;  %vm5120_vm13 = vmpackc.low %vm1433_vm12, %vm1433_vm12 }
   0xc   :  { %5006 = vmatprep.subr.msk.bf16.mxu0 %vm5691_vm1, %v5004_v8  ;;  %v292_v18 = vrot.slane %v291_v12, 4  ;;  %5012 = vmatprep.subr.msk.bf16.mxu1 %vm5713_vm3, %v5010_v16  ;;  %v5732_v23 = vld [vmem:[%s3922_s25] sm:$0xff]  ;;  %v5734_v24 = vld [vmem:[%s3922_s25 + $0x8] sm:$0xff]  ;;  %s3928_s20 = sld [smem:[%s6642_s0 + %s5630_s16]]   ;;  %s5632_s25 = smov 12  }
   0xd   :  { %4511 = vmatprep.mubr.msk.f32.mxu1 %vm439_vm2, %v187_v21  ;;  %5015 = vmatpush3.bf16.xpose.msk.msra.mxu1 %vm5713_vm3, %v5010_v16  ;;  %v534_v26 = vsel %vm533_vm4, %v5732_v23, 0.0  ;;  %v535_v27 = vsel %vm533_vm4, %v5734_v24, 0.0  ;;  %v5757_v34 = vld [vmem:[%s3924_s29] sm:$0xff]  ;;  %v5759_v35 = vld [vmem:[%s3924_s29 + $0x8] sm:$0xff]  ;;  %s3931_s24 = sld [smem:[%s6642_s0 + %s5631_s21]]   ;;  %s5633_s29 = smov 17  }
   0xe   :  { %v293_v25 = vadd.f32 %v292_v18, %v291_v12  ;;  %5018 = vmatprep.subr.msk.bf16.mxu1 %vm5713_vm3, %v5016_v20  ;;  %v536_v28 = vadd.f32 %v535_v27, %v534_v26  ;;  %v778_v37 = vsel %vm777_vm5, %v5757_v34, 0.0  ;;  %v779_v38 = vsel %vm777_vm5, %v5759_v35, 0.0  ;;  %v223_v42 = vld [vmem:[%s5747_s3] sm:$0xff]  ;;  %v224_v43 = vld [vmem:[%s5747_s3 + $0x8] sm:$0xff]  ;;  %v225_v51 = vld [vmem:[%s5747_s3 + $0x10] sm:$0xff]  ;;  %s3932_s28 = sld [smem:[%s6642_s0 + %s5632_s25]]   ;;  %s5636_s10 = smov 23  }
   0xf   :  { %v780_v40 = vadd.f32 %v779_v38, %v778_v37  ;;  %v5034_v47 = vpack.c.bf16 %v224_v43, %v223_v42  ;;  %v226_v52 = vld [vmem:[%s5747_s3 + $0x18] sm:$0xff]  ;;  %v191_v60 = vld [vmem:[%s5770_s7] sm:$0xff]  ;;  %v192_v37 = vld [vmem:[%s5770_s7 + $0x8] sm:$0xff]  ;;  %s5879_s2 = sld [smem:[%s6642_s0 + %s5633_s29]]   ;;  %s5634_s3 = smov 15  }
  0x10   :  { %v294_v29 = vrot.slane %v293_v25, 2  ;;  %v537_v32 = vrot.slane %v536_v28, 4  ;;  %v5040_v59 = vpack.c.bf16 %v226_v52, %v225_v51  ;;  %v922_v9 = vld [vmem:[%s5792_s11 + $0x8] sm:$0xff]  ;;  %s3936_s9 = sld [smem:[%s6642_s0 + %s5635_s6]]   ;;  %s5659_s29 = smov 36  }
  0x11   :  { %v781_v46 = vrot.slane %v780_v40, 4  ;;  %s3943_s14 = sld [smem:[%s6642_s0 + %s5636_s10]]   ;;  %s5646_s10 = smov 14  }
  0x12   :  { %v295_v33 = vadd.f32 %v294_v29, %v293_v25  ;;  %v538_v36 = vadd.f32 %v537_v32, %v536_v28  ;;  %v923_v32 = vld [vmem:[%s5792_s11 + $0x10] sm:$0xff]  ;;  %s5661_s7 = smov 38   ;;  %s5662_s12 = smov 39  }
  0x13   :  { %5009 = vmatpush3.bf16.xpose.msk.msra.mxu0 %vm5691_vm1, %v5004_v8  ;;  %v782_v50 = vadd.f32 %v781_v46, %v780_v40  ;;  %v921_v8 = vld [vmem:[%s5792_s11] sm:$0xff]  ;;  %vm2742_vm1 = vcmask 1041408   ;;  %s5663_s16 = smov 41   ;;  %s5664_s21 = smov 31  }
  0x14   :  { %v296_v39 = vrot.slane %v295_v33, 1  ;;  %5024 = vmatprep.subr.msk.bf16.mxu0 %vm5753_vm6, %v5749_v30  ;;  %v539_v41 = vrot.slane %v538_v36, 2  ;;  %v5058_v17 = vpack.c.bf16 %v922_v9, %v921_v8  ;;  %v3983_v8 = vld [vmem:[%s3932_s28] ss:$0 sm:$0xff]  ;;  %s5643_s28 = smov 27   ;;  %s5665_s25 = smov 40  }
  0x15   :  { %5021 = vmatpush3.bf16.xpose.msk.msra.mxu1 %vm5713_vm3, %v5016_v20  ;;  %v783_v57 = vrot.slane %v782_v50, 2  ;;  %s3947_s1 = sld [smem:[%s6642_s0 + %s5643_s28]]   ;;  %s5650_s28 = smov 18   ;;  %vm2746_vm3 = vcmask 1045504  }
  0x16   :  { %v297_v45 = vadd.f32 %v296_v39, %v295_v33  ;;  %v540_v48 = vadd.f32 %v539_v41, %v538_v36  ;;  %5036 = vmatprep.subr.msk.bf16.mxu1 %vm5779_vm8, %v5034_v47  ;;  %v924_v33 = vld [vmem:[%s5792_s11 + $0x18] sm:$0xff]  ;;  %s3960_s30 = sld [smem:[%s6642_s0 + %s5665_s25]]  }
  0x17   :  { %v784_v63 = vadd.f32 %v783_v57, %v782_v50  ;;  %v5064_v40 = vpack.c.bf16 %v924_v33, %v923_v32 }
  0x18   :  { %v299_v49 = vmul.f32 0.0625, %v297_v45  ;;  %v541_v53 = vrot.slane %v540_v48, 1 }
  0x19   :  { %v785_v3 = vrot.slane %v784_v63, 1 }
  0x1a   :  { %v5795_v54 = vsub.f32 %v5703_v6, %v299_v49  ;;  %v5798_v55 = vsub.f32 %v5705_v7, %v299_v49  ;;  %v542_v58 = vadd.f32 %v541_v53, %v540_v48 }
  0x1b   :  { %v786_v7 = vadd.f32 %v785_v3, %v784_v63 }
  0x1c   :  { %v302_v61 = vmul.f32 %v5795_v54, %v5795_v54  ;;  %v303_v62 = vmul.f32 %v5798_v55, %v5798_v55  ;;  %v543_v0 = vmul.f32 0.0625, %v542_v58  ;;  %4512 = vmatmul.mubr.msk.f32.vlgmr.msra.gmra.mrb[0].mxu1 %vm439_vm2, %v188_v56  ;;  %v3966_v58 = vld [vmem:[%s3927_s15] ss:$0 sm:$0xff]  ;;  %s5640_s15 = smov 5   ;;  %vm2744_vm2 = vcmask 1043456  }
  0x1d   :  { %5039 = vmatpush3.bf16.xpose.msk.msra.mxu1 %vm5779_vm8, %v5034_v47  ;;  %4533 = vmatprep.mubr.msk.f32.mxu1 %vm683_vm7, %v191_v60  ;;  %v787_v13 = vmul.f32 0.0625, %v786_v7  ;;  %v3982_v7 = vld [vmem:[%s3931_s24] ss:$0 sm:$0xff]  ;;  %s3925_s19 = sld [smem:[%s6642_s0 + %s5640_s15]]   ;;  %s5642_s24 = smov 6  }
  0x1e   :  { %v304_v1 = vsel %vm288_vm0, %v302_v61, 0.0  ;;  %v305_v2 = vsel %vm288_vm0, %v303_v62, 0.0  ;;  %v5813_v5 = vsub.f32 %v5732_v23, %v543_v0  ;;  %v5816_v6 = vsub.f32 %v5734_v24, %v543_v0  ;;  %5042 = vmatprep.subr.msk.bf16.mxu1 %vm5779_vm8, %v5040_v59  ;;  %v3967_v61 = vld [vmem:[%s3928_s20] ss:$0 sm:$0xff]  ;;  %v208_v0 = vld [vmem:[%s5687_s17 + $0x10] sm:$0xff]  ;;  %s5641_s20 = smov 28   ;;  %s3926_s27 = sld [smem:[%s6642_s0 + %s5642_s24]]  }
  0x1f   :  { %v306_v4 = vadd.f32 %v305_v2, %v304_v1  ;;  %v5829_v19 = vsub.f32 %v5757_v34, %v787_v13  ;;  %v5832_v20 = vsub.f32 %v5759_v35, %v787_v13  ;;  %v209_v1 = vld [vmem:[%s5687_s17 + $0x18] sm:$0xff]  ;;  %s3935_s17 = sld [smem:[%s6642_s0 + %s5634_s3]]   ;;  %s5647_s15 = smov 22  }
  0x20   :  { %v546_v11 = vmul.f32 %v5813_v5, %v5813_v5  ;;  %v547_v12 = vmul.f32 %v5816_v6, %v5816_v6  ;;  %s3948_s23 = sld [smem:[%s6642_s0 + %s5641_s20]]   ;;  %s5648_s20 = smov 30  }
  0x21   :  { %v307_v10 = vrot.slane %v306_v4, 4  ;;  %v790_v24 = vmul.f32 %v5829_v19, %v5829_v19  ;;  %v791_v25 = vmul.f32 %v5832_v20, %v5832_v20  ;;  %s5649_s24 = smov 24   ;;  %s5660_s3 = smov 37  }
  0x22   :  { %v548_v15 = vsel %vm533_vm4, %v546_v11, 0.0  ;;  %v549_v16 = vsel %vm533_vm4, %v547_v12, 0.0  ;;  %v213_v11 = vld [vmem:[%s5879_s2] sm:$0xff]  ;;  %v214_v12 = vld [vmem:[%s5879_s2 + $0x8] sm:$0xff] }
  0x23   :  { %v308_v14 = vadd.f32 %v307_v10, %v306_v4  ;;  %v550_v18 = vadd.f32 %v549_v16, %v548_v15  ;;  %v792_v28 = vsel %vm777_vm5, %v790_v24, 0.0  ;;  %v793_v29 = vsel %vm777_vm5, %v791_v25, 0.0  ;;  %v4035_v16 = vld [vmem:[%s5792_s11 + $0x68] sm:$0xff] }
  0x24   :  { %v794_v35 = vadd.f32 %v793_v29, %v792_v28  ;;  %v228_v28 = vld [vmem:[%s3943_s14] sm:$0xff]  ;;  %v229_v29 = vld [vmem:[%s3943_s14 + $0x8] sm:$0xff] }
  0x25   :  { %v309_v22 = vrot.slane %v308_v14, 2  ;;  %v551_v23 = vrot.slane %v550_v18, 4  ;;  %5045 = vmatpush3.bf16.xpose.msk.msra.mxu1 %vm5779_vm8, %v5040_v59  ;;  %v3998_v15 = vld [vmem:[%s3935_s17] ss:$0 sm:$0xff]  ;;  %v5119_v33 = vpack.c.bf16 %v229_v29, %v228_v28  ;;  %s5645_s17 = smov 20   ;;  %v4045_v28 = vld [vmem:[%s5792_s11 + $0x88] sm:$0xff] }
  0x26   :  { %5060 = vmatprep.subr.msk.bf16.mxu1 %vm5836_vm10, %v5058_v17  ;;  %v795_v39 = vrot.slane %v794_v35, 4 }
  0x27   :  { %v310_v26 = vadd.f32 %v309_v22, %v308_v14  ;;  %v552_v27 = vadd.f32 %v551_v23, %v550_v18  ;;  %v5046_v14 = vpack.c.bf16 %v214_v12, %v213_v11  ;;  %v215_v22 = vld [vmem:[%s5879_s2 + $0x10] sm:$0xff]  ;;  %v216_v23 = vld [vmem:[%s5879_s2 + $0x18] sm:$0xff]  ;;  %s5644_s2 = smov 10  }
  0x28   :  { %v796_v43 = vadd.f32 %v795_v39, %v794_v35  ;;  %v5052_v25 = vpack.c.bf16 %v216_v23, %v215_v22  ;;  %v231_v35 = vld [vmem:[%s3943_s14 + $0x18] sm:$0xff]  ;;  %v4015_v39 = vld [vmem:[%s5792_s11 + $0x28] sm:$0xff]  ;;  %s3930_s5 = sld [smem:[%s6642_s0 + %s5644_s2]]   ;;  %v4036_v22 = vld [vmem:[%s5792_s11 + $0x70] sm:$0xff] }
  0x29   :  { %v311_v34 = vrot.slane %v310_v26, 1  ;;  %v553_v36 = vrot.slane %v552_v27, 2  ;;  %v4037_v23 = vld [vmem:[%s5792_s11 + $0x78] sm:$0xff]  ;;  %s6343_s2 = sld [smem:[%s6642_s0 + %s5659_s29]]  }
  0x2a   :  { %v797_v46 = vrot.slane %v796_v43, 2 }
  0x2b   :  { %v312_v38 = vadd.f32 %v311_v34, %v310_v26  ;;  %v554_v41 = vadd.f32 %v553_v36, %v552_v27  ;;  %v5637_v27 = vmov 0.0|0.0   ;;  %v230_v34 = vld [vmem:[%s3943_s14 + $0x10] sm:$0xff]  ;;  %s3934_s14 = sld [smem:[%s6642_s0 + %s5646_s10]]  }
  0x2c   :  { %4534 = vmatmul.mubr.msk.f32.vlgmr.msra.gmra.mrb[2].mxu1 %vm683_vm7, %v192_v37  ;;  %v798_v48 = vadd.f32 %v797_v46, %v796_v43  ;;  %v5123_v36 = vpack.c.bf16 %v231_v35, %v230_v34  ;;  %v195_v37 = vld [vmem:[%s3925_s19] sm:$0x3]  ;;  %s3942_s19 = sld [smem:[%s6642_s0 + %s5647_s15]]  }
  0x2d   :  { %v313_v42 = vmul.f32 0.0625, %v312_v38  ;;  %v555_v44 = vrot.slane %v554_v41, 1  ;;  %5063 = vmatpush3.bf16.xpose.msk.msra.mxu1 %vm5836_vm10, %v5058_v17  ;;  %v4014_v38 = vld [vmem:[%s5792_s11 + $0x20] sm:$0xff]  ;;  %s3958_s10 = sld [smem:[%s6642_s0 + %s5661_s7]]  }
  0x2e   :  { %5066 = vmatprep.subr.msk.bf16.mxu1 %vm5836_vm10, %v5064_v40  ;;  %v799_v50 = vrot.slane %v798_v48, 1  ;;  %s3959_s15 = sld [smem:[%s6642_s0 + %s5662_s12]]  }
  0x2f   :  { %v314_v45 = vadd.f32 1e-05, %v313_v42  ;;  %v556_v47 = vadd.f32 %v555_v44, %v554_v41  ;;  %v238_v41 = vld [vmem:[%s3948_s23] sm:$0xff]  ;;  %v239_v42 = vld [vmem:[%s3948_s23 + $0x8] sm:$0xff]  ;;  %v240_v44 = vld [vmem:[%s3948_s23 + $0x10] sm:$0xff] }
  0x30   :  { %v800_v52 = vadd.f32 %v799_v50, %v798_v48  ;;  %v5127_v43 = vpack.c.bf16 %v239_v42, %v238_v41  ;;  %v234_v48 = vld [vmem:[%s3947_s1] sm:$0xff] }
  0x31   :  { %5516 = vrsqrt.f32 %v314_v45  ;;  %v557_v49 = vmul.f32 0.0625, %v556_v47  ;;  %v241_v45 = vld [vmem:[%s3948_s23 + $0x18] sm:$0xff]  ;;  %v196_v47 = vld [vmem:[%s3926_s27] sm:$0x3]  ;;  %s3950_s23 = sld [smem:[%s6642_s0 + %s5648_s20]]  }
  0x32   :  { %v801_v53 = vmul.f32 0.0625, %v800_v52  ;;  %v5130_v46 = vpack.c.bf16 %v241_v45, %v240_v44  ;;  %v237_v52 = vld [vmem:[%s3947_s1 + $0x18] sm:$0xff]  ;;  %v3984_v12 = vld [vmem:[%s3934_s14] ss:$0 sm:$0xff]  ;;  %s3944_s27 = sld [smem:[%s6642_s0 + %s5649_s24]]   ;;  %s5654_s14 = smov 26  }
  0x33   :  { %v558_v51 = vadd.f32 1e-05, %v557_v49  ;;  %v235_v49 = vld [vmem:[%s3947_s1 + $0x8] sm:$0xff]  ;;  %s3946_s18 = sld [smem:[%s6642_s0 + %s5654_s14]]  }
  0x34   :  { %v802_v56 = vadd.f32 1e-05, %v801_v53  ;;  %v5133_v50 = vpack.c.bf16 %v235_v49, %v234_v48  ;;  %s3961_s20 = sld [smem:[%s6642_s0 + %s5663_s16]]  }
  0x35   :  { %5518 = vrsqrt.f32 %v558_v51  ;;  %5069 = vmatpush3.bf16.xpose.msk.msra.mxu1 %vm5836_vm10, %v5064_v40  ;;  %v5070_v40 = vpack.c.bf16 %v4015_v39, %v4014_v38  ;;  %v236_v51 = vld [vmem:[%s3947_s1 + $0x10] sm:$0xff]  ;;  %s3938_s1 = sld [smem:[%s6642_s0 + %s5650_s28]]   ;;  %s5658_s28 = smov 80  }
  0x36   :  { %5520 = vrsqrt.f32 %v802_v56  ;;  %v5137_v53 = vpack.c.bf16 %v237_v52, %v236_v51  ;;  %s3951_s24 = sld [smem:[%s6642_s0 + %s5664_s21]]  }
  0x37   :  { %5072 = vmatprep.subr.msk.bf16.mxu1 %vm5836_vm10, %v5070_v40 }
  0x38   :  { %v4054_v34 = vld [vmem:[%s3944_s27] ss:$0 sm:$0xff]  ;;  %s5657_s27 = smov 96  }
  0x3b   :  { %v5517_v57 = vpop.eup %5516  ;;  %v4000_v39 = vld [vmem:[%s3938_s1] ss:$0 sm:$0xff] }
  0x3c   :  { %v316_v59 = vmul.f32 %v5517_v57, %v5795_v54  ;;  %v317_v60 = vmul.f32 %v5517_v57, %v5798_v55  ;;  %v5028_v54 = vpack.c.bf16 %v209_v1, %v208_v0  ;;  %v4017_v0 = vld [vmem:[%s5792_s11 + $0x38] sm:$0xff] }
  0x3e   :  { %v324_v62 = vmul.f32 %v3966_v58, %v316_v59  ;;  %v325_v63 = vmul.f32 %v3966_v58, %v317_v60  ;;  %v3968_v60 = vld [vmem:[%s3930_s5] ss:$0 sm:$0xff]  ;;  %s5652_s5 = smov 33  }
  0x3f   :  { %v5519_v2 = vpop.eup %5518  ;;  %s3953_s8 = sld [smem:[%s6642_s0 + %s5652_s5]]  }
  0x40   :  { %v332_v3 = vadd.f32 %v3967_v61, %v324_v62  ;;  %v333_v4 = vadd.f32 %v3967_v61, %v325_v63  ;;  %v560_v55 = vmul.f32 %v5519_v2, %v5813_v5  ;;  %v5521_v10 = vpop.eup %5520  ;;  %v561_v13 = vmul.f32 %v5519_v2, %v5816_v6  ;;  %v3999_v6 = vld [vmem:[%s3936_s9] ss:$0 sm:$0xff]  ;;  %s3940_s9 = sld [smem:[%s6642_s0 + %s5645_s17]]   ;;  %v4016_v63 = vld [vmem:[%s5792_s11 + $0x30] sm:$0xff] }
  0x41   :  { %v805_v31 = vmul.f32 %v5521_v10, %v5832_v20  ;;  %v5639_v20 = vmov 0.0   ;;  %s6348_s17 = sld [smem:[%s6642_s0 + %s5660_s3]]   ;;  %s5667_s3 = smov 43  }
  0x42   :  { %4500 = vmatprep.mubr.msk.f32.mxu0 %vm288_vm0, %v332_v3  ;;  %v568_v9 = vmul.f32 %v3982_v7, %v560_v55  ;;  %v569_v17 = vmul.f32 %v3982_v7, %v561_v13  ;;  %v5076_v7 = vpack.c.bf16 %v4017_v0, %v4016_v63  ;;  %v4025_v55 = vld [vmem:[%s5792_s11 + $0x48] sm:$0xff] }
  0x43   :  { %4501 = vmatmul.mubr.msk.f32.vlgmr.msra.gmra.mrb[0].mxu0 %vm288_vm0, %v333_v4  ;;  %v813_v26 = vmul.f32 %v3998_v15, %v805_v31  ;;  %v5100_v31 = vpack.c.bf16 %v4037_v23, %v4036_v22  ;;  %vm6065_vm0 = vmpackc.low %vm1877_vm15, %vm1877_vm15 }
  0x44   :  { %5027 = vmatpush3.bf16.xpose.msk.msra.mxu0 %vm5753_vm6, %v5749_v30  ;;  %v576_v5 = vadd.f32 %v3983_v8, %v568_v9  ;;  %v804_v30 = vmul.f32 %v5521_v10, %v5829_v19  ;;  %v577_v19 = vadd.f32 %v3983_v8, %v569_v17  ;;  %v4026_v10 = vld [vmem:[%s5792_s11 + $0x50] sm:$0xff] }
  0x45   :  { %5030 = vmatprep.subr.msk.bf16.mxu0 %vm5753_vm6, %v5028_v54  ;;  %v821_v32 = vadd.f32 %v3999_v6, %v813_v26  ;;  %v4044_v26 = vld [vmem:[%s5792_s11 + $0x80] sm:$0xff]  ;;  %v255_v52 = vld [vmem:[%s3953_s8 + $0x8] sm:$0xff]  ;;  %v260_v63 = vld [vmem:[%s3953_s8 + $0x30] sm:$0xff] }
  0x46   :  { %4522 = vmatprep.mubr.msk.f32.mxu0 %vm533_vm4, %v576_v5  ;;  %v812_v18 = vmul.f32 %v3998_v15, %v804_v30  ;;  %v3975_v61 = vld [vmem:[%s3940_s9] ss:$0 sm:$0xff]  ;;  %v4027_v5 = vld [vmem:[%s5792_s11 + $0x58] sm:$0xff]  ;;  %v5106_v29 = vpack.c.bf16 %v4045_v28, %v4044_v26  ;;  %s5653_s9 = smov 29  }
  0x47   :  { %v5088_v30 = vpack.c.bf16 %v4027_v5, %v4026_v10  ;;  %v4034_v15 = vld [vmem:[%s5792_s11 + $0x60] sm:$0xff]  ;;  %v261_v0 = vld [vmem:[%s3953_s8 + $0x38] sm:$0xff]  ;;  %s3949_s13 = sld [smem:[%s6642_s0 + %s5653_s9]]   ;;  %s5669_s9 = smov 44  }
  0x48   :  { %v820_v24 = vadd.f32 %v3999_v6, %v812_v18  ;;  %v5094_v17 = vpack.c.bf16 %v4035_v16, %v4034_v15  ;;  %v3991_v18 = vld [vmem:[%s3942_s19] ss:$0 sm:$0xff]  ;;  %s5655_s19 = smov 34  }
  0x49   :  { %v254_v51 = vld [vmem:[%s3953_s8] sm:$0xff]  ;;  %s3954_s22 = sld [smem:[%s6642_s0 + %s5655_s19]]  }
  0x4c   :  { %5033 = vmatpush3.bf16.xpose.msk.msra.mxu0 %vm5753_vm6, %v5028_v54  ;;  %v4024_v54 = vld [vmem:[%s5792_s11 + $0x40] sm:$0xff] }
  0x4d   :  { %5048 = vmatprep.subr.msk.bf16.mxu0 %vm5903_vm11, %v5046_v14  ;;  %v5082_v8 = vpack.c.bf16 %v4025_v55, %v4024_v54 }
  0x53   :  { %4523 = vmatmul.mubr.msk.f32.vlgmr.msra.gmra.mrb[2].mxu0 %vm533_vm4, %v577_v19  ;;  %vm3902_vm4 = vcmask 123904  }
  0x54   :  { %5051 = vmatpush3.bf16.xpose.msk.msra.mxu0 %vm5903_vm11, %v5046_v14  ;;  %4544 = vmatprep.mubr.msk.f32.mxu0 %vm777_vm5, %v820_v24 }
  0x55   :  { %5054 = vmatprep.subr.msk.bf16.mxu0 %vm5903_vm11, %v5052_v25 }
  0x5c   :  { %5057 = vmatpush3.bf16.xpose.msk.msra.mxu0 %vm5903_vm11, %v5052_v25 }
  0x5d   :  { %5118 = vmatprep.subr.bf16.mxu0 %v5637_v27 }
  0x63   :  { %4545 = vmatmul.mubr.msk.f32.vlgmr.msra.gmra.mrb[4].mxu0 %vm777_vm5, %v821_v32  ;;  %v243_v32 = vld [vmem:[%s3950_s23] sm:$0xff]  ;;  %vm3910_vm5 = vcmask 1024  }
  0x64   :  { %5121 = vmatpush3.bf16.xpose.msk.msra.mxu0 %vm5120_vm13, %v5119_v33  ;;  %4610 = vmatprep.mubr.msk.f32.mxu0 %vm5638_vm14, %v5639_v20  ;;  %v244_v33 = vld [vmem:[%s3950_s23 + $0x8] sm:$0xff]  ;;  %s5656_s23 = smov 35  }
  0x65   :  { %5122 = vmatprep.subr.bf16.mxu0 %v5637_v27  ;;  %v5141_v38 = vpack.c.bf16 %v244_v33, %v243_v32  ;;  %s3955_s26 = sld [smem:[%s6642_s0 + %s5656_s23]]  }
  0x6b   :  { %v6170_v28 = vld [vmem:[%s3955_s26] ss:$0 sm:$0xff] }
  0x6c   :  { %5125 = vmatpush3.bf16.xpose.msk.msra.mxu0 %vm5120_vm13, %v5123_v36  ;;  %v4046_v36 = vld [vmem:[%s5792_s11 + $0x90] sm:$0xff] }
  0x6d   :  { %5126 = vmatprep.subr.bf16.mxu0 %v5637_v27 }
  0x73   :  { %4611 = vmatmul.mubr.msk.f32.vlgmr.msra.gmra.mrb[6].mxu0 %vm1433_vm12, %v195_v37  ;;  %v4047_v37 = vld [vmem:[%s5792_s11 + $0x98] sm:$0xff]  ;;  %s5651_s11 = smov 32  }
  0x74   :  { %4621 = vmatprep.mubr.msk.f32.mxu0 %vm5638_vm14, %v5639_v20  ;;  %5128 = vmatpush3.bf16.xpose.msra.mxu0 %v5127_v43  ;;  %v5112_v43 = vpack.c.bf16 %v4047_v37, %v4046_v36  ;;  %s6052_s4 = sld [smem:[%s6642_s0 + %s5651_s11]]  }
  0x75   :  { %5129 = vmatprep.subr.bf16.mxu0 %v5637_v27 }
  0x7a   :  { %v246_v48 = vld [vmem:[%s6052_s4] sm:$0xff]  ;;  %v247_v49 = vld [vmem:[%s6052_s4 + $0x8] sm:$0xff] }
  0x7b   :  { %v250_v10 = vld [vmem:[%s6052_s4 + $0x20] sm:$0xff]  ;;  %v251_v5 = vld [vmem:[%s6052_s4 + $0x28] sm:$0xff] }
  0x7c   :  { %5131 = vmatpush3.bf16.xpose.msra.mxu0 %v5130_v46 }
  0x7d   :  { %5132 = vmatprep.subr.bf16.mxu0 %v5637_v27 }
  0x83   :  { %4622 = vmatmul.mubr.f32.vlgmr.msra.gmra.mrb[8].mxu0 %v196_v47 }
  0x84   :  { %5135 = vmatpush3.bf16.xpose.msk.msra.mxu0 %vm5836_vm10, %v5133_v50  ;;  %4632 = vmatprep.mubr.msk.f32.mxu0 %vm5638_vm14, %v5639_v20  ;;  %v5144_v50 = vpack.c.bf16 %v247_v49, %v246_v48 }
  0x85   :  { %5136 = vmatprep.subr.bf16.mxu0 %v5637_v27 }
  0x8c   :  { %5139 = vmatpush3.bf16.xpose.msk.msra.mxu0 %vm5836_vm10, %v5137_v53  ;;  %v6061_v53 = vpack.c.bf16 %v255_v52, %v254_v51 }
  0x8d   :  { %5140 = vmatprep.subr.bf16.mxu0 %v5637_v27 }
  0xef   :  { %v4513_v56 = vpop.f32.mrb[0].mxu1 }
  0xf0   :  { %v524_v57 = vpop.f32.mrb[1].mxu1  ;;  %v530_v11 = vadd.f32 %v4513_v56, %v3975_v61 }
  0xf1   :  { %v525_v3 = vadd.f32 %v3975_v61, %v524_v57  ;;  %v256_v57 = vld [vmem:[%s3953_s8 + $0x10] sm:$0xff]  ;;  %v259_v61 = vld [vmem:[%s3953_s8 + $0x28] sm:$0xff] }
  0xff   :  { %v5962_v58 = vpop.f32.mrb[2].mxu1 }
 0x100   :  { %v768_v59 = vpop.f32.mrb[3].mxu1 }
 0x101   :  { %v769_v24 = vadd.f32 %v3991_v18, %v768_v59 }
 0x116   :  { %v4502_v62 = vpop.f32.mrb[0].mxu0 }
 0x117   :  { %v424_v1 = vpop.f32.mrb[1].mxu0  ;;  %v430_v4 = vadd.f32 %v4502_v62, %v3968_v60 }
 0x118   :  { %v425_v2 = vadd.f32 %v3968_v60, %v424_v1  ;;  %v258_v60 = vld [vmem:[%s3953_s8 + $0x20] sm:$0xff]  ;;  %v6085_v1 = vpack.c.bf16 %v261_v0, %v260_v63 }
 0x119   :  { %v6079_v62 = vpack.c.bf16 %v259_v61, %v258_v60 }
 0x11a   :  { %4555 = vmatprep.mubr.msk.f32.mxu1 %vm925_vm9, %v425_v2  ;;  %v4065_v2 = vld [vmem:[%s3949_s13] ss:$0 sm:$0xff]  ;;  %s3964_s13 = sld [smem:[%s6642_s0 + %s5669_s9]]  }
 0x11b   :  { %4556 = vmatmul.mubr.msk.f32.vlgmr.msra.gmra.mrb[4].mxu1 %vm925_vm9, %v430_v4  ;;  %v248_v4 = vld [vmem:[%s6052_s4 + $0x10] sm:$0xff] }
 0x11c   :  { %5075 = vmatpush3.bf16.xpose.msk.msra.mxu1 %vm5836_vm10, %v5070_v40  ;;  %4566 = vmatprep.mubr.msk.f32.mxu1 %vm925_vm9, %v525_v3  ;;  %v774_v40 = vadd.f32 %v5962_v58, %v3991_v18  ;;  %v257_v58 = vld [vmem:[%s3953_s8 + $0x18] sm:$0xff] }
 0x11d   :  { %5078 = vmatprep.subr.msk.bf16.mxu1 %vm5836_vm10, %v5076_v7  ;;  %v6073_v59 = vpack.c.bf16 %v257_v58, %v256_v57 }
 0x124   :  { %5081 = vmatpush3.bf16.xpose.msk.msra.mxu1 %vm5836_vm10, %v5076_v7  ;;  %v249_v7 = vld [vmem:[%s6052_s4 + $0x18] sm:$0xff] }
 0x125   :  { %5084 = vmatprep.subr.msk.bf16.mxu1 %vm5836_vm10, %v5082_v8 }
 0x126   :  { %v4524_v9 = vpop.f32.mrb[2].mxu0 }
 0x127   :  { %v668_v13 = vpop.f32.mrb[3].mxu0  ;;  %v674_v25 = vadd.f32 %v4524_v9, %v3984_v12  ;;  %v5150_v9 = vpack.c.bf16 %v249_v7, %v248_v4 }
 0x128   :  { %v669_v14 = vadd.f32 %v3984_v12, %v668_v13  ;;  %v252_v12 = vld [vmem:[%s6052_s4 + $0x30] sm:$0xff]  ;;  %v253_v13 = vld [vmem:[%s6052_s4 + $0x38] sm:$0xff] }
 0x129   :  { %v5162_v16 = vpack.c.bf16 %v253_v13, %v252_v12 }
 0x12b   :  { %4567 = vmatmul.mubr.msk.f32.vlgmr.msra.gmra.mrb[4].mxu1 %vm925_vm9, %v530_v11  ;;  %v5156_v11 = vpack.c.bf16 %v251_v5, %v250_v10 }
 0x12c   :  { %5087 = vmatpush3.bf16.xpose.msk.msra.mxu1 %vm5836_vm10, %v5082_v8  ;;  %4577 = vmatprep.mubr.msk.f32.mxu1 %vm925_vm9, %v669_v14 }
 0x12d   :  { %5090 = vmatprep.subr.msk.bf16.mxu1 %vm5836_vm10, %v5088_v30 }
 0x134   :  { %5093 = vmatpush3.bf16.xpose.msk.msra.mxu1 %vm5836_vm10, %v5088_v30  ;;  %v4013_v30 = vld [vmem:[%s3946_s18] ss:$0 sm:$0xff] }
 0x135   :  { %5096 = vmatprep.subr.msk.bf16.mxu1 %vm5836_vm10, %v5094_v17 }
 0x136   :  { %v4546_v6 = vpop.f32.mrb[4].mxu0 }
 0x137   :  { %v912_v19 = vpop.f32.mrb[5].mxu0  ;;  %v918_v45 = vadd.f32 %v4546_v6, %v4000_v39 }
 0x138   :  { %v913_v44 = vadd.f32 %v4000_v39, %v912_v19  ;;  %v4070_v19 = vld [vmem:[%s3954_s22] ss:$0 sm:$0xff] }
 0x13b   :  { %4578 = vmatmul.mubr.msk.f32.vlgmr.msra.gmra.mrb[4].mxu1 %vm925_vm9, %v674_v25 }
 0x13c   :  { %5099 = vmatpush3.bf16.xpose.msk.msra.mxu1 %vm5836_vm10, %v5094_v17  ;;  %4588 = vmatprep.mubr.msk.f32.mxu1 %vm925_vm9, %v769_v24 }
 0x13d   :  { %5102 = vmatprep.subr.msk.bf16.mxu1 %vm5836_vm10, %v5100_v31 }
 0x144   :  { %5105 = vmatpush3.bf16.xpose.msk.msra.mxu1 %vm5836_vm10, %v5100_v31 }
 0x145   :  { %5108 = vmatprep.subr.msk.bf16.mxu1 %vm5836_vm10, %v5106_v29 }
 0x146   :  { %v1515_v35 = vpop.f32.mrb[6].mxu0 }
 0x147   :  { %v1516_v41 = vadd.f32 %v4054_v34, %v1515_v35  ;;  %v4612_v42 = vpop.f32.mrb[7].mxu0 }
 0x149   :  { %4633 = vmatmul.mubr.msk.f32.vlgmr.msra.gmra.mrb[10].mxu0 %vm925_vm9, %v1516_v41 }
 0x14a   :  { %5143 = vmatpush3.bf16.xpose.msk.msra.mxu0 %vm5836_vm10, %v5141_v38  ;;  %4639 = vmatprep.mubr.msk.f32.mxu0 %vm5638_vm14, %v5639_v20 }
 0x14b   :  { %4589 = vmatmul.mubr.msk.f32.vlgmr.msra.gmra.mrb[4].mxu1 %vm925_vm9, %v774_v40  ;;  %5146 = vmatprep.subr.msk.bf16.mxu0 %vm5836_vm10, %v5144_v50 }
 0x14c   :  { %5111 = vmatpush3.bf16.xpose.msk.msra.mxu1 %vm5836_vm10, %v5106_v29  ;;  %4599 = vmatprep.mubr.msk.f32.mxu1 %vm925_vm9, %v913_v44 }
 0x14d   :  { %5114 = vmatprep.subr.msk.bf16.mxu1 %vm5836_vm10, %v5112_v43 }
 0x154   :  { %5117 = vmatpush3.bf16.xpose.msk.msra.mxu1 %vm5836_vm10, %v5112_v43 }
 0x155   :  { %5168 = vmatprep.subr.bf16.mxu1 %v5637_v27 }
 0x156   :  { %v1585_v46 = vpop.f32.mrb[8].mxu0 }
 0x157   :  { %v4623_v47 = vpop.f32.mrb[9].mxu0 }
 0x15b   :  { %4600 = vmatmul.mubr.msk.f32.vlgmr.msra.gmra.mrb[4].mxu1 %vm925_vm9, %v918_v45 }
 0x15c   :  { %4677 = vmatprep.mubr.msk.f32.mxu1 %vm5638_vm14, %v5639_v20  ;;  %5171 = vmatpush3.bf16.xpose.msk.msra.mxu1 %vm6065_vm0, %v6061_v53 }
 0x15d   :  { %5172 = vmatprep.subr.bf16.mxu1 %v5637_v27 }
 0x164   :  { %5175 = vmatpush3.bf16.xpose.msk.msra.mxu1 %vm6065_vm0, %v6073_v59 }
 0x165   :  { %5176 = vmatprep.subr.bf16.mxu1 %v5637_v27 }
 0x16c   :  { %5179 = vmatpush3.bf16.xpose.msk.msra.mxu1 %vm6065_vm0, %v6079_v62 }
 0x16d   :  { %5180 = vmatprep.subr.bf16.mxu1 %v5637_v27 }
 0x174   :  { %5183 = vmatpush3.bf16.xpose.msk.msra.mxu1 %vm6065_vm0, %v6085_v1 }
 0x175   :  { %5200 = vmatprep.subr.bf16.mxu1 %v5637_v27 }
 0x17b   :  { %4678 = vmatmul.mubr.f32.vlgmr.msra.gmra.mrb[6].mxu1 %v5639_v20 }
 0x17c   :  { %5203 = vmatpush3.bf16.xpose.msk.msra.mxu1 %vm6065_vm0, %v6061_v53  ;;  %4715 = vmatprep.mubr.msk.f32.mxu1 %vm5638_vm14, %v5639_v20 }
 0x17d   :  { %5204 = vmatprep.subr.bf16.mxu1 %v5637_v27 }
 0x184   :  { %5207 = vmatpush3.bf16.xpose.msk.msra.mxu1 %vm6065_vm0, %v6073_v59 }
 0x185   :  { %5208 = vmatprep.subr.bf16.mxu1 %v5637_v27 }
 0x18c   :  { %5211 = vmatpush3.bf16.xpose.msk.msra.mxu1 %vm6065_vm0, %v6079_v62 }
 0x18d   :  { %5212 = vmatprep.subr.bf16.mxu1 %v5637_v27 }
 0x194   :  { %5215 = vmatpush3.bf16.xpose.msk.msra.mxu1 %vm6065_vm0, %v6085_v1 }
 0x195   :  { %5232 = vmatprep.subr.bf16.mxu1 %v5637_v27 }
 0x21c   :  { %v1670_v3 = vpop.f32.mrb[10].mxu0 }
 0x21d   :  { %v1671_v54 = vadd.f32 %v1670_v3, %v1585_v46  ;;  %v4634_v55 = vpop.f32.mrb[11].mxu0 }
 0x21f   :  { %v1680_v8 = vadd.f32 %v4065_v2, %v1671_v54 }
 0x221   :  { %4640 = vmatmul.mubr.msk.f32.vlgmr.msra.gmra.mrb[12].mxu0 %vm925_vm9, %v1680_v8 }
 0x222   :  { %5149 = vmatpush3.bf16.xpose.msk.msra.mxu0 %vm5836_vm10, %v5144_v50 }
 0x223   :  { %5152 = vmatprep.subr.msk.bf16.mxu0 %vm5836_vm10, %v5150_v9 }
 0x22a   :  { %5155 = vmatpush3.bf16.xpose.msk.msra.mxu0 %vm5836_vm10, %v5150_v9 }
 0x22b   :  { %5158 = vmatprep.subr.msk.bf16.mxu0 %vm5836_vm10, %v5156_v11 }
 0x22e   :  { %v4601_v14 = vpop.f32.mrb[4].mxu1 }
 0x22f   :  { %v1416_v15 = vpop.f32.mrb[5].mxu1  ;;  %v5456_v18 = vadd.f32 %v4601_v14, %v4013_v30 }
 0x230   :  { %v5457_v17 = vadd.f32 %v4013_v30, %v1416_v15 }
 0x232   :  { %5161 = vmatpush3.bf16.xpose.msk.msra.mxu0 %vm5836_vm10, %v5156_v11  ;;  %4658 = vmatprep.mubr.msk.f32.mxu0 %vm925_vm9, %v5457_v17 }
 0x233   :  { %5164 = vmatprep.subr.msk.bf16.mxu0 %vm5836_vm10, %v5162_v16 }
 0x23a   :  { %5167 = vmatpush3.bf16.xpose.msk.msra.mxu0 %vm5836_vm10, %v5162_v16 }
 0x23b   :  { %5184 = vmatprep.subr.bf16.mxu0 %v5637_v27 }
 0x241   :  { %4659 = vmatmul.mubr.msk.f32.vlgmr.msra.gmra.mrb[14].mxu0 %vm925_vm9, %v5456_v18 }
 0x242   :  { %5187 = vmatpush3.bf16.xpose.msk.msra.mxu0 %vm6065_vm0, %v6061_v53  ;;  %4696 = vmatprep.mubr.msk.f32.mxu0 %vm5638_vm14, %v5639_v20 }
 0x243   :  { %5188 = vmatprep.subr.bf16.mxu0 %v5637_v27 }
 0x24a   :  { %5191 = vmatpush3.bf16.xpose.msk.msra.mxu0 %vm6065_vm0, %v6073_v59 }
 0x24b   :  { %5192 = vmatprep.subr.bf16.mxu0 %v5637_v27 }
 0x24e   :  { %v1971_v21 = vpop.f32.mrb[6].mxu1 }
 0x24f   :  { %v4679_v6 = vpop.f32.mrb[7].mxu1 }
 0x252   :  { %5195 = vmatpush3.bf16.xpose.msk.msra.mxu0 %vm6065_vm0, %v6079_v62 }
 0x253   :  { %5196 = vmatprep.subr.bf16.mxu0 %v5637_v27 }
 0x25a   :  { %5199 = vmatpush3.bf16.xpose.msk.msra.mxu0 %vm6065_vm0, %v6085_v1 }
 0x25b   :  { %5216 = vmatprep.subr.bf16.mxu0 %v5637_v27 }
 0x2f4   :  { %v6158_v22 = vpop.f32.mrb[12].mxu0 }
 0x2f5   :  { %v4641_v23 = vpop.f32.mrb[13].mxu0 }
 0x314   :  { %v4660_v24 = vpop.f32.mrb[14].mxu0 }
 0x315   :  { %v6166_v25 = vadd.f32 %v4660_v24, %v4070_v19  ;;  %v1868_v31 = vpop.f32.mrb[15].mxu0 }
 0x316   :  { %v6168_v26 = vadd.f32 %v4070_v19, %v1868_v31 }
 0x318   :  { %v1975_v29 = vadd.f32 %v1971_v21, %v6168_v26 }
 0x31a   :  { %v1982_v32 = vadd.f32 %v6170_v28, %v1975_v29 }
 0x31c   :  { %5522 = vtanh.f32 %v1982_v32  ;;  %v1983_v34 = vmul.f32 0.5, %v1982_v32 }
 0x31e   :  { %5524 = vtanh.f32 %v1983_v34 }
 0x326   :  { %v5523_v33 = vpop.eup %5522 }
 0x327   :  { %1990 = vrot.lane.b32.xlu0 %v5523_v33, %s5657_s27 }
 0x328   :  { %v5525_v35 = vpop.eup %5524 }
 0x329   :  { %v1985_v36 = vadd.f32 1.0, %v5525_v35 }
 0x32b   :  { %v1986_v37 = vmul.f32 0.5, %v1985_v36 }
 0x32d   :  { %v1988_v40 = vmul.f32 0.0, %v1986_v37 }
 0x399   :  { %v1991_v38 = vpop.permute.xlu0 %1990 }
 0x39a   :  { %v1993_v39 = vmul.f32 %v1991_v38, %v1986_v37 }
 0x39c   :  { %1995 = vrot.lane.b32.xlu0 %v1993_v39, %s5635_s6 }
 0x40e   :  { %v1996_v41 = vpop.permute.xlu0 %1995 }
 0x40f   :  { %v1998_v42 = vadd.f32 %v1996_v41, %v1988_v40 }
 0x411   :  { %5526 = vtanh.f32 %v1998_v42  ;;  %v2091_v2 = vrot.slane %v1998_v42, 6 }
 0x41b   :  { %v5527_v43 = vpop.eup %5526 }
 0x41c   :  { %2001 = vrot.lane.b32.xlu1 %v5527_v43, %s5651_s11 }
 0x48e   :  { %v2002_v44 = vpop.permute.xlu1 %2001 }
 0x48f   :  { %v6177_v45 = vmul.f32 %v2002_v44, %v1986_v37 }
 0x491   :  { %2006 = vrot.lane.b32.xlu1 %v6177_v45, %s5658_s28 }
 0x503   :  { %v2007_v46 = vpop.permute.xlu1 %2006 }
 0x504   :  { %4697 = vmatmul.mubr.msk.f32.vlgmr.msra.gmra.mrb[16].mxu0 %vm1877_vm15, %v2007_v46 }
 0x505   :  { %5219 = vmatpush3.bf16.xpose.msk.msra.mxu0 %vm6065_vm0, %v6061_v53  ;;  %4734 = vmatprep.mubr.msk.f32.mxu0 %vm5638_vm14, %v5639_v20 }
 0x506   :  { %5220 = vmatprep.subr.bf16.mxu0 %v5637_v27 }
 0x50d   :  { %5223 = vmatpush3.bf16.xpose.msk.msra.mxu0 %vm6065_vm0, %v6073_v59 }
 0x50e   :  { %5224 = vmatprep.subr.bf16.mxu0 %v5637_v27 }
 0x515   :  { %5227 = vmatpush3.bf16.xpose.msk.msra.mxu0 %vm6065_vm0, %v6079_v62 }
 0x516   :  { %5228 = vmatprep.subr.bf16.mxu0 %v5637_v27 }
 0x51d   :  { %5231 = vmatpush3.bf16.xpose.msk.msra.mxu0 %vm6065_vm0, %v6085_v1 }
 0x51e   :  { %5248 = vmatprep.subr.bf16.mxu0 %v5637_v27 }
 0x5d7   :  { %v2076_v47 = vpop.f32.mrb[16].mxu0 }
 0x5d8   :  { %v2081_v48 = vrot.slane %v2076_v47, 6  ;;  %v4698_v49 = vpop.f32.mrb[17].mxu0 }
 0x5da   :  { %v2083_v50 = vadd.f32 %v2081_v48, %v6168_v26 }
 0x5dc   :  { %v2084_v51 = vadd.f32 %v6170_v28, %v2083_v50 }
 0x5de   :  { %5528 = vtanh.f32 %v2084_v51  ;;  %v2085_v57 = vmul.f32 0.5, %v2084_v51 }
 0x5e0   :  { %5530 = vtanh.f32 %v2085_v57 }
 0x5e8   :  { %v5529_v52 = vpop.eup %5528 }
 0x5e9   :  { %2095 = vrot.lane.b32.xlu0 %v5529_v52, %s5657_s27 }
 0x5ea   :  { %v5531_v58 = vpop.eup %5530 }
 0x5eb   :  { %v2087_v60 = vadd.f32 1.0, %v5531_v58 }
 0x5ed   :  { %v2088_v61 = vmul.f32 0.5, %v2087_v60 }
 0x5ef   :  { %v2093_v3 = vmul.f32 %v2091_v2, %v2088_v61 }
 0x65b   :  { %v2096_v63 = vpop.permute.xlu0 %2095 }
 0x65c   :  { %v2098_v0 = vmul.f32 %v2096_v63, %v2088_v61 }
 0x65e   :  { %2100 = vrot.lane.b32.xlu1 %v2098_v0, %s5635_s6 }
 0x6d0   :  { %v2101_v4 = vpop.permute.xlu1 %2100 }
 0x6d1   :  { %v2103_v7 = vadd.f32 %v2101_v4, %v2093_v3 }
 0x6d3   :  { %5532 = vtanh.f32 %v2103_v7  ;;  %v2197_v23 = vrot.slane %v2103_v7, 6 }
 0x6dd   :  { %v5533_v54 = vpop.eup %5532 }
 0x6de   :  { %2106 = vrot.lane.b32.xlu0 %v5533_v54, %s5651_s11 }
 0x750   :  { %v2107_v55 = vpop.permute.xlu0 %2106 }
 0x751   :  { %v2109_v8 = vmul.f32 %v2107_v55, %v2088_v61 }
 0x753   :  { %v2111_v9 = vrot.slane %v2109_v8, 2  ;;  %v2743_v34 = vsel %vm2742_vm1, %v6177_v45, %v2109_v8 }
 0x755   :  { %2112 = vrot.lane.b32.xlu1 %v2111_v9, %s5658_s28 }
 0x7c7   :  { %v2113_v10 = vpop.permute.xlu1 %2112 }
 0x7c8   :  { %4716 = vmatmul.mubr.msk.f32.vlgmr.msra.gmra.mrb[8].mxu1 %vm1877_vm15, %v2113_v10 }
 0x7c9   :  { %5235 = vmatpush3.bf16.xpose.msk.msra.mxu1 %vm6065_vm0, %v6061_v53  ;;  %4753 = vmatprep.mubr.msk.f32.mxu1 %vm5638_vm14, %v5639_v20 }
 0x7ca   :  { %5236 = vmatprep.subr.bf16.mxu1 %v5637_v27 }
 0x7d1   :  { %5239 = vmatpush3.bf16.xpose.msk.msra.mxu1 %vm6065_vm0, %v6073_v59 }
 0x7d2   :  { %5240 = vmatprep.subr.bf16.mxu1 %v5637_v27 }
 0x7d9   :  { %5243 = vmatpush3.bf16.xpose.msk.msra.mxu1 %vm6065_vm0, %v6079_v62 }
 0x7da   :  { %5244 = vmatprep.subr.bf16.mxu1 %v5637_v27 }
 0x7e1   :  { %5247 = vmatpush3.bf16.xpose.msk.msra.mxu1 %vm6065_vm0, %v6085_v1 }
 0x7e2   :  { %5264 = vmatprep.subr.bf16.mxu1 %v5637_v27 }
 0x89b   :  { %v2182_v5 = vpop.f32.mrb[8].mxu1 }
 0x89c   :  { %v2187_v11 = vrot.slane %v2182_v5, 4  ;;  %v4717_v12 = vpop.f32.mrb[9].mxu1 }
 0x89e   :  { %v2189_v13 = vadd.f32 %v2187_v11, %v6168_v26 }
 0x8a0   :  { %v2190_v30 = vadd.f32 %v6170_v28, %v2189_v13 }
 0x8a2   :  { %5534 = vtanh.f32 %v2190_v30  ;;  %v2191_v15 = vmul.f32 0.5, %v2190_v30 }
 0x8a4   :  { %5536 = vtanh.f32 %v2191_v15 }
 0x8ac   :  { %v5535_v14 = vpop.eup %5534 }
 0x8ad   :  { %2201 = vrot.lane.b32.xlu0 %v5535_v14, %s5657_s27 }
 0x8ae   :  { %v5537_v16 = vpop.eup %5536 }
 0x8af   :  { %v2193_v17 = vadd.f32 1.0, %v5537_v16 }
 0x8b1   :  { %v2194_v18 = vmul.f32 0.5, %v2193_v17 }
 0x8b3   :  { %v2199_v19 = vmul.f32 %v2197_v23, %v2194_v18 }
 0x91f   :  { %v2202_v21 = vpop.permute.xlu0 %2201 }
 0x920   :  { %v2204_v6 = vmul.f32 %v2202_v21, %v2194_v18 }
 0x922   :  { %2206 = vrot.lane.b32.xlu1 %v2204_v6, %s5635_s6 }
 0x994   :  { %v2207_v24 = vpop.permute.xlu1 %2206 }
 0x995   :  { %v2209_v31 = vadd.f32 %v2207_v24, %v2199_v19 }
 0x997   :  { %5538 = vtanh.f32 %v2209_v31  ;;  %v2303_v50 = vrot.slane %v2209_v31, 6 }
 0x9a1   :  { %v5539_v29 = vpop.eup %5538 }
 0x9a2   :  { %2212 = vrot.lane.b32.xlu0 %v5539_v29, %s5651_s11 }
 0xa14   :  { %v2213_v32 = vpop.permute.xlu0 %2212 }
 0xa15   :  { %v2215_v33 = vmul.f32 %v2213_v32, %v2194_v18 }
 0xa17   :  { %v2217_v35 = vrot.slane %v2215_v33, 4  ;;  %v2745_v36 = vsel %vm2744_vm2, %v2743_v34, %v2215_v33 }
 0xa19   :  { %2218 = vrot.lane.b32.xlu1 %v2217_v35, %s5658_s28 }
 0xa8b   :  { %v2219_v37 = vpop.permute.xlu1 %2218 }
 0xa8c   :  { %4735 = vmatmul.mubr.msk.f32.vlgmr.msra.gmra.mrb[18].mxu0 %vm1877_vm15, %v2219_v37 }
 0xa8d   :  { %5251 = vmatpush3.bf16.xpose.msk.msra.mxu0 %vm6065_vm0, %v6061_v53  ;;  %4772 = vmatprep.mubr.msk.f32.mxu0 %vm5638_vm14, %v5639_v20 }
 0xa8e   :  { %5252 = vmatprep.subr.bf16.mxu0 %v5637_v27 }
 0xa95   :  { %5255 = vmatpush3.bf16.xpose.msk.msra.mxu0 %vm6065_vm0, %v6073_v59 }
 0xa96   :  { %5256 = vmatprep.subr.bf16.mxu0 %v5637_v27 }
 0xa9d   :  { %5259 = vmatpush3.bf16.xpose.msk.msra.mxu0 %vm6065_vm0, %v6079_v62 }
 0xa9e   :  { %5260 = vmatprep.subr.bf16.mxu0 %v5637_v27 }
 0xaa5   :  { %5263 = vmatpush3.bf16.xpose.msk.msra.mxu0 %vm6065_vm0, %v6085_v1 }
 0xaa6   :  { %5280 = vmatprep.subr.bf16.mxu0 %v5637_v27 }
 0xb5f   :  { %v2288_v38 = vpop.f32.mrb[18].mxu0 }
 0xb60   :  { %v2293_v39 = vrot.slane %v2288_v38, 2  ;;  %v4736_v40 = vpop.f32.mrb[19].mxu0 }
 0xb62   :  { %v2295_v41 = vadd.f32 %v2293_v39, %v6168_v26 }
 0xb64   :  { %v2296_v42 = vadd.f32 %v6170_v28, %v2295_v41 }
 0xb66   :  { %5540 = vtanh.f32 %v2296_v42  ;;  %v2297_v44 = vmul.f32 0.5, %v2296_v42 }
 0xb68   :  { %5542 = vtanh.f32 %v2297_v44 }
 0xb70   :  { %v5541_v43 = vpop.eup %5540 }
 0xb71   :  { %2307 = vrot.lane.b32.xlu0 %v5541_v43, %s5657_s27 }
 0xb72   :  { %v5543_v45 = vpop.eup %5542 }
 0xb73   :  { %v2299_v46 = vadd.f32 1.0, %v5543_v45 }
 0xb75   :  { %v2300_v47 = vmul.f32 0.5, %v2299_v46 }
 0xb77   :  { %v2305_v51 = vmul.f32 %v2303_v50, %v2300_v47 }
 0xbe3   :  { %v2308_v48 = vpop.permute.xlu0 %2307 }
 0xbe4   :  { %v2310_v49 = vmul.f32 %v2308_v48, %v2300_v47 }
 0xbe6   :  { %2312 = vrot.lane.b32.xlu1 %v2310_v49, %s5635_s6 }
 0xc58   :  { %v2313_v52 = vpop.permute.xlu1 %2312 }
 0xc59   :  { %v2315_v57 = vadd.f32 %v2313_v52, %v2305_v51 }
 0xc5b   :  { %5544 = vtanh.f32 %v2315_v57  ;;  %v2406_v12 = vrot.slane %v2315_v57, 6 }
 0xc65   :  { %v5545_v26 = vpop.eup %5544 }
 0xc66   :  { %2318 = vrot.lane.b32.xlu0 %v5545_v26, %s5651_s11 }
 0xcd8   :  { %v2319_v58 = vpop.permute.xlu0 %2318 }
 0xcd9   :  { %v2321_v60 = vmul.f32 %v2319_v58, %v2300_v47 }
 0xcdb   :  { %v2323_v61 = vrot.slane %v2321_v60, 6  ;;  %v6259_v63 = vsel %vm2746_vm3, %v2745_v36, %v2321_v60 }
 0xcdd   :  { %2324 = vrot.lane.b32.xlu1 %v2323_v61, %s5658_s28 }
 0xd4f   :  { %v2325_v0 = vpop.permute.xlu1 %2324 }
 0xd50   :  { %4754 = vmatmul.mubr.msk.f32.vlgmr.msra.gmra.mrb[10].mxu1 %vm1877_vm15, %v2325_v0 }
 0xd51   :  { %5267 = vmatpush3.bf16.xpose.msk.msra.mxu1 %vm6065_vm0, %v6061_v53  ;;  %4791 = vmatprep.mubr.msk.f32.mxu1 %vm5638_vm14, %v5639_v20 }
 0xd52   :  { %5268 = vmatprep.subr.bf16.mxu1 %v5637_v27 }
 0xd59   :  { %5271 = vmatpush3.bf16.xpose.msk.msra.mxu1 %vm6065_vm0, %v6073_v59 }
 0xd5a   :  { %5272 = vmatprep.subr.bf16.mxu1 %v5637_v27 }
 0xd61   :  { %5275 = vmatpush3.bf16.xpose.msk.msra.mxu1 %vm6065_vm0, %v6079_v62 }
 0xd62   :  { %5276 = vmatprep.subr.bf16.mxu1 %v5637_v27 }
 0xd69   :  { %5279 = vmatpush3.bf16.xpose.msk.msra.mxu1 %vm6065_vm0, %v6085_v1 }
 0xe23   :  { %v2394_v2 = vpop.f32.mrb[10].mxu1 }
 0xe24   :  { %v2398_v3 = vadd.f32 %v2394_v2, %v6166_v25  ;;  %v4755_v4 = vpop.f32.mrb[11].mxu1 }
 0xe26   :  { %v2399_v7 = vadd.f32 %v6170_v28, %v2398_v3 }
 0xe28   :  { %5546 = vtanh.f32 %v2399_v7  ;;  %v2400_v55 = vmul.f32 0.5, %v2399_v7 }
 0xe2a   :  { %5548 = vtanh.f32 %v2400_v55 }
 0xe32   :  { %v5547_v54 = vpop.eup %5546 }
 0xe33   :  { %2410 = vrot.lane.b32.xlu0 %v5547_v54, %s5657_s27 }
 0xe34   :  { %v5549_v8 = vpop.eup %5548 }
 0xe35   :  { %v2402_v9 = vadd.f32 1.0, %v5549_v8 }
 0xe37   :  { %v2403_v10 = vmul.f32 0.5, %v2402_v9 }
 0xe39   :  { %v2408_v13 = vmul.f32 %v2406_v12, %v2403_v10 }
 0xea5   :  { %v2411_v5 = vpop.permute.xlu0 %2410 }
 0xea6   :  { %v2413_v11 = vmul.f32 %v2411_v5, %v2403_v10 }
 0xea8   :  { %2415 = vrot.lane.b32.xlu1 %v2413_v11, %s5635_s6 }
 0xf1a   :  { %v2416_v30 = vpop.permute.xlu1 %2415 }
 0xf1b   :  { %v2418_v14 = vadd.f32 %v2416_v30, %v2408_v13 }
 0xf1d   :  { %5550 = vtanh.f32 %v2418_v14  ;;  %v2511_v33 = vrot.slane %v2418_v14, 6 }
 0xf27   :  { %v5551_v15 = vpop.eup %5550 }
 0xf28   :  { %2421 = vrot.lane.b32.xlu0 %v5551_v15, %s5651_s11 }
 0xf9a   :  { %v2422_v16 = vpop.permute.xlu0 %2421 }
 0xf9b   :  { %v6285_v17 = vmul.f32 %v2422_v16, %v2403_v10 }
 0xf9d   :  { %2426 = vrot.lane.b32.xlu1 %v6285_v17, %s5658_s28 }
0x100f   :  { %v2427_v18 = vpop.permute.xlu1 %2426 }
0x1010   :  { %4773 = vmatmul.mubr.msk.f32.vlgmr.msra.gmra.mrb[20].mxu0 %vm1877_vm15, %v2427_v18 }
0x1011   :  { %5283 = vmatpush3.bf16.xpose.msk.msra.mxu0 %vm6065_vm0, %v6061_v53  ;;  %4810 = vmatprep.mubr.msk.f32.mxu0 %vm5638_vm14, %v5639_v20 }
0x1012   :  { %5284 = vmatprep.subr.bf16.mxu0 %v5637_v27 }
0x1019   :  { %5287 = vmatpush3.bf16.xpose.msk.msra.mxu0 %vm6065_vm0, %v6073_v59 }
0x101a   :  { %5288 = vmatprep.subr.bf16.mxu0 %v5637_v27 }
0x1021   :  { %5291 = vmatpush3.bf16.xpose.msk.msra.mxu0 %vm6065_vm0, %v6079_v62 }
0x1022   :  { %5292 = vmatprep.subr.bf16.mxu0 %v5637_v27 }
0x1029   :  { %5295 = vmatpush3.bf16.xpose.msk.msra.mxu0 %vm6065_vm0, %v6085_v1 }
0x102a   :  { %5320 = vmatprep.subr.bf16.mxu0 %v5637_v27 }
0x10e3   :  { %v2496_v53 = vpop.f32.mrb[20].mxu0 }
0x10e4   :  { %v2501_v21 = vrot.slane %v2496_v53, 6  ;;  %v4774_v6 = vpop.f32.mrb[21].mxu0 }
0x10e5   :  { %v265_v6 = vld [vmem:[%s6343_s2 + $0x8] sm:$0xff] }
0x10e6   :  { %v2503_v23 = vadd.f32 %v2501_v21, %v6166_v25 }
0x10e8   :  { %v2504_v59 = vadd.f32 %v6170_v28, %v2503_v23  ;;  %v272_v23 = vld [vmem:[%s6348_s17] sm:$0xff] }
0x10ea   :  { %5552 = vtanh.f32 %v2504_v59  ;;  %v2505_v62 = vmul.f32 0.5, %v2504_v59 }
0x10ec   :  { %5554 = vtanh.f32 %v2505_v62  ;;  %v266_v62 = vld [vmem:[%s6343_s2 + $0x10] sm:$0xff] }
0x10f4   :  { %v5553_v19 = vpop.eup %5552 }
0x10f5   :  { %2515 = vrot.lane.b32.xlu0 %v5553_v19, %s5657_s27  ;;  %v273_v19 = vld [vmem:[%s6348_s17 + $0x8] sm:$0xff] }
0x10f6   :  { %v5555_v24 = vpop.eup %5554 }
0x10f7   :  { %v2507_v31 = vadd.f32 1.0, %v5555_v24  ;;  %v267_v24 = vld [vmem:[%s6343_s2 + $0x18] sm:$0xff] }
0x10f9   :  { %v2508_v29 = vmul.f32 0.5, %v2507_v31 }
0x10fb   :  { %v2513_v34 = vmul.f32 %v2511_v33, %v2508_v29  ;;  %v275_v33 = vld [vmem:[%s6348_s17 + $0x18] sm:$0xff] }
0x1167   :  { %v2516_v32 = vpop.permute.xlu0 %2515 }
0x1168   :  { %v2518_v1 = vmul.f32 %v2516_v32, %v2508_v29  ;;  %v5302_v32 = vpack.c.bf16 %v267_v24, %v266_v62 }
0x116a   :  { %2520 = vrot.lane.b32.xlu1 %v2518_v1, %s5635_s6  ;;  %v274_v1 = vld [vmem:[%s6348_s17 + $0x10] sm:$0xff] }
0x11dc   :  { %v2521_v35 = vpop.permute.xlu1 %2520 }
0x11dd   :  { %v2523_v36 = vadd.f32 %v2521_v35, %v2513_v34  ;;  %v268_v34 = vld [vmem:[%s6343_s2 + $0x20] sm:$0xff]  ;;  %v269_v35 = vld [vmem:[%s6343_s2 + $0x28] sm:$0xff] }
0x11df   :  { %5556 = vtanh.f32 %v2523_v36  ;;  %v2617_v26 = vrot.slane %v2523_v36, 6  ;;  %v6373_v36 = vpack.c.bf16 %v275_v33, %v274_v1 }
0x11e9   :  { %v5557_v37 = vpop.eup %5556 }
0x11ea   :  { %2526 = vrot.lane.b32.xlu0 %v5557_v37, %s5651_s11  ;;  %v5308_v37 = vpack.c.bf16 %v269_v35, %v268_v34 }
0x125c   :  { %v2527_v38 = vpop.permute.xlu0 %2526 }
0x125d   :  { %v2529_v39 = vmul.f32 %v2527_v38, %v2508_v29  ;;  %v6356_v29 = vpack.c.bf16 %v273_v19, %v272_v23  ;;  %v276_v38 = vld [vmem:[%s6348_s17 + $0x20] sm:$0xff] }
0x125f   :  { %v2531_v40 = vrot.slane %v2529_v39, 2  ;;  %v2748_v4 = vsel %vm2742_vm1, %v6285_v17, %v2529_v39  ;;  %v277_v39 = vld [vmem:[%s6348_s17 + $0x28] sm:$0xff] }
0x1261   :  { %2532 = vrot.lane.b32.xlu1 %v2531_v40, %s5658_s28  ;;  %v270_v40 = vld [vmem:[%s6343_s2 + $0x30] sm:$0xff] }
0x12d3   :  { %v2533_v41 = vpop.permute.xlu1 %2532 }
0x12d4   :  { %4792 = vmatmul.mubr.msk.f32.vlgmr.msra.gmra.mrb[12].mxu1 %vm1877_vm15, %v2533_v41  ;;  %v271_v41 = vld [vmem:[%s6343_s2 + $0x38] sm:$0xff] }
0x13a7   :  { %v2602_v42 = vpop.f32.mrb[12].mxu1 }
0x13a8   :  { %v2607_v43 = vrot.slane %v2602_v42, 4  ;;  %v4793_v44 = vpop.f32.mrb[13].mxu1  ;;  %v6387_v42 = vpack.c.bf16 %v277_v39, %v276_v38 }
0x13a9   :  { %v278_v44 = vld [vmem:[%s6348_s17 + $0x30] sm:$0xff] }
0x13aa   :  { %v2609_v45 = vadd.f32 %v2607_v43, %v6166_v25  ;;  %v5314_v43 = vpack.c.bf16 %v271_v41, %v270_v40 }
0x13ac   :  { %v2610_v46 = vadd.f32 %v6170_v28, %v2609_v45  ;;  %v279_v45 = vld [vmem:[%s6348_s17 + $0x38] sm:$0xff] }
0x13ae   :  { %5558 = vtanh.f32 %v2610_v46  ;;  %v2611_v48 = vmul.f32 0.5, %v2610_v46  ;;  %v6399_v46 = vpack.c.bf16 %v279_v45, %v278_v44 }
0x13b0   :  { %5560 = vtanh.f32 %v2611_v48 }
0x13b8   :  { %v5559_v47 = vpop.eup %5558 }
0x13b9   :  { %2621 = vrot.lane.b32.xlu0 %v5559_v47, %s5657_s27 }
0x13ba   :  { %v5561_v49 = vpop.eup %5560 }
0x13bb   :  { %v2613_v50 = vadd.f32 1.0, %v5561_v49 }
0x13bd   :  { %v2614_v51 = vmul.f32 0.5, %v2613_v50 }
0x13bf   :  { %v2619_v58 = vmul.f32 %v2617_v26, %v2614_v51 }
0x142b   :  { %v2622_v52 = vpop.permute.xlu0 %2621 }
0x142c   :  { %v2624_v57 = vmul.f32 %v2622_v52, %v2614_v51 }
0x142e   :  { %2626 = vrot.lane.b32.xlu1 %v2624_v57, %s5635_s6  ;;  %v4153_v57 = vld [vmem:[%s3958_s10] ss:$0 sm:$0xff] }
0x14a0   :  { %v2627_v60 = vpop.permute.xlu1 %2626 }
0x14a1   :  { %v2629_v61 = vadd.f32 %v2627_v60, %v2619_v58 }
0x14a3   :  { %5562 = vtanh.f32 %v2629_v61 }
0x14ad   :  { %v5563_v0 = vpop.eup %5562 }
0x14ae   :  { %2632 = vrot.lane.b32.xlu0 %v5563_v0, %s5651_s11  ;;  %v6460_v0 = vld [vmem:[%s3959_s15] ss:$0 sm:$0xff] }
0x1520   :  { %v2633_v2 = vpop.permute.xlu0 %2632 }
0x1521   :  { %v2635_v3 = vmul.f32 %v2633_v2, %v2614_v51 }
0x1523   :  { %v2637_v7 = vrot.slane %v2635_v3, 4  ;;  %v6323_v54 = vsel %vm2744_vm2, %v2748_v4, %v2635_v3 }
0x1525   :  { %2638 = vrot.lane.b32.xlu1 %v2637_v7, %s5658_s28 }
0x1597   :  { %v2639_v55 = vpop.permute.xlu1 %2638 }
0x1598   :  { %4811 = vmatmul.mubr.msk.f32.vlgmr.msra.gmra.mrb[22].mxu0 %vm1877_vm15, %v2639_v55 }
0x1599   :  { %4848 = vmatprep.mubr.msk.f32.mxu0 %vm5638_vm14, %v5639_v20  ;;  %5323 = vmatpush3.bf16.xpose.msk.msra.mxu0 %vm6065_vm0, %v6356_v29 }
0x159a   :  { %5324 = vmatprep.subr.bf16.mxu0 %v5637_v27 }
0x15a1   :  { %5327 = vmatpush3.bf16.xpose.msk.msra.mxu0 %vm6065_vm0, %v6373_v36 }
0x15a2   :  { %5328 = vmatprep.subr.bf16.mxu0 %v5637_v27 }
0x15a9   :  { %5331 = vmatpush3.bf16.xpose.msk.msra.mxu0 %vm6065_vm0, %v6387_v42 }
0x15aa   :  { %5332 = vmatprep.subr.bf16.mxu0 %v5637_v27 }
0x15b1   :  { %5335 = vmatpush3.bf16.xpose.msk.msra.mxu0 %vm6065_vm0, %v6399_v46 }
0x15b2   :  { %5352 = vmatprep.subr.bf16.mxu0 %v5637_v27 }
0x15b8   :  { %4849 = vmatmul.mubr.f32.vlgmr.msra.gmra.mrb[24].mxu0 %v5639_v20 }
0x15b9   :  { %5355 = vmatpush3.bf16.xpose.msk.msra.mxu0 %vm6065_vm0, %v6356_v29  ;;  %4886 = vmatprep.mubr.msk.f32.mxu0 %vm5638_vm14, %v5639_v20 }
0x15ba   :  { %5356 = vmatprep.subr.bf16.mxu0 %v5637_v27 }
0x15c1   :  { %5359 = vmatpush3.bf16.xpose.msk.msra.mxu0 %vm6065_vm0, %v6373_v36 }
0x15c2   :  { %5360 = vmatprep.subr.bf16.mxu0 %v5637_v27 }
0x15c9   :  { %5363 = vmatpush3.bf16.xpose.msk.msra.mxu0 %vm6065_vm0, %v6387_v42 }
0x15ca   :  { %5364 = vmatprep.subr.bf16.mxu0 %v5637_v27 }
0x15d1   :  { %5367 = vmatpush3.bf16.xpose.msk.msra.mxu0 %vm6065_vm0, %v6399_v46 }
0x15d2   :  { %5384 = vmatprep.subr.bf16.mxu0 %v5637_v27 }
0x166b   :  { %v2708_v8 = vpop.f32.mrb[22].mxu0 }
0x166c   :  { %v2713_v9 = vrot.slane %v2708_v8, 2  ;;  %v4812_v10 = vpop.f32.mrb[23].mxu0 }
0x166e   :  { %v2715_v5 = vadd.f32 %v2713_v9, %v6166_v25  ;;  %v2723_v25 = vrot.slane %v2629_v61, 6 }
0x1670   :  { %v2716_v11 = vadd.f32 %v6170_v28, %v2715_v5 }
0x1672   :  { %5564 = vtanh.f32 %v2716_v11  ;;  %v2717_v13 = vmul.f32 0.5, %v2716_v11 }
0x1674   :  { %5566 = vtanh.f32 %v2717_v13 }
0x167c   :  { %v5565_v12 = vpop.eup %5564 }
0x167d   :  { %2727 = vrot.lane.b32.xlu0 %v5565_v12, %s5657_s27 }
0x167e   :  { %v5567_v30 = vpop.eup %5566 }
0x167f   :  { %v2719_v14 = vadd.f32 1.0, %v5567_v30 }
0x1681   :  { %v6332_v15 = vmul.f32 0.5, %v2719_v14 }
0x1683   :  { %v2725_v28 = vmul.f32 %v2723_v25, %v6332_v15 }
0x168b   :  { %v2956_v51 = vpop.f32.mrb[24].mxu0 }
0x168c   :  { %v4850_v52 = vpop.f32.mrb[25].mxu0 }
0x16ef   :  { %v2728_v16 = vpop.permute.xlu0 %2727 }
0x16f0   :  { %v2730_v17 = vmul.f32 %v2728_v16, %v6332_v15 }
0x16f2   :  { %2732 = vrot.lane.b32.xlu1 %v2730_v17, %s5635_s6 }
0x16f6   :  { %2759 = vrot.lane.b32.xlu1 %v6259_v63, %s5658_s28  ;;  %v264_v63 = vld [vmem:[%s6343_s2] sm:$0xff] }
0x16f7   :  { %v5296_v59 = vpack.c.bf16 %v265_v6, %v264_v63 }
0x16f9   :  { %5298 = vmatprep.subr.msk.bf16.mxu1 %vm6065_vm0, %v5296_v59 }
0x16fa   :  { %5301 = vmatpush3.bf16.xpose.msk.msra.mxu1 %vm6065_vm0, %v5296_v59 }
0x16fb   :  { %5304 = vmatprep.subr.msk.bf16.mxu1 %vm6065_vm0, %v5302_v32 }
0x1702   :  { %5307 = vmatpush3.bf16.xpose.msk.msra.mxu1 %vm6065_vm0, %v5302_v32 }
0x1703   :  { %5310 = vmatprep.subr.msk.bf16.mxu1 %vm6065_vm0, %v5308_v37 }
0x170a   :  { %5313 = vmatpush3.bf16.xpose.msk.msra.mxu1 %vm6065_vm0, %v5308_v37 }
0x170b   :  { %5316 = vmatprep.subr.msk.bf16.mxu1 %vm6065_vm0, %v5314_v43 }
0x1712   :  { %5319 = vmatpush3.bf16.xpose.msk.msra.mxu1 %vm6065_vm0, %v5314_v43 }
0x1713   :  { %5336 = vmatprep.subr.bf16.mxu1 %v5637_v27 }
0x1764   :  { %v2733_v18 = vpop.permute.xlu1 %2732 }
0x1765   :  { %v2735_v53 = vadd.f32 %v2733_v18, %v2725_v28 }
0x1767   :  { %5568 = vtanh.f32 %v2735_v53 }
0x1768   :  { %v2760_v21 = vpop.permute.xlu1 %2759 }
0x1769   :  { %4829 = vmatprep.mubr.msk.f32.mxu1 %vm1877_vm15, %v2760_v21 }
0x1771   :  { %v5569_v31 = vpop.eup %5568 }
0x1772   :  { %2738 = vrot.lane.b32.xlu0 %v5569_v31, %s5651_s11 }
0x17e4   :  { %v2739_v47 = vpop.permute.xlu0 %2738 }
0x17e5   :  { %v2741_v48 = vmul.f32 %v2739_v47, %v6332_v15 }
0x17e7   :  { %v2750_v49 = vsel %vm2746_vm3, %v6323_v54, %v2741_v48 }
0x17e8   :  { %2761 = vrot.lane.b32.xlu0 %v2750_v49, %s5658_s28 }
0x185a   :  { %v2762_v50 = vpop.permute.xlu0 %2761 }
0x185b   :  { %4830 = vmatmul.mubr.msk.f32.vlgmr.msra.gmra.mrb[14].mxu1 %vm1877_vm15, %v2762_v50 }
0x185c   :  { %5339 = vmatpush3.bf16.xpose.msk.msra.mxu1 %vm6065_vm0, %v6356_v29  ;;  %4867 = vmatprep.mubr.msk.f32.mxu1 %vm5638_vm14, %v5639_v20 }
0x185d   :  { %5340 = vmatprep.subr.bf16.mxu1 %v5637_v27 }
0x1864   :  { %5343 = vmatpush3.bf16.xpose.msk.msra.mxu1 %vm6065_vm0, %v6373_v36 }
0x1865   :  { %5344 = vmatprep.subr.bf16.mxu1 %v5637_v27 }
0x186c   :  { %5347 = vmatpush3.bf16.xpose.msk.msra.mxu1 %vm6065_vm0, %v6387_v42 }
0x186d   :  { %5348 = vmatprep.subr.bf16.mxu1 %v5637_v27 }
0x1874   :  { %5351 = vmatpush3.bf16.xpose.msk.msra.mxu1 %vm6065_vm0, %v6399_v46 }
0x1875   :  { %5368 = vmatprep.subr.bf16.mxu1 %v5637_v27 }
0x192e   :  { %v4831_v26 = vpop.f32.mrb[14].mxu1 }
0x192f   :  { %v6456_v58 = vadd.f32 %v4831_v26, %v4153_v57  ;;  %v2857_v60 = vpop.f32.mrb[15].mxu1 }
0x1930   :  { %v6458_v61 = vadd.f32 %v4153_v57, %v2857_v60 }
0x1932   :  { %v2960_v2 = vadd.f32 %v2956_v51, %v6458_v61 }
0x1934   :  { %v2967_v3 = vadd.f32 %v6460_v0, %v2960_v2 }
0x1936   :  { %5570 = vtanh.f32 %v2967_v3  ;;  %v2968_v7 = vmul.f32 0.5, %v2967_v3 }
0x1938   :  { %5572 = vtanh.f32 %v2968_v7 }
0x1940   :  { %v5571_v4 = vpop.eup %5570 }
0x1941   :  { %2975 = vrot.lane.b32.xlu1 %v5571_v4, %s5657_s27 }
0x1942   :  { %v5573_v54 = vpop.eup %5572 }
0x1943   :  { %v2970_v55 = vadd.f32 1.0, %v5573_v54 }
0x1945   :  { %v2971_v8 = vmul.f32 0.5, %v2970_v55 }
0x1947   :  { %v2973_v5 = vmul.f32 0.0, %v2971_v8 }
0x19b3   :  { %v2976_v9 = vpop.permute.xlu1 %2975 }
0x19b4   :  { %v2978_v10 = vmul.f32 %v2976_v9, %v2971_v8 }
0x19b6   :  { %2980 = vrot.lane.b32.xlu0 %v2978_v10, %s5635_s6 }
0x1a28   :  { %v2981_v11 = vpop.permute.xlu0 %2980 }
0x1a29   :  { %v2983_v12 = vadd.f32 %v2981_v11, %v2973_v5 }
0x1a2b   :  { %5574 = vtanh.f32 %v2983_v12  ;;  %v3076_v62 = vrot.slane %v2983_v12, 6 }
0x1a35   :  { %v5575_v13 = vpop.eup %5574 }
0x1a36   :  { %2986 = vrot.lane.b32.xlu1 %v5575_v13, %s5651_s11 }
0x1aa8   :  { %v2987_v30 = vpop.permute.xlu1 %2986 }
0x1aa9   :  { %v2989_v14 = vmul.f32 %v2987_v30, %v2971_v8 }
0x1aab   :  { %2991 = vrot.lane.b32.xlu0 %v2989_v14, %s5658_s28 }
0x1b1d   :  { %v2992_v15 = vpop.permute.xlu0 %2991 }
0x1b1e   :  { %4868 = vmatmul.mubr.msk.f32.vlgmr.msra.gmra.mrb[16].mxu1 %vm1877_vm15, %v2992_v15 }
0x1b1f   :  { %5371 = vmatpush3.bf16.xpose.msk.msra.mxu1 %vm6065_vm0, %v6356_v29  ;;  %4905 = vmatprep.mubr.msk.f32.mxu1 %vm5638_vm14, %v5639_v20 }
0x1b20   :  { %5372 = vmatprep.subr.bf16.mxu1 %v5637_v27 }
0x1b27   :  { %5375 = vmatpush3.bf16.xpose.msk.msra.mxu1 %vm6065_vm0, %v6373_v36 }
0x1b28   :  { %5376 = vmatprep.subr.bf16.mxu1 %v5637_v27 }
0x1b2f   :  { %5379 = vmatpush3.bf16.xpose.msk.msra.mxu1 %vm6065_vm0, %v6387_v42 }
0x1b30   :  { %5380 = vmatprep.subr.bf16.mxu1 %v5637_v27 }
0x1b37   :  { %5383 = vmatpush3.bf16.xpose.msk.msra.mxu1 %vm6065_vm0, %v6399_v46 }
0x1b38   :  { %5400 = vmatprep.subr.bf16.mxu1 %v5637_v27 }
0x1bf1   :  { %v3061_v16 = vpop.f32.mrb[16].mxu1 }
0x1bf2   :  { %v3066_v17 = vrot.slane %v3061_v16, 6  ;;  %v4869_v25 = vpop.f32.mrb[17].mxu1 }
0x1bf4   :  { %v3068_v28 = vadd.f32 %v3066_v17, %v6458_v61 }
0x1bf6   :  { %v3069_v18 = vadd.f32 %v6460_v0, %v3068_v28 }
0x1bf8   :  { %5576 = vtanh.f32 %v3069_v18  ;;  %v3070_v21 = vmul.f32 0.5, %v3069_v18 }
0x1bfa   :  { %5578 = vtanh.f32 %v3070_v21 }
0x1c02   :  { %v5577_v53 = vpop.eup %5576 }
0x1c03   :  { %3080 = vrot.lane.b32.xlu1 %v5577_v53, %s5657_s27 }
0x1c04   :  { %v5579_v63 = vpop.eup %5578 }
0x1c05   :  { %v3072_v6 = vadd.f32 1.0, %v5579_v63 }
0x1c07   :  { %v3073_v23 = vmul.f32 0.5, %v3072_v6 }
0x1c09   :  { %v3078_v24 = vmul.f32 %v3076_v62, %v3073_v23 }
0x1c75   :  { %v3081_v59 = vpop.permute.xlu1 %3080 }
0x1c76   :  { %v3083_v19 = vmul.f32 %v3081_v59, %v3073_v23 }
0x1c78   :  { %3085 = vrot.lane.b32.xlu0 %v3083_v19, %s5635_s6 }
0x1cea   :  { %v3086_v31 = vpop.permute.xlu0 %3085 }
0x1ceb   :  { %v3088_v32 = vadd.f32 %v3086_v31, %v3078_v24 }
0x1ced   :  { %5580 = vtanh.f32 %v3088_v32  ;;  %v3182_v52 = vrot.slane %v3088_v32, 6 }
0x1cf7   :  { %v5581_v1 = vpop.eup %5580 }
0x1cf8   :  { %3091 = vrot.lane.b32.xlu1 %v5581_v1, %s5651_s11 }
0x1d6a   :  { %v3092_v33 = vpop.permute.xlu1 %3091 }
0x1d6b   :  { %v3094_v34 = vmul.f32 %v3092_v33, %v3073_v23 }
0x1d6d   :  { %v3096_v35 = vrot.slane %v3094_v34, 2 }
0x1d6f   :  { %3097 = vrot.lane.b32.xlu0 %v3096_v35, %s5658_s28 }
0x1de1   :  { %v3098_v37 = vpop.permute.xlu0 %3097 }
0x1de2   :  { %4887 = vmatmul.mubr.msk.f32.vlgmr.msra.gmra.mrb[26].mxu0 %vm1877_vm15, %v3098_v37 }
0x1de3   :  { %5387 = vmatpush3.bf16.xpose.msk.msra.mxu0 %vm6065_vm0, %v6356_v29  ;;  %4924 = vmatprep.mubr.msk.f32.mxu0 %vm5638_vm14, %v5639_v20 }
0x1de4   :  { %5388 = vmatprep.subr.bf16.mxu0 %v5637_v27 }
0x1deb   :  { %5391 = vmatpush3.bf16.xpose.msk.msra.mxu0 %vm6065_vm0, %v6373_v36 }
0x1dec   :  { %5392 = vmatprep.subr.bf16.mxu0 %v5637_v27 }
0x1df3   :  { %5395 = vmatpush3.bf16.xpose.msk.msra.mxu0 %vm6065_vm0, %v6387_v42 }
0x1df4   :  { %5396 = vmatprep.subr.bf16.mxu0 %v5637_v27 }
0x1dfb   :  { %5399 = vmatpush3.bf16.xpose.msk.msra.mxu0 %vm6065_vm0, %v6399_v46 }
0x1dfc   :  { %5416 = vmatprep.subr.bf16.mxu0 %v5637_v27 }
0x1eb5   :  { %v3167_v38 = vpop.f32.mrb[26].mxu0 }
0x1eb6   :  { %v3172_v39 = vrot.slane %v3167_v38, 4  ;;  %v4888_v40 = vpop.f32.mrb[27].mxu0 }
0x1eb8   :  { %v3174_v41 = vadd.f32 %v3172_v39, %v6458_v61 }
0x1eba   :  { %v3175_v43 = vadd.f32 %v6460_v0, %v3174_v41 }
0x1ebc   :  { %5582 = vtanh.f32 %v3175_v43  ;;  %v3176_v45 = vmul.f32 0.5, %v3175_v43 }
0x1ebe   :  { %5584 = vtanh.f32 %v3176_v45 }
0x1ec6   :  { %v5583_v44 = vpop.eup %5582 }
0x1ec7   :  { %3186 = vrot.lane.b32.xlu1 %v5583_v44, %s5657_s27 }
0x1ec8   :  { %v5585_v47 = vpop.eup %5584 }
0x1ec9   :  { %v3178_v48 = vadd.f32 1.0, %v5585_v47 }
0x1ecb   :  { %v3179_v49 = vmul.f32 0.5, %v3178_v48 }
0x1ecd   :  { %v3184_v57 = vmul.f32 %v3182_v52, %v3179_v49 }
0x1f39   :  { %v3187_v50 = vpop.permute.xlu1 %3186 }
0x1f3a   :  { %v3189_v51 = vmul.f32 %v3187_v50, %v3179_v49 }
0x1f3c   :  { %3191 = vrot.lane.b32.xlu0 %v3189_v51, %s5635_s6 }
0x1fae   :  { %v3192_v26 = vpop.permute.xlu0 %3191 }
0x1faf   :  { %v3194_v60 = vadd.f32 %v3192_v26, %v3184_v57 }
0x1fb1   :  { %5586 = vtanh.f32 %v3194_v60  ;;  %v3288_v17 = vrot.slane %v3194_v60, 6 }
0x1fbb   :  { %v5587_v2 = vpop.eup %5586 }
0x1fbc   :  { %3197 = vrot.lane.b32.xlu1 %v5587_v2, %s5651_s11 }
0x202e   :  { %v3198_v3 = vpop.permute.xlu1 %3197 }
0x202f   :  { %v3200_v4 = vmul.f32 %v3198_v3, %v3179_v49 }
0x2031   :  { %v3202_v7 = vrot.slane %v3200_v4, 4 }
0x2033   :  { %3203 = vrot.lane.b32.xlu0 %v3202_v7, %s5658_s28 }
0x20a5   :  { %v3204_v54 = vpop.permute.xlu0 %3203 }
0x20a6   :  { %4906 = vmatmul.mubr.msk.f32.vlgmr.msra.gmra.mrb[18].mxu1 %vm1877_vm15, %v3204_v54 }
0x20a7   :  { %5403 = vmatpush3.bf16.xpose.msk.msra.mxu1 %vm6065_vm0, %v6356_v29  ;;  %4943 = vmatprep.mubr.msk.f32.mxu1 %vm5638_vm14, %v5639_v20 }
0x20a8   :  { %5404 = vmatprep.subr.bf16.mxu1 %v5637_v27 }
0x20af   :  { %5407 = vmatpush3.bf16.xpose.msk.msra.mxu1 %vm6065_vm0, %v6373_v36 }
0x20b0   :  { %5408 = vmatprep.subr.bf16.mxu1 %v5637_v27 }
0x20b7   :  { %5411 = vmatpush3.bf16.xpose.msk.msra.mxu1 %vm6065_vm0, %v6387_v42 }
0x20b8   :  { %5412 = vmatprep.subr.bf16.mxu1 %v5637_v27 }
0x20bf   :  { %5415 = vmatpush3.bf16.xpose.msk.msra.mxu1 %vm6065_vm0, %v6399_v46 }
0x20c0   :  { %5432 = vmatprep.subr.bf16.mxu1 %v5637_v27 }
0x2179   :  { %v3273_v55 = vpop.f32.mrb[18].mxu1 }
0x217a   :  { %v3278_v8 = vrot.slane %v3273_v55, 2  ;;  %v4907_v9 = vpop.f32.mrb[19].mxu1 }
0x217b   :  { %v284_v9 = vld [vmem:[%s3961_s20] sm:$0xff] }
0x217c   :  { %v3280_v10 = vadd.f32 %v3278_v8, %v6458_v61 }
0x217e   :  { %v3281_v5 = vadd.f32 %v6460_v0, %v3280_v10  ;;  %v285_v10 = vld [vmem:[%s3961_s20 + $0x8] sm:$0xff] }
0x2180   :  { %5588 = vtanh.f32 %v3281_v5  ;;  %v3282_v12 = vmul.f32 0.5, %v3281_v5  ;;  %v5449_v5 = vpack.c.bf16 %v285_v10, %v284_v9 }
0x2182   :  { %5590 = vtanh.f32 %v3282_v12  ;;  %v4066_v12 = vld [vmem:[%s3951_s24] ss:$0 sm:$0xff] }
0x218a   :  { %v5589_v11 = vpop.eup %5588 }
0x218b   :  { %3292 = vrot.lane.b32.xlu1 %v5589_v11, %s5657_s27 }
0x218c   :  { %v5591_v13 = vpop.eup %5590 }
0x218d   :  { %v3284_v30 = vadd.f32 1.0, %v5591_v13  ;;  %v1763_v13 = vadd.f32 %v4066_v12, %v6158_v22 }
0x218f   :  { %v3285_v14 = vmul.f32 0.5, %v3284_v30 }
0x2191   :  { %v3290_v25 = vmul.f32 %v3288_v17, %v3285_v14 }
0x21fd   :  { %v3293_v15 = vpop.permute.xlu1 %3292 }
0x21fe   :  { %v3295_v16 = vmul.f32 %v3293_v15, %v3285_v14 }
0x2200   :  { %3297 = vrot.lane.b32.xlu0 %v3295_v16, %s5635_s6 }
0x2272   :  { %v3298_v28 = vpop.permute.xlu0 %3297 }
0x2273   :  { %v3300_v18 = vadd.f32 %v3298_v28, %v3290_v25 }
0x2275   :  { %5592 = vtanh.f32 %v3300_v18  ;;  %v3391_v37 = vrot.slane %v3300_v18, 6 }
0x227f   :  { %v5593_v61 = vpop.eup %5592 }
0x2280   :  { %3303 = vrot.lane.b32.xlu1 %v5593_v61, %s5651_s11 }
0x22f2   :  { %v3304_v53 = vpop.permute.xlu1 %3303 }
0x22f3   :  { %v3306_v21 = vmul.f32 %v3304_v53, %v3285_v14 }
0x22f5   :  { %v3308_v63 = vrot.slane %v3306_v21, 6 }
0x22f7   :  { %3309 = vrot.lane.b32.xlu0 %v3308_v63, %s5658_s28 }
0x2369   :  { %v3310_v6 = vpop.permute.xlu0 %3309 }
0x236a   :  { %4925 = vmatmul.mubr.msk.f32.vlgmr.msra.gmra.mrb[28].mxu0 %vm1877_vm15, %v3310_v6 }
0x236b   :  { %5419 = vmatpush3.bf16.xpose.msk.msra.mxu0 %vm6065_vm0, %v6356_v29  ;;  %4962 = vmatprep.mubr.msk.f32.mxu0 %vm5638_vm14, %v5639_v20 }
0x236c   :  { %5420 = vmatprep.subr.bf16.mxu0 %v5637_v27 }
0x2373   :  { %5423 = vmatpush3.bf16.xpose.msk.msra.mxu0 %vm6065_vm0, %v6373_v36 }
0x2374   :  { %5424 = vmatprep.subr.bf16.mxu0 %v5637_v27 }
0x237b   :  { %5427 = vmatpush3.bf16.xpose.msk.msra.mxu0 %vm6065_vm0, %v6387_v42 }
0x237c   :  { %5428 = vmatprep.subr.bf16.mxu0 %v5637_v27 }
0x2383   :  { %5431 = vmatpush3.bf16.xpose.msk.msra.mxu0 %vm6065_vm0, %v6399_v46 }
0x2384   :  { %5448 = vmatprep.subr.bf16.mxu0 %v5637_v27 }
0x243d   :  { %v3379_v23 = vpop.f32.mrb[28].mxu0 }
0x243e   :  { %v3383_v59 = vadd.f32 %v3379_v23, %v6456_v58  ;;  %v4926_v19 = vpop.f32.mrb[29].mxu0 }
0x2440   :  { %v3384_v62 = vadd.f32 %v6460_v0, %v3383_v59 }
0x2442   :  { %5594 = vtanh.f32 %v3384_v62  ;;  %v3385_v31 = vmul.f32 0.5, %v3384_v62 }
0x2444   :  { %5596 = vtanh.f32 %v3385_v31 }
0x244c   :  { %v5595_v24 = vpop.eup %5594 }
0x244d   :  { %3395 = vrot.lane.b32.xlu1 %v5595_v24, %s5657_s27 }
0x244e   :  { %v5597_v32 = vpop.eup %5596 }
0x244f   :  { %v3387_v1 = vadd.f32 1.0, %v5597_v32 }
0x2451   :  { %v3388_v33 = vmul.f32 0.5, %v3387_v1 }
0x2453   :  { %v3393_v38 = vmul.f32 %v3391_v37, %v3388_v33 }
0x24bf   :  { %v3396_v34 = vpop.permute.xlu1 %3395 }
0x24c0   :  { %v3398_v35 = vmul.f32 %v3396_v34, %v3388_v33 }
0x24c2   :  { %3400 = vrot.lane.b32.xlu0 %v3398_v35, %s5635_s6 }
0x2534   :  { %v3401_v39 = vpop.permute.xlu0 %3400 }
0x2535   :  { %v3403_v40 = vadd.f32 %v3401_v39, %v3393_v38 }
0x2537   :  { %5598 = vtanh.f32 %v3403_v40 }
0x2541   :  { %v5599_v41 = vpop.eup %5598 }
0x2542   :  { %3406 = vrot.lane.b32.xlu1 %v5599_v41, %s5651_s11 }
0x25b4   :  { %v3407_v43 = vpop.permute.xlu1 %3406 }
0x25b5   :  { %v3409_v44 = vmul.f32 %v3407_v43, %v3388_v33 }
0x25b7   :  { %3411 = vrot.lane.b32.xlu0 %v3409_v44, %s5658_s28 }
0x2629   :  { %v3412_v45 = vpop.permute.xlu0 %3411 }
0x262a   :  { %4944 = vmatmul.mubr.msk.f32.vlgmr.msra.gmra.mrb[20].mxu1 %vm1877_vm15, %v3412_v45 }
0x262b   :  { %5435 = vmatpush3.bf16.xpose.msk.msra.mxu1 %vm6065_vm0, %v6356_v29  ;;  %4981 = vmatprep.mubr.msk.f32.mxu1 %vm5638_vm14, %v5639_v20 }
0x262c   :  { %5436 = vmatprep.subr.bf16.mxu1 %v5637_v27 }
0x2633   :  { %5439 = vmatpush3.bf16.xpose.msk.msra.mxu1 %vm6065_vm0, %v6373_v36 }
0x2634   :  { %5440 = vmatprep.subr.bf16.mxu1 %v5637_v27 }
0x263b   :  { %5443 = vmatpush3.bf16.xpose.msk.msra.mxu1 %vm6065_vm0, %v6387_v42 }
0x263c   :  { %5444 = vmatprep.subr.bf16.mxu1 %v5637_v27 }
0x2643   :  { %5447 = vmatpush3.bf16.xpose.msk.msra.mxu1 %vm6065_vm0, %v6399_v46  ;;  %v3496_v46 = vrot.slane %v3403_v40, 6 }
0x26fd   :  { %v3481_v29 = vpop.f32.mrb[20].mxu1 }
0x26fe   :  { %v3486_v47 = vrot.slane %v3481_v29, 6  ;;  %v4945_v48 = vpop.f32.mrb[21].mxu1 }
0x2700   :  { %v3488_v49 = vadd.f32 %v3486_v47, %v6456_v58 }
0x2702   :  { %v3489_v50 = vadd.f32 %v6460_v0, %v3488_v49 }
0x2704   :  { %5600 = vtanh.f32 %v3489_v50  ;;  %v3490_v51 = vmul.f32 0.5, %v3489_v50 }
0x2706   :  { %5602 = vtanh.f32 %v3490_v51 }
0x270e   :  { %v5601_v36 = vpop.eup %5600 }
0x270f   :  { %3500 = vrot.lane.b32.xlu1 %v5601_v36, %s5657_s27 }
0x2710   :  { %v5603_v42 = vpop.eup %5602 }
0x2711   :  { %v3492_v52 = vadd.f32 1.0, %v5603_v42 }
0x2713   :  { %v3493_v57 = vmul.f32 0.5, %v3492_v52 }
0x2715   :  { %v3498_v2 = vmul.f32 %v3496_v46, %v3493_v57 }
0x2781   :  { %v3501_v26 = vpop.permute.xlu1 %3500 }
0x2782   :  { %v3503_v60 = vmul.f32 %v3501_v26, %v3493_v57 }
0x2784   :  { %3505 = vrot.lane.b32.xlu0 %v3503_v60, %s5635_s6 }
0x27f6   :  { %v3506_v3 = vpop.permute.xlu0 %3505 }
0x27f7   :  { %v3508_v4 = vadd.f32 %v3506_v3, %v3498_v2 }
0x27f9   :  { %5604 = vtanh.f32 %v3508_v4  ;;  %v3602_v63 = vrot.slane %v3508_v4, 6 }
0x2803   :  { %v5605_v7 = vpop.eup %5604 }
0x2804   :  { %3511 = vrot.lane.b32.xlu1 %v5605_v7, %s5651_s11 }
0x2876   :  { %v3512_v54 = vpop.permute.xlu1 %3511 }
0x2877   :  { %v3514_v55 = vmul.f32 %v3512_v54, %v3493_v57 }
0x2879   :  { %v3516_v8 = vrot.slane %v3514_v55, 2 }
0x287b   :  { %3517 = vrot.lane.b32.xlu0 %v3516_v8, %s5658_s28 }
0x28ed   :  { %v3518_v11 = vpop.permute.xlu0 %3517 }
0x28ee   :  { %4963 = vmatmul.mubr.msk.f32.vlgmr.msra.gmra.mrb[30].mxu0 %vm1877_vm15, %v3518_v11 }
0x28ef   :  { %5451 = vmatpush3.bf16.xpose.msk.msra.mxu0 %vm6065_vm0, %v5449_v5  ;;  %4988 = vmatprep.mubr.msk.f32.mxu0 %vm5638_vm14, %v5639_v20 }
0x28f0   :  { %5452 = vmatprep.subr.bf16.mxu0 %v5637_v27 }
0x28f6   :  { %4989 = vmatmul.mubr.msk.f32.vlgmr.msra.gmra.mrb[32].mxu0 %vm1877_vm15, %v1763_v13 }
0x28f7   :  { %4995 = vmatprep.mubr.msk.f32.mxu0 %vm5638_vm14, %v5639_v20 }
0x29c1   :  { %v3587_v30 = vpop.f32.mrb[30].mxu0 }
0x29c2   :  { %v3592_v14 = vrot.slane %v3587_v30, 4  ;;  %v4964_v15 = vpop.f32.mrb[31].mxu0 }
0x29c4   :  { %v3594_v16 = vadd.f32 %v3592_v14, %v6456_v58 }
0x29c6   :  { %v3595_v17 = vadd.f32 %v6460_v0, %v3594_v16 }
0x29c8   :  { %5606 = vtanh.f32 %v3595_v17  ;;  %v3596_v22 = vmul.f32 0.5, %v3595_v17 }
0x29c9   :  { %v6610_v25 = vpop.f32.mrb[32].mxu0 }
0x29ca   :  { %v4990_v28 = vpop.f32.mrb[33].mxu0  ;;  %5608 = vtanh.f32 %v3596_v22 }
0x29d2   :  { %v5607_v27 = vpop.eup %5606 }
0x29d3   :  { %3606 = vrot.lane.b32.xlu1 %v5607_v27, %s5657_s27 }
0x29d4   :  { %v5609_v18 = vpop.eup %5608 }
0x29d5   :  { %v3598_v61 = vadd.f32 1.0, %v5609_v18 }
0x29d7   :  { %v3599_v53 = vmul.f32 0.5, %v3598_v61 }
0x29d9   :  { %v3604_v6 = vmul.f32 %v3602_v63, %v3599_v53 }
0x2a45   :  { %v3607_v20 = vpop.permute.xlu1 %3606 }
0x2a46   :  { %v3609_v21 = vmul.f32 %v3607_v20, %v3599_v53 }
0x2a48   :  { %3611 = vrot.lane.b32.xlu0 %v3609_v21, %s5635_s6 }
0x2aba   :  { %v3612_v23 = vpop.permute.xlu0 %3611 }
0x2abb   :  { %v3614_v59 = vadd.f32 %v3612_v23, %v3604_v6 }
0x2abd   :  { %5610 = vtanh.f32 %v3614_v59  ;;  %v3708_v29 = vrot.slane %v3614_v59, 6 }
0x2ac7   :  { %v5611_v19 = vpop.eup %5610 }
0x2ac8   :  { %3617 = vrot.lane.b32.xlu1 %v5611_v19, %s5651_s11 }
0x2b3a   :  { %v3618_v62 = vpop.permute.xlu1 %3617 }
0x2b3b   :  { %v3620_v24 = vmul.f32 %v3618_v62, %v3599_v53 }
0x2b3d   :  { %v3622_v31 = vrot.slane %v3620_v24, 4 }
0x2b3f   :  { %3623 = vrot.lane.b32.xlu0 %v3622_v31, %s5658_s28 }
0x2bb1   :  { %v3624_v32 = vpop.permute.xlu0 %3623 }
0x2bb2   :  { %4982 = vmatmul.mubr.msk.f32.vlgmr.msra.gmra.mrb[22].mxu1 %vm1877_vm15, %v3624_v32 }
0x2c85   :  { %v3693_v1 = vpop.f32.mrb[22].mxu1 }
0x2c86   :  { %v3698_v33 = vrot.slane %v3693_v1, 2  ;;  %v4983_v34 = vpop.f32.mrb[23].mxu1 }
0x2c88   :  { %v3700_v35 = vadd.f32 %v3698_v33, %v6456_v58  ;;  %v282_v58 = vld [vmem:[%s3960_s30] sm:$0xff] }
0x2c8a   :  { %v3701_v37 = vadd.f32 %v6460_v0, %v3700_v35  ;;  %v283_v0 = vld [vmem:[%s3960_s30 + $0x8] sm:$0xff] }
0x2c8b   :  { %v5453_v36 = vpack.c.bf16 %v283_v0, %v282_v58 }
0x2c8c   :  { %5612 = vtanh.f32 %v3701_v37  ;;  %v3702_v39 = vmul.f32 0.5, %v3701_v37 }
0x2c8d   :  { %5455 = vmatpush3.bf16.xpose.msk.msra.mxu0 %vm6065_vm0, %v5453_v36 }
0x2c8e   :  { %5614 = vtanh.f32 %v3702_v39 }
0x2c96   :  { %v5613_v38 = vpop.eup %5612 }
0x2c97   :  { %3712 = vrot.lane.b32.xlu1 %v5613_v38, %s5657_s27 }
0x2c98   :  { %v5615_v40 = vpop.eup %5614 }
0x2c99   :  { %v3704_v41 = vadd.f32 1.0, %v5615_v40 }
0x2c9b   :  { %v3705_v43 = vmul.f32 0.5, %v3704_v41 }
0x2c9d   :  { %v3710_v47 = vmul.f32 %v3708_v29, %v3705_v43 }
0x2d09   :  { %v3713_v44 = vpop.permute.xlu1 %3712 }
0x2d0a   :  { %v3715_v45 = vmul.f32 %v3713_v44, %v3705_v43 }
0x2d0c   :  { %3717 = vrot.lane.b32.xlu0 %v3715_v45, %s5635_s6  ;;  %s5666_s6 = smov 42  }
0x2d0d   :  { %s3962_s2 = sld [smem:[%s6642_s0 + %s5666_s6]]  }
0x2d13   :  { %v4242_v56 = vld [vmem:[%s3962_s2] ss:$0 sm:$0xff] }
0x2d7e   :  { %v3718_v48 = vpop.permute.xlu0 %3717 }
0x2d7f   :  { %v3720_v49 = vadd.f32 %v3718_v48, %v3710_v47 }
0x2d81   :  { %5616 = vtanh.f32 %v3720_v49 }
0x2d8b   :  { %v5617_v50 = vpop.eup %5616 }
0x2d8c   :  { %3723 = vrot.lane.b32.xlu1 %v5617_v50, %s5651_s11  ;;  %s3963_s11 = sld [smem:[%s6642_s0 + %s5667_s3]]  }
0x2d92   :  { %v4243_v2 = vld [vmem:[%s3963_s11] ss:$0 sm:$0xff] }
0x2dfe   :  { %v3724_v51 = vpop.permute.xlu1 %3723 }
0x2dff   :  { %v3726_v42 = vmul.f32 %v3724_v51, %v3705_v43 }
0x2e01   :  { %v3807_v52 = vrot.slane %v3726_v42, 6 }
0x2e03   :  { %3808 = vrot.lane.b32.xlu0 %v3807_v52, %s5658_s28  ;;  %s5668_s28 = smov 45  }
0x2e04   :  { %s3965_s8 = sld [smem:[%s6642_s0 + %s5668_s28]]  }
0x2e75   :  { %v3809_v57 = vpop.permute.xlu0 %3808 }
0x2e76   :  { %4996 = vmatmul.mubr.msk.f32.vlgmr.msra.gmra.mrb[34].mxu0 %vm1877_vm15, %v3809_v57 }
0x2f49   :  { %v3884_v26 = vpop.f32.mrb[34].mxu0 }
0x2f4a   :  { %v3885_v60 = vadd.f32 %v3884_v26, %v6610_v25  ;;  %v4997_v46 = vpop.f32.mrb[35].mxu0 }
0x2f4c   :  { %v3894_v3 = vadd.f32 %v4242_v56, %v3885_v60 }
0x2f4e   :  { %v3901_v4 = vmul.f32 %v4243_v2, %v3894_v3 }
0x2f50   :  { %v3903_v7 = vsel %vm3902_vm4, %v3901_v4, 0.0 }
0x2f51   :  { %3904 = vadd.xlane.f32.xlu1 %v3903_v7 }
0x2fde   :  { %v3905_v54 = vpop.xlane.xlu1 %3904 }
0x2fdf   :  { %v3906_v55 = vmul.f32 0.5, %v3905_v54  ;;  %3912 = vst.msk [vmem:[%s3965_s8] sm:$0x3] %vm3910_vm5, %v3905_v54 }
0x2fe1   :  { %5618 = vtanh.f32 %v3906_v55 }
0x2feb   :  { %v5619_v8 = vpop.eup %5618 }
0x2fec   :  { %v3908_v9 = vadd.f32 1.0, %v5619_v8 }
0x2fee   :  { %v3909_v10 = vmul.f32 0.5, %v3908_v9 }
0x2ff0   :  { %3911 = vst.msk [vmem:[%s3964_s13] sm:$0x3] %vm3910_vm5, %v3909_v10 }

</bundles_post_ra>
